<compile_context>
chip_gen: v7x
topology: tpu7x:2x2x1
jax: 0.10.0
libtpu: 0.0.40
codegen_flags: <defaults>
</compile_context>

<pallas_src>
import functools

import jax
import jax.numpy as jnp
from jax.experimental import pallas as pl
from jax.experimental.pallas import tpu as pltpu


def _fuse_conv_gru_kernel(*refs, H, W, K, Cx, Cout, has_h):
    if has_h:
        xd_ref, h_ref, w_ref, aux_ref, out_ref = refs
    else:
        xd_ref, w_ref, aux_ref, out_ref = refs
        h_ref = None

    Nb = xd_ref.shape[0]
    M = Nb * H * W
    Ct = 2 * Cx + 1                      # per-tap columns: [x (Cx), d (1), xm (Cx)]

    aux = aux_ref[...].astype(jnp.float32)   # (3, 2*Cout)
    bias = aux[0:1, :]                       # (1, 2*Cout): [b_gate | b_hidden]
    wdh = aux[1:2, :Cout]                    # (1, Cout)  1x1 d_conv_hidden weight
    bdh = aux[2:3, :Cout]                    # (1, Cout)  1x1 d_conv_hidden bias

    xd = xd_ref[...]                         # (Nb, Hp, Wp, Cx+1), input dtype

    # d_conv_hidden (1x1) + sigmoid gate on x.  Padded border rows/cols of x
    # are zero, so the gated product stays zero there (matches zero padding of
    # the hidden conv).
    d_f32 = xd[..., Cx:Cx + 1].astype(jnp.float32)        # (Nb, Hp, Wp, 1)
    d_gate = jax.nn.sigmoid(d_f32 * wdh + bdh)            # (Nb, Hp, Wp, Cout)
    xm = (xd[..., :Cx].astype(jnp.float32) * d_gate).astype(xd.dtype)

    # im2col: build one (M, K*K*Ct) tap matrix and do a single fused matmul
    # for both the gate conv ([x, d] taps) and hidden conv (xm taps).
    xmd = jnp.concatenate([xd, xm], axis=-1)              # (Nb, Hp, Wp, Ct)
    pieces = []
    for ky in range(K):
        for kx in range(K):
            pieces.append(xmd[:, ky:ky + H, kx:kx + W, :].reshape(M, Ct))
    taps = jnp.concatenate(pieces, axis=-1)               # (M, K*K*Ct)

    res = jnp.dot(taps, w_ref[...],
                  preferred_element_type=jnp.float32)     # (M, 2*Cout) f32
    res = res + bias

    gate = jax.nn.sigmoid(res[:, :Cout])                  # (M, Cout)
    hid = res[:, Cout:]
    # g(x) = where(x >= 0, x + 0.5, sigmoid(x))
    hidden = jnp.where(hid >= 0.0, hid + 0.5, jax.nn.sigmoid(hid))

    if has_h:
        h = h_ref[...].astype(jnp.float32).reshape(M, Cout)
        out = h + gate * (hidden - h)       # torch.lerp(prev_h, hidden, gate)
    else:
        out = hidden * gate                 # h=None branch

    out_ref[...] = out.reshape(Nb, H, W, Cout).astype(out_ref.dtype)


def _pick_batch_block(N, bytes_per_image, budget=4 * 1024 * 1024):
    """Largest divisor of N that fits the per-step budget, keeping grid >= 2."""
    nb = max(1, min(N, budget // max(bytes_per_image, 1)))
    if N >= 2:
        nb = min(nb, N // 2)     # keep >=2 grid steps: pipelining + 2 TCs (v7x)
    nb = max(nb, 1)
    while N % nb:
        nb -= 1
    return max(nb, 1)


def fuse_conv_gru2d(x, d, params, h=None, *, kernel_size=3, padding=1):
    """x: (N, Cx, H, W), d: (N, 1, H, W), h: (N, Cout, H, W) or None. NCHW."""
    N, Cx, H, W = x.shape
    Cout = params["b_gate"].shape[0]
    assert Cx == Cout, "PyTorch forward requires channels_x == channels_out"
    K, p = kernel_size, padding
    Hp, Wp = H + 2 * p, W + 2 * p
    Ct = 2 * Cx + 1
    Kdim = K * K * Ct
    cdt = x.dtype                    # matmul / tap dtype follows the input
    itemsize = jnp.dtype(cdt).itemsize

    # NCHW -> NHWC, fold d in as channel Cx, zero-pad spatially.
    x_nhwc = jnp.transpose(x, (0, 2, 3, 1))
    d_nhwc = jnp.transpose(d, (0, 2, 3, 1)).astype(cdt)
    xd = jnp.concatenate([x_nhwc, d_nhwc], axis=-1)
    xd = jnp.pad(xd, ((0, 0), (p, p), (p, p), (0, 0)))

    has_h = h is not None
    if has_h:
        h_nhwc = jnp.transpose(h, (0, 2, 3, 1))

    # Fused conv weight.  torch conv weights are (O, I, kh, kw); tap rows per
    # (ky, kx) are ordered [x channels, d, xm channels]; gate conv outputs go
    # to columns [:Cout], hidden conv outputs to columns [Cout:].
    wg = jnp.transpose(params["w_gate"], (2, 3, 1, 0))      # (K, K, Cx+1, Cout)
    wh = jnp.transpose(params["w_hidden"], (2, 3, 1, 0))    # (K, K, Cx,   Cout)
    wpack = jnp.zeros((K, K, Ct, 2 * Cout), cdt)
    wpack = wpack.at[:, :, :Cx + 1, :Cout].set(wg.astype(cdt))
    wpack = wpack.at[:, :, Cx + 1:, Cout:].set(wh.astype(cdt))
    wpack = wpack.reshape(Kdim, 2 * Cout)

    # Pack the small per-channel vectors into one input (fewer tiny DMAs).
    aux = jnp.zeros((3, 2 * Cout), jnp.float32)
    aux = aux.at[0, :Cout].set(params["b_gate"].astype(jnp.float32))
    aux = aux.at[0, Cout:].set(params["b_hidden"].astype(jnp.float32))
    aux = aux.at[1, :Cout].set(params["w_dh"].reshape(Cout).astype(jnp.float32))
    aux = aux.at[2, :Cout].set(params["b_dh"].astype(jnp.float32))

    per_image = (Hp * Wp * (Cx + 1) + 2 * H * W * Cout) * itemsize \
        + H * W * Kdim * itemsize
    Nb = _pick_batch_block(N, per_image)
    grid = (N // Nb,)

    kernel = functools.partial(_fuse_conv_gru_kernel, H=H, W=W, K=K,
                               Cx=Cx, Cout=Cout, has_h=has_h)

    in_specs = [pl.BlockSpec((Nb, Hp, Wp, Cx + 1), lambda n: (n, 0, 0, 0))]
    inputs = [xd]
    if has_h:
        in_specs.append(pl.BlockSpec((Nb, H, W, Cout), lambda n: (n, 0, 0, 0)))
        inputs.append(h_nhwc)
    in_specs += [
        pl.BlockSpec((Kdim, 2 * Cout), lambda n: (0, 0)),
        pl.BlockSpec((3, 2 * Cout), lambda n: (0, 0)),
    ]
    inputs += [wpack, aux]

    h_bytes = (N * H * W * Cout * itemsize) if has_h else 0
    bytes_accessed = int(xd.size * itemsize + h_bytes + wpack.size * itemsize
                         + aux.size * 4 + N * H * W * Cout * itemsize)
    cost = pl.CostEstimate(
        flops=int(2 * N * H * W * Kdim * (2 * Cout) + 12 * N * H * W * Cout),
        transcendentals=int(N * (Hp * Wp + 2 * H * W) * Cout),
        bytes_accessed=bytes_accessed)

    # Explicit scoped-VMEM budget: double-buffered blocks + im2col scratch,
    # clamped to the v7x 64 MiB physical VMEM (half of v5e/v6e).
    step_bytes = 2 * Nb * (Hp * Wp * (Cx + 1) + 2 * H * W * Cout) * itemsize \
        + 4 * Nb * H * W * Kdim * itemsize + 2 * Kdim * 2 * Cout * itemsize
    vmem_limit = int(min(max(2 * step_bytes, 32 * 1024 * 1024),
                         64 * 1024 * 1024))

    out_nhwc = pl.pallas_call(
        kernel,
        out_shape=jax.ShapeDtypeStruct((N, H, W, Cout), x.dtype),
        grid_spec=pltpu.PrefetchScalarGridSpec(
            num_scalar_prefetch=0,
            grid=grid,
            in_specs=in_specs,
            out_specs=pl.BlockSpec((Nb, H, W, Cout), lambda n: (n, 0, 0, 0)),
        ),
        compiler_params=pltpu.CompilerParams(
            dimension_semantics=("parallel",),
            vmem_limit_bytes=vmem_limit),
        cost_estimate=cost,
    )(*inputs)

    return jnp.transpose(out_nhwc, (0, 3, 1, 2))


def reference(x, d, params, h=None):
    """Pure-JAX NCHW reference mirroring the PyTorch forward."""
    dn = ("NCHW", "OIHW", "NCHW")

    def conv(inp, w, pad):
        return jax.lax.conv_general_dilated(
            inp, w, (1, 1), [(pad, pad), (pad, pad)], dimension_numbers=dn)

    def bias(b):
        return b[None, :, None, None]

    combined = jnp.concatenate([x, d], axis=1)
    gate = conv(combined, params["w_gate"], 1) + bias(params["b_gate"])
    d_hidden = conv(d, params["w_dh"], 0) + bias(params["b_dh"])
    hidden = conv(x * jax.nn.sigmoid(d_hidden), params["w_hidden"], 1) \
        + bias(params["b_hidden"])
    hidden = jnp.where(hidden >= 0, hidden + 0.5, jax.nn.sigmoid(hidden))
    gate = jax.nn.sigmoid(gate)
    return h + gate * (hidden - h) if h is not None else hidden * gate


if __name__ == "__main__":
    N, Cx, Cout, H, W = 2, 8, 8, 16, 16
    K = 3
    key = jax.random.PRNGKey(0)
    keys = jax.random.split(key, 9)
    s = 0.1
    params = {
        "w_gate":   s * jax.random.normal(keys[0], (Cout, Cx + 1, K, K), jnp.float32),
        "b_gate":   s * jax.random.normal(keys[1], (Cout,), jnp.float32),
        "w_dh":     s * jax.random.normal(keys[2], (Cout, 1, 1, 1), jnp.float32),
        "b_dh":     s * jax.random.normal(keys[3], (Cout,), jnp.float32),
        "w_hidden": s * jax.random.normal(keys[4], (Cout, Cx, K, K), jnp.float32),
        "b_hidden": s * jax.random.normal(keys[5], (Cout,), jnp.float32),
    }
    x = jax.random.normal(keys[6], (N, Cx, H, W), jnp.float32)
    d = jax.random.normal(keys[7], (N, 1, H, W), jnp.float32)
    h = jax.random.normal(keys[8], (N, Cout, H, W), jnp.float32)

    # with previous hidden state: lerp(prev_h, hidden, gate)
    out = fuse_conv_gru2d(x, d, params, h)
    jax.block_until_ready(out)
    ref = reference(x, d, params, h)
    assert out.shape == (N, Cout, H, W)
    assert jnp.allclose(out, ref, atol=1e-4, rtol=1e-4), \
        float(jnp.max(jnp.abs(out - ref)))

    # h=None branch (hidden * gate), compiled without the h input
    out0 = fuse_conv_gru2d(x, d, params, None)
    jax.block_until_ready(out0)
    ref0 = reference(x, d, params, None)
    assert jnp.allclose(out0, ref0, atol=1e-4, rtol=1e-4), \
        float(jnp.max(jnp.abs(out0 - ref0)))

    print("KERNEL_OK")
</pallas_src>

<mosaic_0001>
module attributes {stable_mosaic.version = 11 : i64} {
  func.func @_fuse_conv_gru_kernel(%arg0: i32, %arg1: memref<1x18x18x9xf32, #tpu.memory_space<vmem>>, %arg2: memref<1x16x16x8xf32, #tpu.memory_space<vmem>>, %arg3: memref<153x16xf32, #tpu.memory_space<vmem>>, %arg4: memref<3x16xf32, #tpu.memory_space<vmem>>, %arg5: memref<1x16x16x8xf32, #tpu.memory_space<vmem>>) attributes {dimension_semantics = [#tpu.dimension_semantics<parallel>], iteration_bounds = array<i64: 2>, scalar_prefetch = 0 : i64, scratch_operands = 0 : i64, tpu.core_type = #tpu.core_type<tc>, window_params = [{transform_indices = @transform_0, window_bounds = array<i64: 1, 18, 18, 9>}, {transform_indices = @transform_1, window_bounds = array<i64: 1, 16, 16, 8>}, {pipeline_mode = #tpu.pipeline_mode<synchronous>, transform_indices = @transform_2, window_bounds = array<i64: 153, 16>}, {pipeline_mode = #tpu.pipeline_mode<synchronous>, transform_indices = @transform_3, window_bounds = array<i64: 3, 16>}, {transform_indices = @transform_4, window_bounds = array<i64: 1, 16, 16, 8>}]} {
    %c0 = arith.constant 0 : index
    %c0_0 = arith.constant 0 : index
    %0 = vector.load %arg4[%c0, %c0_0] : memref<3x16xf32, #tpu.memory_space<vmem>>, vector<3x16xf32>
    %1 = vector.extract_strided_slice %0 {offsets = [0, 0], sizes = [1, 16], strides = [1, 1]} : vector<3x16xf32> to vector<1x16xf32>
    %2 = vector.extract_strided_slice %0 {offsets = [1, 0], sizes = [1, 8], strides = [1, 1]} : vector<3x16xf32> to vector<1x8xf32>
    %3 = vector.extract_strided_slice %0 {offsets = [2, 0], sizes = [1, 8], strides = [1, 1]} : vector<3x16xf32> to vector<1x8xf32>
    %c0_1 = arith.constant 0 : index
    %c0_2 = arith.constant 0 : index
    %c0_3 = arith.constant 0 : index
    %c0_4 = arith.constant 0 : index
    %4 = vector.load %arg1[%c0_1, %c0_2, %c0_3, %c0_4] : memref<1x18x18x9xf32, #tpu.memory_space<vmem>>, vector<1x18x18x9xf32>
    %5 = vector.extract_strided_slice %4 {offsets = [0, 0, 0, 8], sizes = [1, 18, 18, 1], strides = [1, 1, 1, 1]} : vector<1x18x18x9xf32> to vector<1x18x18x1xf32>
    %6 = vector.shape_cast %2 : vector<1x8xf32> to vector<1x1x1x8xf32>
    %7 = vector.broadcast %5 : vector<1x18x18x1xf32> to vector<1x18x18x8xf32>
    %8 = vector.broadcast %6 : vector<1x1x1x8xf32> to vector<1x18x18x8xf32>
    %9 = arith.mulf %7, %8 : vector<1x18x18x8xf32>
    %10 = vector.shape_cast %3 : vector<1x8xf32> to vector<1x1x1x8xf32>
    %11 = vector.broadcast %10 : vector<1x1x1x8xf32> to vector<1x18x18x8xf32>
    %12 = arith.addf %9, %11 : vector<1x18x18x8xf32>
    %13 = arith.negf %12 : vector<1x18x18x8xf32>
    %14 = math.exp %13 : vector<1x18x18x8xf32>
    %cst = arith.constant 1.000000e+00 : f32
    %15 = vector.broadcast %cst : f32 to vector<1x18x18x8xf32>
    %16 = arith.addf %15, %14 : vector<1x18x18x8xf32>
    %17 = arith.divf %15, %16 : vector<1x18x18x8xf32>
    %18 = vector.extract_strided_slice %4 {offsets = [0, 0, 0, 0], sizes = [1, 18, 18, 8], strides = [1, 1, 1, 1]} : vector<1x18x18x9xf32> to vector<1x18x18x8xf32>
    %19 = arith.mulf %18, %17 : vector<1x18x18x8xf32>
    %20 = tpu.concatenate %4, %19 in 3 : vector<1x18x18x9xf32>, vector<1x18x18x8xf32> -> vector<1x18x18x17xf32>
    %21 = vector.extract_strided_slice %20 {offsets = [0, 0, 0, 0], sizes = [1, 16, 16, 17], strides = [1, 1, 1, 1]} : vector<1x18x18x17xf32> to vector<1x16x16x17xf32>
    %22 = vector.shape_cast %21 : vector<1x16x16x17xf32> to vector<256x17xf32>
    %23 = vector.extract_strided_slice %20 {offsets = [0, 0, 1, 0], sizes = [1, 16, 16, 17], strides = [1, 1, 1, 1]} : vector<1x18x18x17xf32> to vector<1x16x16x17xf32>
    %24 = vector.shape_cast %23 : vector<1x16x16x17xf32> to vector<256x17xf32>
    %25 = vector.extract_strided_slice %20 {offsets = [0, 0, 2, 0], sizes = [1, 16, 16, 17], strides = [1, 1, 1, 1]} : vector<1x18x18x17xf32> to vector<1x16x16x17xf32>
    %26 = vector.shape_cast %25 : vector<1x16x16x17xf32> to vector<256x17xf32>
    %27 = vector.extract_strided_slice %20 {offsets = [0, 1, 0, 0], sizes = [1, 16, 16, 17], strides = [1, 1, 1, 1]} : vector<1x18x18x17xf32> to vector<1x16x16x17xf32>
    %28 = vector.shape_cast %27 : vector<1x16x16x17xf32> to vector<256x17xf32>
    %29 = vector.extract_strided_slice %20 {offsets = [0, 1, 1, 0], sizes = [1, 16, 16, 17], strides = [1, 1, 1, 1]} : vector<1x18x18x17xf32> to vector<1x16x16x17xf32>
    %30 = vector.shape_cast %29 : vector<1x16x16x17xf32> to vector<256x17xf32>
    %31 = vector.extract_strided_slice %20 {offsets = [0, 1, 2, 0], sizes = [1, 16, 16, 17], strides = [1, 1, 1, 1]} : vector<1x18x18x17xf32> to vector<1x16x16x17xf32>
    %32 = vector.shape_cast %31 : vector<1x16x16x17xf32> to vector<256x17xf32>
    %33 = vector.extract_strided_slice %20 {offsets = [0, 2, 0, 0], sizes = [1, 16, 16, 17], strides = [1, 1, 1, 1]} : vector<1x18x18x17xf32> to vector<1x16x16x17xf32>
    %34 = vector.shape_cast %33 : vector<1x16x16x17xf32> to vector<256x17xf32>
    %35 = vector.extract_strided_slice %20 {offsets = [0, 2, 1, 0], sizes = [1, 16, 16, 17], strides = [1, 1, 1, 1]} : vector<1x18x18x17xf32> to vector<1x16x16x17xf32>
    %36 = vector.shape_cast %35 : vector<1x16x16x17xf32> to vector<256x17xf32>
    %37 = vector.extract_strided_slice %20 {offsets = [0, 2, 2, 0], sizes = [1, 16, 16, 17], strides = [1, 1, 1, 1]} : vector<1x18x18x17xf32> to vector<1x16x16x17xf32>
    %38 = vector.shape_cast %37 : vector<1x16x16x17xf32> to vector<256x17xf32>
    %39 = tpu.concatenate %22, %24, %26, %28, %30, %32, %34, %36, %38 in 1 : vector<256x17xf32>, vector<256x17xf32>, vector<256x17xf32>, vector<256x17xf32>, vector<256x17xf32>, vector<256x17xf32>, vector<256x17xf32>, vector<256x17xf32>, vector<256x17xf32> -> vector<256x153xf32>
    %c0_5 = arith.constant 0 : index
    %c0_6 = arith.constant 0 : index
    %40 = vector.load %arg3[%c0_5, %c0_6] : memref<153x16xf32, #tpu.memory_space<vmem>>, vector<153x16xf32>
    %cst_7 = arith.constant dense<0.000000e+00> : vector<256x16xf32>
    %41 = tpu.matmul %39, %40, %cst_7 {dimension_numbers = #tpu.dot_dimension_numbers<[1], [0], [0], [1], [0, 0, 1, 1], [], []>} : vector<256x153xf32>, vector<153x16xf32>, vector<256x16xf32> -> vector<256x16xf32>
    %42 = vector.broadcast %1 : vector<1x16xf32> to vector<256x16xf32>
    %43 = arith.addf %41, %42 : vector<256x16xf32>
    %44 = vector.extract_strided_slice %43 {offsets = [0, 0], sizes = [256, 8], strides = [1, 1]} : vector<256x16xf32> to vector<256x8xf32>
    %45 = arith.negf %44 : vector<256x8xf32>
    %46 = math.exp %45 : vector<256x8xf32>
    %cst_8 = arith.constant 1.000000e+00 : f32
    %47 = vector.broadcast %cst_8 : f32 to vector<256x8xf32>
    %48 = arith.addf %47, %46 : vector<256x8xf32>
    %49 = arith.divf %47, %48 : vector<256x8xf32>
    %50 = vector.extract_strided_slice %43 {offsets = [0, 8], sizes = [256, 8], strides = [1, 1]} : vector<256x16xf32> to vector<256x8xf32>
    %cst_9 = arith.constant 0.000000e+00 : f32
    %51 = vector.broadcast %cst_9 : f32 to vector<256x8xf32>
    %52 = arith.cmpf oge, %50, %51 : vector<256x8xf32>
    %cst_10 = arith.constant 5.000000e-01 : f32
    %53 = vector.broadcast %cst_10 : f32 to vector<256x8xf32>
    %54 = arith.addf %50, %53 : vector<256x8xf32>
    %55 = arith.negf %50 : vector<256x8xf32>
    %56 = math.exp %55 : vector<256x8xf32>
    %cst_11 = arith.constant 1.000000e+00 : f32
    %57 = vector.broadcast %cst_11 : f32 to vector<256x8xf32>
    %58 = arith.addf %57, %56 : vector<256x8xf32>
    %59 = arith.divf %57, %58 : vector<256x8xf32>
    %60 = arith.select %52, %54, %59 : vector<256x8xi1>, vector<256x8xf32>
    %c0_12 = arith.constant 0 : index
    %c0_13 = arith.constant 0 : index
    %c0_14 = arith.constant 0 : index
    %c0_15 = arith.constant 0 : index
    %61 = vector.load %arg2[%c0_12, %c0_13, %c0_14, %c0_15] : memref<1x16x16x8xf32, #tpu.memory_space<vmem>>, vector<1x16x16x8xf32>
    %62 = vector.shape_cast %61 : vector<1x16x16x8xf32> to vector<256x8xf32>
    %63 = arith.subf %60, %62 : vector<256x8xf32>
    %64 = arith.mulf %49, %63 : vector<256x8xf32>
    %65 = arith.addf %62, %64 : vector<256x8xf32>
    %66 = vector.shape_cast %65 : vector<256x8xf32> to vector<1x16x16x8xf32>
    %c0_16 = arith.constant 0 : index
    %c0_17 = arith.constant 0 : index
    %c0_18 = arith.constant 0 : index
    %c0_19 = arith.constant 0 : index
    %67 = vector.load %arg5[%c0_16, %c0_17, %c0_18, %c0_19] : memref<1x16x16x8xf32, #tpu.memory_space<vmem>>, vector<1x16x16x8xf32>
    tpu.vector_store %arg5[%c0_16, %c0_17, %c0_18, %c0_19], %66 {strides = array<i32>} : memref<1x16x16x8xf32, #tpu.memory_space<vmem>>, vector<1x16x16x8xf32>,
    return
  }
  func.func @transform_0(%arg0: i32) -> (i32, i32, i32, i32) {
    %c0_i32 = arith.constant 0 : i32
    %c0_i32_0 = arith.constant 0 : i32
    %c0_i32_1 = arith.constant 0 : i32
    %c0_i32_2 = arith.constant 0 : i32
    return %arg0, %c0_i32, %c0_i32_0, %c0_i32_1 : i32, i32, i32, i32
  }
  func.func @transform_1(%arg0: i32) -> (i32, i32, i32, i32) {
    %c0_i32 = arith.constant 0 : i32
    %c0_i32_0 = arith.constant 0 : i32
    %c0_i32_1 = arith.constant 0 : i32
    %c0_i32_2 = arith.constant 0 : i32
    return %arg0, %c0_i32, %c0_i32_0, %c0_i32_1 : i32, i32, i32, i32
  }
  func.func @transform_2(%arg0: i32) -> (i32, i32) {
    %c0_i32 = arith.constant 0 : i32
    %c0_i32_0 = arith.constant 0 : i32
    %c0_i32_1 = arith.constant 0 : i32
    return %c0_i32, %c0_i32_0 : i32, i32
  }
  func.func @transform_3(%arg0: i32) -> (i32, i32) {
    %c0_i32 = arith.constant 0 : i32
    %c0_i32_0 = arith.constant 0 : i32
    %c0_i32_1 = arith.constant 0 : i32
    return %c0_i32, %c0_i32_0 : i32, i32
  }
  func.func @transform_4(%arg0: i32) -> (i32, i32, i32, i32) {
    %c0_i32 = arith.constant 0 : i32
    %c0_i32_0 = arith.constant 0 : i32
    %c0_i32_1 = arith.constant 0 : i32
    %c0_i32_2 = arith.constant 0 : i32
    return %arg0, %c0_i32, %c0_i32_0, %c0_i32_1 : i32, i32, i32, i32
  }
}

</mosaic_0001>

<bundles_post_ra>
// kernel: tpu_custom_call.1
= control target key start
LH: loop header
LB: loop body
LE: loop exit
PB: predicated region body
PF: predicated region fallthrough
CT: control target
= control target key end

     0   :  { %s4881_s15 = smov 0   ;;  %s7514_s0 = inlined_call_operand.vmem [shape: f32[2,18,18,9], index: 0, kind: input, shape index: {}]   ;;  %s7515_s1 = inlined_call_operand.vmem [shape: f32[2,16,16,8], index: 1, kind: input, shape index: {}]   ;;  %s7516_s2 = inlined_call_operand.vmem [shape: f32[153,16], index: 2, kind: input, shape index: {}]   ;;  %s7517_s3 = inlined_call_operand.vmem [shape: f32[3,16], index: 3, kind: input, shape index: {}]   ;;  %s7518_s4 = inlined_call_operand.vmem [shape: f32[2,16,16,8], index: 4, kind: output, shape index: {}]  }
   0x1 LB: > { %s3697_s16 = sadd.s32 4294967295, %s4841_s15   ;;  %p3701_p0 = scmp.ge.s32.totalorder %s4841_s15, 1  ;;  %s4841_s15 = sphi %s4881_s15, %s14_s15  }
   0x2   : > { %p172_p1 = scmp.lt.s32.totalorder %s4841_s15, 3 }
   0x4   : > { %p173_p2 = pnand %p3701_p0, %p172_p1 }
   0x6   : > { %176 = sbr.rel (%p173_p2) target bundleno = 1155 (0x483), region = 36 }
   0xd   : > { %p203_p3 = scmp.lt.s32.totalorder %s3697_s16, 1  ;;  %v4843_v0 = vmov 8   ;;  %v543_v55 = vlaneseq  ;;  %v218_v58 = vld [vmem:[%s7517_s3] sm:$0x7]  ;;  %s4844_s23 = smov 9   ;;  %vm1253_vm0 = vcmask 72704  }
   0xe   : > { %3904 = vset.pattern.permute.xlu1 %v4843_v0  ;;  %3903 = vset.pattern.permute.xlu0 %v4843_v0  ;;  %vm1356_vm1 = vcmask 1046528   ;;  %s4845_s24 = smov 51   ;;  %s4846_s25 = smov 17   ;;  %vm1437_vm2 = vcmask 1045504   ;;  %vm2697_vm3 = vcmask 1040384   ;;  %vm4850_vm4 = vmmov 1  }
   0xf   : > { %s7812_s16 = smov (!%p203_p3, %s3697_s16), 1  ;;  %v5050_v56 = vshrl.u32 %v543_v55, 7  ;;  %s4847_s26 = smov 34   ;;  %vm3859_vm5 = vmpackc.low %vm2697_vm3, %vm4850_vm4  ;;  %vm2312_vm6 = vcmask 138240   ;;  %vm2345_vm7 = vcmask 277504   ;;  %vm2378_vm8 = vcmask 416768  }
  0x10   : > { %s3881_s17 = smul.u32 432, %s7812_s16  ;;  %s4849_s7 = smov 68   ;;  %vm2411_vm9 = vcmask 556032   ;;  %vm2543_vm10 = vcmask 64512   ;;  %vm2600_vm11 = vcmask 203776   ;;  %vm2444_vm12 = vcmask 695296  }
  0x11   : > { %7637 = vst [vmem:[#allocation2_spill] sm:$0xff] %v5050_v56  ;;  %v545_v57 = vsub.s32 1, %v5050_v56  ;;  %v603_v59 = vsub.s32 2, %v5050_v56  ;;  %s4851_s22 = smov 85   ;;  %vm2477_vm13 = vcmask 834560   ;;  %vm2510_vm14 = vcmask 973824  }
  0x12   : > { %s4895_s20 = scalar_lea.vmem %s7514_s0, %s3881_s17  ;;  %s3828_s27 = sshll.u32 %s7812_s16, 8 }
  0x13   : > { %v4898_v1 = vld [vmem:[%s4895_s20 + $0x10] sm:$0x3]  ;;  %v4901_v2 = vld [vmem:[%s4895_s20] sm:$0xff]  ;;  %v4906_v3 = vld [vmem:[%s4895_s20 + $0x18] sm:$0xff]  ;;  %v5057_v60 = vrot.slane %v218_v58, %v545_v57  ;;  %v5059_v61 = vrot.slane %v218_v58, %v603_v59  ;;  %s6794_s30 = scalar_lea.vmem %s7515_s1, %s3828_s27  ;;  %s4855_s6 = smov 120  }
  0x14   : > { %285 = vperm.xlu1 %3904, %v4898_v1   ;;  %275 = vperm.xlu0 %3903, %v4901_v2   ;;  %v4909_v4 = vld [vmem:[%s4895_s20 + $0x8] sm:$0xff]  ;;  %v4917_v6 = vld [vmem:[%s4895_s20 + $0x20] sm:$0xff]  ;;  %v4922_v7 = vld [vmem:[%s4895_s20 + $0x38] sm:$0xff]  ;;  %s7249_s9 = scalar_lea.vmem %s7518_s4, %s3828_s27 }
  0x15   : > { %v4914_v5 = vld [vmem:[%s4895_s20 + $0x28] sm:$0x3]  ;;  %v4925_v8 = vld [vmem:[%s4895_s20 + $0x30] sm:$0xff]  ;;  %v4933_v10 = vld [vmem:[%s4895_s20 + $0x40] sm:$0x3] }
  0x16   : > { %v4930_v9 = vld [vmem:[%s4895_s20 + $0x48] sm:$0xff]  ;;  %v4938_v11 = vld [vmem:[%s4895_s20 + $0x58] sm:$0x3]  ;;  %v4941_v12 = vld [vmem:[%s4895_s20 + $0x50] sm:$0xff] }
  0x17   : > { %v4946_v13 = vld [vmem:[%s4895_s20 + $0x68] sm:$0xff]  ;;  %v4949_v14 = vld [vmem:[%s4895_s20 + $0x60] sm:$0xff]  ;;  %v4954_v15 = vld [vmem:[%s4895_s20 + $0x78] sm:$0xff] }
  0x18   : > { %290 = vperm.xlu1 %3904, %v4906_v3   ;;  %280 = vperm.xlu0 %3903, %v4909_v4   ;;  %v4957_v16 = vld [vmem:[%s4895_s20 + $0x70] sm:$0x3]  ;;  %v4962_v17 = vld [vmem:[%s4895_s20 + $0x88] sm:$0x3]  ;;  %v4965_v18 = vld [vmem:[%s4895_s20 + $0x80] sm:$0xff] }
  0x19   : > { %v4970_v19 = vld [vmem:[%s4895_s20 + $0x98] sm:$0xff]  ;;  %v4973_v20 = vld [vmem:[%s4895_s20 + $0x90] sm:$0xff]  ;;  %v4978_v21 = vld [vmem:[%s4895_s20 + $0xa8] sm:$0xff] }
  0x1a   : > { %v4981_v22 = vld [vmem:[%s4895_s20 + $0xa0] sm:$0x3]  ;;  %v4986_v23 = vld [vmem:[%s4895_s20 + $0xb8] sm:$0x3]  ;;  %v4989_v24 = vld [vmem:[%s4895_s20 + $0xb0] sm:$0xff] }
  0x1b   : > { %v4994_v25 = vld [vmem:[%s4895_s20 + $0xc8] sm:$0xff]  ;;  %v4997_v26 = vld [vmem:[%s4895_s20 + $0xc0] sm:$0xff]  ;;  %v5002_v27 = vld [vmem:[%s4895_s20 + $0xd8] sm:$0xff] }
  0x1c   : > { %300 = vperm.xlu1 %3904, %v4914_v5   ;;  %295 = vperm.xlu0 %3903, %v4917_v6   ;;  %v5005_v28 = vld [vmem:[%s4895_s20 + $0xd0] sm:$0x3]  ;;  %v5010_v29 = vld [vmem:[%s4895_s20 + $0xe8] sm:$0x3]  ;;  %v5013_v30 = vld [vmem:[%s4895_s20 + $0xe0] sm:$0xff] }
  0x1d   : > { %v5018_v31 = vld [vmem:[%s4895_s20 + $0xf8] sm:$0xff]  ;;  %v5021_v32 = vld [vmem:[%s4895_s20 + $0xf0] sm:$0xff]  ;;  %v252_v33 = vld [vmem:[%s4895_s20 + $0x108] sm:$0xff] }
  0x1e   : > { %v5027_v34 = vld [vmem:[%s4895_s20 + $0x100] sm:$0x3]  ;;  %v254_v35 = vld [vmem:[%s4895_s20 + $0x118] sm:$0x3]  ;;  %v253_v36 = vld [vmem:[%s4895_s20 + $0x110] sm:$0xff] }
  0x1f   : > { %v256_v37 = vld [vmem:[%s4895_s20 + $0x128] sm:$0xff]  ;;  %v255_v38 = vld [vmem:[%s4895_s20 + $0x120] sm:$0xff]  ;;  %v258_v39 = vld [vmem:[%s4895_s20 + $0x138] sm:$0xff] }
  0x20   : > { %310 = vperm.xlu1 %3904, %v4922_v7   ;;  %305 = vperm.xlu0 %3903, %v4925_v8   ;;  %v257_v40 = vld [vmem:[%s4895_s20 + $0x130] sm:$0x3]  ;;  %v260_v41 = vld [vmem:[%s4895_s20 + $0x148] sm:$0x3]  ;;  %v259_v42 = vld [vmem:[%s4895_s20 + $0x140] sm:$0xff] }
  0x21   : > { %v262_v43 = vld [vmem:[%s4895_s20 + $0x158] sm:$0xff]  ;;  %v261_v44 = vld [vmem:[%s4895_s20 + $0x150] sm:$0xff]  ;;  %v264_v45 = vld [vmem:[%s4895_s20 + $0x168] sm:$0xff] }
  0x22   : > { %v263_v46 = vld [vmem:[%s4895_s20 + $0x160] sm:$0x3]  ;;  %v266_v47 = vld [vmem:[%s4895_s20 + $0x178] sm:$0x3]  ;;  %v265_v48 = vld [vmem:[%s4895_s20 + $0x170] sm:$0xff] }
  0x23   : > { %v268_v49 = vld [vmem:[%s4895_s20 + $0x188] sm:$0xff]  ;;  %v267_v50 = vld [vmem:[%s4895_s20 + $0x180] sm:$0xff]  ;;  %v270_v51 = vld [vmem:[%s4895_s20 + $0x198] sm:$0xff] }
  0x24   : > { %320 = vperm.xlu1 %3904, %v4930_v9   ;;  %315 = vperm.xlu0 %3903, %v4933_v10   ;;  %v269_v52 = vld [vmem:[%s4895_s20 + $0x190] sm:$0x3]  ;;  %v272_v53 = vld [vmem:[%s4895_s20 + $0x1a8] sm:$0x3]  ;;  %v271_v54 = vld [vmem:[%s4895_s20 + $0x1a0] sm:$0xff] }
  0x28   : > { %330 = vperm.xlu1 %3904, %v4938_v11   ;;  %325 = vperm.xlu0 %3903, %v4941_v12  }
  0x2c   : > { %340 = vperm.xlu1 %3904, %v4946_v13   ;;  %335 = vperm.xlu0 %3903, %v4949_v14  }
  0x30   : > { %350 = vperm.xlu1 %3904, %v4954_v15   ;;  %345 = vperm.xlu0 %3903, %v4957_v16  }
  0x34   : > { %360 = vperm.xlu1 %3904, %v4962_v17   ;;  %355 = vperm.xlu0 %3903, %v4965_v18  }
  0x38   : > { %370 = vperm.xlu1 %3904, %v4970_v19   ;;  %365 = vperm.xlu0 %3903, %v4973_v20  }
  0x3c   : > { %380 = vperm.xlu1 %3904, %v4978_v21   ;;  %375 = vperm.xlu0 %3903, %v4981_v22  }
  0x40   : > { %390 = vperm.xlu1 %3904, %v4986_v23   ;;  %385 = vperm.xlu0 %3903, %v4989_v24  }
  0x44   : > { %400 = vperm.xlu1 %3904, %v4994_v25   ;;  %395 = vperm.xlu0 %3903, %v4997_v26  }
  0x48   : > { %410 = vperm.xlu1 %3904, %v5002_v27   ;;  %405 = vperm.xlu0 %3903, %v5005_v28  }
  0x4c   : > { %420 = vperm.xlu1 %3904, %v5010_v29   ;;  %415 = vperm.xlu0 %3903, %v5013_v30  }
  0x50   : > { %430 = vperm.xlu1 %3904, %v5018_v31   ;;  %425 = vperm.xlu0 %3903, %v5021_v32  }
  0x54   : > { %440 = vperm.xlu1 %3904, %v252_v33   ;;  %435 = vperm.xlu0 %3903, %v5027_v34  }
  0x58   : > { %450 = vperm.xlu1 %3904, %v254_v35   ;;  %445 = vperm.xlu0 %3903, %v253_v36  }
  0x5c   : > { %460 = vperm.xlu1 %3904, %v256_v37   ;;  %455 = vperm.xlu0 %3903, %v255_v38  }
  0x60   : > { %470 = vperm.xlu1 %3904, %v258_v39   ;;  %465 = vperm.xlu0 %3903, %v257_v40  }
  0x64   : > { %480 = vperm.xlu1 %3904, %v260_v41   ;;  %475 = vperm.xlu0 %3903, %v259_v42  }
  0x68   : > { %490 = vperm.xlu1 %3904, %v262_v43   ;;  %485 = vperm.xlu0 %3903, %v261_v44  }
  0x6c   : > { %500 = vperm.xlu1 %3904, %v264_v45   ;;  %495 = vperm.xlu0 %3903, %v263_v46  }
  0x70   : > { %510 = vperm.xlu1 %3904, %v266_v47   ;;  %505 = vperm.xlu0 %3903, %v265_v48  }
  0x74   : > { %520 = vperm.xlu1 %3904, %v268_v49   ;;  %515 = vperm.xlu0 %3903, %v267_v50  }
  0x78   : > { %530 = vperm.xlu1 %3904, %v270_v51   ;;  %525 = vperm.xlu0 %3903, %v269_v52  }
  0x7c   : > { %540 = vperm.xlu1 %3904, %v272_v53   ;;  %535 = vperm.xlu0 %3903, %v271_v54  }
  0x93   : > { %v286_v62 = vpop.permute.xlu1 %285  ;;  %v276_v63 = vpop.permute.xlu0 %275 }
  0x94   : > { %v549_v0 = vmul.f32 %v5057_v60, %v286_v62  ;;  %v547_v33 = vmul.f32 %v5057_v60, %v276_v63 }
  0x96   : > { %v607_v35 = vadd.f32 %v5059_v61, %v549_v0  ;;  %v605_v36 = vadd.f32 %v5059_v61, %v547_v33 }
  0x97   : > { %v291_v37 = vpop.permute.xlu1 %290  ;;  %v281_v38 = vpop.permute.xlu0 %280 }
  0x98   : > { %v3709_v39 = vmul.f32 -1.442695, %v607_v35  ;;  %v3707_v40 = vmul.f32 -1.442695, %v605_v36  ;;  %v550_v41 = vmul.f32 %v5057_v60, %v291_v37  ;;  %v548_v42 = vmul.f32 %v5057_v60, %v281_v38 }
  0x9a   : > { %4400 = vpow2.f32 %v3709_v39  ;;  %v608_v43 = vadd.f32 %v5059_v61, %v550_v41  ;;  %v606_v44 = vadd.f32 %v5059_v61, %v548_v42 }
  0x9b   : > { %4402 = vpow2.f32 %v3707_v40  ;;  %v301_v45 = vpop.permute.xlu1 %300  ;;  %v296_v46 = vpop.permute.xlu0 %295 }
  0x9c   : > { %v3710_v47 = vmul.f32 -1.442695, %v608_v43  ;;  %v3708_v48 = vmul.f32 -1.442695, %v606_v44  ;;  %v552_v49 = vmul.f32 %v5057_v60, %v301_v45  ;;  %v551_v50 = vmul.f32 %v5057_v60, %v296_v46 }
  0x9e   : > { %4404 = vpow2.f32 %v3710_v47  ;;  %v610_v51 = vadd.f32 %v5059_v61, %v552_v49  ;;  %v609_v52 = vadd.f32 %v5059_v61, %v551_v50 }
  0x9f   : > { %4406 = vpow2.f32 %v3708_v48  ;;  %v311_v53 = vpop.permute.xlu1 %310  ;;  %v306_v54 = vpop.permute.xlu0 %305 }
  0xa0   : > { %v3712_v55 = vmul.f32 -1.442695, %v610_v51  ;;  %v3711_v57 = vmul.f32 -1.442695, %v609_v52  ;;  %v554_v58 = vmul.f32 %v5057_v60, %v311_v53  ;;  %v553_v59 = vmul.f32 %v5057_v60, %v306_v54 }
  0xa2   : > { %4408 = vpow2.f32 %v3712_v55  ;;  %v612_v62 = vadd.f32 %v5059_v61, %v554_v58  ;;  %v611_v63 = vadd.f32 %v5059_v61, %v553_v59 }
  0xa3   : > { %4410 = vpow2.f32 %v3711_v57  ;;  %v321_v0 = vpop.permute.xlu1 %320  ;;  %v316_v33 = vpop.permute.xlu0 %315 }
  0xa4   : > { %v4401_v35 = vpop.eup %4400  ;;  %v3714_v36 = vmul.f32 -1.442695, %v612_v62  ;;  %v556_v37 = vmul.f32 %v5057_v60, %v321_v0  ;;  %v555_v38 = vmul.f32 %v5057_v60, %v316_v33  ;;  %v3713_v41 = vmul.f32 -1.442695, %v611_v63 }
  0xa5   : > { %v4403_v39 = vpop.eup %4402  ;;  %v823_v40 = vadd.f32 1.0, %v4401_v35 }
  0xa6   : > { %v821_v42 = vadd.f32 1.0, %v4403_v39  ;;  %4412 = vpow2.f32 %v3714_v36  ;;  %v614_v43 = vadd.f32 %v5059_v61, %v556_v37  ;;  %v613_v44 = vadd.f32 %v5059_v61, %v555_v38 }
  0xa7   : > { %4414 = vrcp.f32 %v823_v40  ;;  %v331_v45 = vpop.permute.xlu1 %330  ;;  %v326_v46 = vpop.permute.xlu0 %325 }
  0xa8   : > { %v4405_v47 = vpop.eup %4404  ;;  %4416 = vrcp.f32 %v821_v42  ;;  %v3716_v48 = vmul.f32 -1.442695, %v614_v43  ;;  %v558_v49 = vmul.f32 %v5057_v60, %v331_v45  ;;  %v3715_v52 = vmul.f32 -1.442695, %v613_v44 }
  0xa9   : > { %v4407_v50 = vpop.eup %4406  ;;  %v824_v51 = vadd.f32 1.0, %v4405_v47  ;;  %4418 = vpow2.f32 %v3713_v41  ;;  %v557_v53 = vmul.f32 %v5057_v60, %v326_v46 }
  0xaa   : > { %v822_v54 = vadd.f32 1.0, %v4407_v50  ;;  %4420 = vpow2.f32 %v3716_v48  ;;  %v616_v55 = vadd.f32 %v5059_v61, %v558_v49 }
  0xab   : > { %4422 = vrcp.f32 %v824_v51  ;;  %v615_v57 = vadd.f32 %v5059_v61, %v557_v53  ;;  %v341_v58 = vpop.permute.xlu1 %340  ;;  %v336_v59 = vpop.permute.xlu0 %335 }
  0xac   : > { %v4409_v62 = vpop.eup %4408  ;;  %4424 = vrcp.f32 %v822_v54  ;;  %v3718_v63 = vmul.f32 -1.442695, %v616_v55  ;;  %v560_v0 = vmul.f32 %v5057_v60, %v341_v58  ;;  %v559_v33 = vmul.f32 %v5057_v60, %v336_v59 }
  0xad   : > { %v4411_v35 = vpop.eup %4410  ;;  %v826_v36 = vadd.f32 1.0, %v4409_v62  ;;  %4426 = vpow2.f32 %v3715_v52  ;;  %v3717_v37 = vmul.f32 -1.442695, %v615_v57 }
  0xae   : > { %v825_v38 = vadd.f32 1.0, %v4411_v35  ;;  %4428 = vpow2.f32 %v3718_v63  ;;  %v618_v39 = vadd.f32 %v5059_v61, %v560_v0  ;;  %v617_v40 = vadd.f32 %v5059_v61, %v559_v33 }
  0xaf   : > { %4430 = vrcp.f32 %v826_v36  ;;  %v351_v41 = vpop.permute.xlu1 %350  ;;  %v346_v42 = vpop.permute.xlu0 %345 }
  0xb0   : > { %v4413_v43 = vpop.eup %4412  ;;  %4432 = vrcp.f32 %v825_v38  ;;  %v3720_v44 = vmul.f32 -1.442695, %v618_v39  ;;  %v3719_v45 = vmul.f32 -1.442695, %v617_v40  ;;  %v562_v46 = vmul.f32 %v5057_v60, %v351_v41 }
  0xb1   : > { %v4415_v47 = vpop.eup %4414  ;;  %v828_v48 = vadd.f32 1.0, %v4413_v43  ;;  %4434 = vpow2.f32 %v3717_v37  ;;  %v561_v49 = vmul.f32 %v5057_v60, %v346_v42 }
  0xb2   : > { %v4417_v50 = vpop.eup %4416  ;;  %4436 = vpow2.f32 %v3720_v44  ;;  %v620_v51 = vadd.f32 %v5059_v61, %v562_v46  ;;  %v985_v38 = vmul.f32 %v4415_v47, %v4898_v1 }
  0xb3   : > { %v4419_v52 = vpop.eup %4418  ;;  %v619_v53 = vadd.f32 %v5059_v61, %v561_v49  ;;  %v361_v54 = vpop.permute.xlu1 %360  ;;  %4438 = vpow2.f32 %v3719_v45  ;;  %v983_v44 = vmul.f32 %v4417_v50, %v4901_v2 }
  0xb4   : > { %v356_v55 = vpop.permute.xlu0 %355  ;;  %v4421_v57 = vpop.eup %4420  ;;  %v827_v58 = vadd.f32 1.0, %v4419_v52  ;;  %v3722_v59 = vmul.f32 -1.442695, %v620_v51  ;;  %v564_v62 = vmul.f32 %v5057_v60, %v361_v54  ;;  %4440 = vrcp.f32 %v828_v48 }
  0xb5   : > { %v4423_v63 = vpop.eup %4422  ;;  %v830_v0 = vadd.f32 1.0, %v4421_v57  ;;  %v3721_v33 = vmul.f32 -1.442695, %v619_v53  ;;  %v563_v35 = vmul.f32 %v5057_v60, %v356_v55 }
  0xb6   : > { %v4425_v36 = vpop.eup %4424  ;;  %4442 = vrcp.f32 %v827_v58  ;;  %v622_v37 = vadd.f32 %v5059_v61, %v564_v62  ;;  %v986_v39 = vmul.f32 %v4423_v63, %v4906_v3 }
  0xb7   : > { %v4427_v40 = vpop.eup %4426  ;;  %4444 = vrcp.f32 %v830_v0  ;;  %v621_v41 = vadd.f32 %v5059_v61, %v563_v35  ;;  %v371_v42 = vpop.permute.xlu1 %370  ;;  %v984_v45 = vmul.f32 %v4425_v36, %v4909_v4 }
  0xb8   : > { %v366_v43 = vpop.permute.xlu0 %365  ;;  %v4429_v46 = vpop.eup %4428  ;;  %v829_v48 = vadd.f32 1.0, %v4427_v40  ;;  %4446 = vpow2.f32 %v3722_v59  ;;  %v3724_v49 = vmul.f32 -1.442695, %v622_v37  ;;  %v566_v51 = vmul.f32 %v5057_v60, %v371_v42 }
  0xb9   : > { %v4431_v52 = vpop.eup %4430  ;;  %v832_v1 = vadd.f32 1.0, %v4429_v46  ;;  %4448 = vpow2.f32 %v3721_v33  ;;  %v3723_v3 = vmul.f32 -1.442695, %v621_v41  ;;  %v565_v47 = vmul.f32 %v5057_v60, %v366_v43 }
  0xba   : > { %v4433_v53 = vpop.eup %4432  ;;  %4450 = vrcp.f32 %v829_v48  ;;  %v624_v54 = vadd.f32 %v5059_v61, %v566_v51  ;;  %v3910_v55 = vpack.i.bf16 %v986_v39, %v985_v38  ;;  %v3905_v2 = vpack.i.bf16 %v984_v45, %v983_v44 }
  0xbb   : > { %v4435_v50 = vpop.eup %4434  ;;  %4452 = vrcp.f32 %v832_v1  ;;  %v623_v4 = vadd.f32 %v5059_v61, %v565_v47  ;;  %v381_v57 = vpop.permute.xlu1 %380  ;;  %v987_v59 = vmul.f32 %v4433_v53, %v4917_v6  ;;  %v988_v62 = vmul.f32 %v4431_v52, %v4914_v5 }
  0xbc   : > { %v376_v58 = vpop.permute.xlu0 %375  ;;  %v4437_v63 = vpop.eup %4436  ;;  %v831_v0 = vadd.f32 1.0, %v4435_v50  ;;  %4454 = vpow2.f32 %v3724_v49  ;;  %v3726_v33 = vmul.f32 -1.442695, %v624_v54  ;;  %3911 = vrot.lane.b32.xlu1 %v3910_v55, %s4844_s23  ;;  %3906 = vrot.lane.b32.xlu0 %v3905_v2, %s4844_s23  ;;  %v568_v35 = vmul.f32 %v5057_v60, %v381_v57 }
  0xbd   : > { %v834_v36 = vadd.f32 1.0, %v4437_v63  ;;  %4456 = vpow2.f32 %v3723_v3  ;;  %v567_v37 = vmul.f32 %v5057_v60, %v376_v58  ;;  %v4439_v38 = vpop.eup %4438  ;;  %v3725_v6 = vmul.f32 -1.442695, %v623_v4 }
  0xbe   : > { %4458 = vrcp.f32 %v831_v0  ;;  %v626_v5 = vadd.f32 %v5059_v61, %v568_v35  ;;  %v3915_v39 = vpack.i.bf16 %v988_v62, %v987_v59  ;;  %v4441_v40 = vpop.eup %4440  ;;  %v833_v41 = vadd.f32 1.0, %v4439_v38 }
  0xbf   : > { %4460 = vrcp.f32 %v834_v36  ;;  %v625_v42 = vadd.f32 %v5059_v61, %v567_v37  ;;  %v391_v43 = vpop.permute.xlu1 %390  ;;  %v990_v54 = vmul.f32 %v4441_v40, %v4922_v7 }
  0xc0   : > { %v386_v44 = vpop.permute.xlu0 %385  ;;  %v4443_v45 = vpop.eup %4442  ;;  %4462 = vpow2.f32 %v3726_v33  ;;  %v3728_v46 = vmul.f32 -1.442695, %v626_v5  ;;  %3916 = vrot.lane.b32.xlu0 %v3915_v39, %s4844_s23  ;;  %v570_v48 = vmul.f32 %v5057_v60, %v391_v43 }
  0xc1   : > { %v569_v49 = vmul.f32 %v5057_v60, %v386_v44  ;;  %v4445_v51 = vpop.eup %4444  ;;  %4464 = vrcp.f32 %v833_v41  ;;  %v3727_v52 = vmul.f32 -1.442695, %v625_v42  ;;  %v989_v1 = vmul.f32 %v4443_v45, %v4925_v8 }
  0xc2   : > { %v4447_v3 = vpop.eup %4446  ;;  %4466 = vpow2.f32 %v3725_v6  ;;  %v628_v47 = vadd.f32 %v5059_v61, %v570_v48  ;;  %v992_v35 = vmul.f32 %v4445_v51, %v4930_v9 }
  0xc3   : > { %v627_v53 = vadd.f32 %v5059_v61, %v569_v49  ;;  %v4449_v55 = vpop.eup %4448  ;;  %v836_v2 = vadd.f32 1.0, %v4447_v3  ;;  %4468 = vpow2.f32 %v3728_v46  ;;  %1103 = vrot.lane.b32.xlu1 %v989_v1, %s4844_s23  ;;  %v401_v50 = vpop.permute.xlu1 %400 }
  0xc4   : > { %v396_v4 = vpop.permute.xlu0 %395  ;;  %v4451_v57 = vpop.eup %4450  ;;  %v835_v58 = vadd.f32 1.0, %v4449_v55  ;;  %4470 = vpow2.f32 %v3727_v52  ;;  %v3730_v59 = vmul.f32 -1.442695, %v628_v47  ;;  %1105 = vrot.lane.b32.xlu0 %v990_v54, %s4844_s23  ;;  %v572_v63 = vmul.f32 %v5057_v60, %v401_v50 }
  0xc5   : > { %v3729_v8 = vmul.f32 -1.442695, %v627_v53  ;;  %v4453_v62 = vpop.eup %4452  ;;  %4472 = vrcp.f32 %v836_v2  ;;  %v571_v7 = vmul.f32 %v5057_v60, %v396_v4  ;;  %v991_v0 = vmul.f32 %v4451_v57, %v4933_v10 }
  0xc6   : > { %v4455_v33 = vpop.eup %4454  ;;  %4474 = vrcp.f32 %v835_v58  ;;  %v630_v38 = vadd.f32 %v5059_v61, %v572_v63  ;;  %v994_v51 = vmul.f32 %v4453_v62, %v4938_v11 }
  0xc7   : > { %v4457_v36 = vpop.eup %4456  ;;  %v838_v37 = vadd.f32 1.0, %v4455_v33  ;;  %4476 = vpow2.f32 %v3730_v59  ;;  %v629_v6 = vadd.f32 %v5059_v61, %v571_v7  ;;  %1107 = vrot.lane.b32.xlu1 %v991_v0, %s4844_s23  ;;  %v411_v5 = vpop.permute.xlu1 %410 }
  0xc8   : > { %v406_v39 = vpop.permute.xlu0 %405  ;;  %v4459_v40 = vpop.eup %4458  ;;  %v837_v41 = vadd.f32 1.0, %v4457_v36  ;;  %4478 = vpow2.f32 %v3729_v8  ;;  %1109 = vrot.lane.b32.xlu0 %v992_v35, %s4844_s23  ;;  %v574_v10 = vmul.f32 %v5057_v60, %v411_v5  ;;  %v3732_v43 = vmul.f32 -1.442695, %v630_v38 }
  0xc9   : > { %v573_v9 = vmul.f32 %v5057_v60, %v406_v39  ;;  %v4461_v42 = vpop.eup %4460  ;;  %4480 = vrcp.f32 %v838_v37  ;;  %v3731_v44 = vmul.f32 -1.442695, %v629_v6  ;;  %v993_v45 = vmul.f32 %v4459_v40, %v4941_v12 }
  0xca   : > { %v4463_v46 = vpop.eup %4462  ;;  %4482 = vrcp.f32 %v837_v41  ;;  %v632_v48 = vadd.f32 %v5059_v61, %v574_v10  ;;  %v996_v55 = vmul.f32 %v4461_v42, %v4946_v13 }
  0xcb   : > { %v631_v49 = vadd.f32 %v5059_v61, %v573_v9  ;;  %v4465_v52 = vpop.eup %4464  ;;  %v840_v1 = vadd.f32 1.0, %v4463_v46  ;;  %4484 = vpow2.f32 %v3732_v43  ;;  %1111 = vrot.lane.b32.xlu1 %v993_v45, %s4844_s23  ;;  %v421_v3 = vpop.permute.xlu1 %420 }
  0xcc   : > { %v416_v47 = vpop.permute.xlu0 %415  ;;  %v4467_v53 = vpop.eup %4466  ;;  %4486 = vpow2.f32 %v3731_v44  ;;  %v3734_v54 = vmul.f32 -1.442695, %v632_v48  ;;  %1113 = vrot.lane.b32.xlu0 %v994_v51, %s4844_s23  ;;  %v576_v12 = vmul.f32 %v5057_v60, %v421_v3  ;;  %v995_v4 = vmul.f32 %v4465_v52, %v4949_v14 }
  0xcd   : > { %v4469_v2 = vpop.eup %4468  ;;  %4488 = vrcp.f32 %v840_v1  ;;  %v839_v50 = vadd.f32 1.0, %v4467_v53  ;;  %v575_v11 = vmul.f32 %v5057_v60, %v416_v47  ;;  %v3733_v59 = vmul.f32 -1.442695, %v631_v49 }
  0xce   : > { %v4471_v57 = vpop.eup %4470  ;;  %v842_v58 = vadd.f32 1.0, %v4469_v2  ;;  %4490 = vpow2.f32 %v3734_v54  ;;  %v634_v8 = vadd.f32 %v5059_v61, %v576_v12 }
  0xcf   : > { %v4473_v62 = vpop.eup %4472  ;;  %4492 = vrcp.f32 %v839_v50  ;;  %v841_v63 = vadd.f32 1.0, %v4471_v57  ;;  %v633_v7 = vadd.f32 %v5059_v61, %v575_v11  ;;  %1115 = vrot.lane.b32.xlu1 %v995_v4, %s4844_s23  ;;  %v431_v13 = vpop.permute.xlu1 %430 }
  0xd0   : > { %v426_v0 = vpop.permute.xlu0 %425  ;;  %v4475_v33 = vpop.eup %4474  ;;  %4494 = vrcp.f32 %v842_v58  ;;  %v3736_v35 = vmul.f32 -1.442695, %v634_v8  ;;  %1117 = vrot.lane.b32.xlu0 %v996_v55, %s4844_s23  ;;  %v578_v14 = vmul.f32 %v5057_v60, %v431_v13  ;;  %v998_v5 = vmul.f32 %v4473_v62, %v4954_v15 }
  0xd1   : > { %v577_v36 = vmul.f32 %v5057_v60, %v426_v0  ;;  %v4477_v37 = vpop.eup %4476  ;;  %4496 = vrcp.f32 %v841_v63  ;;  %v3735_v38 = vmul.f32 -1.442695, %v633_v7  ;;  %v997_v6 = vmul.f32 %v4475_v33, %v4957_v16 }
  0xd2   : > { %v4479_v39 = vpop.eup %4478  ;;  %v844_v40 = vadd.f32 1.0, %v4477_v37  ;;  %4498 = vpow2.f32 %v3733_v59  ;;  %v636_v41 = vadd.f32 %v5059_v61, %v578_v14 }
  0xd3   : > { %v635_v10 = vadd.f32 %v5059_v61, %v577_v36  ;;  %v4481_v9 = vpop.eup %4480  ;;  %v843_v42 = vadd.f32 1.0, %v4479_v39  ;;  %4500 = vpow2.f32 %v3736_v35  ;;  %1119 = vrot.lane.b32.xlu1 %v997_v6, %s4844_s23  ;;  %v441_v43 = vpop.permute.xlu1 %440 }
  0xd4   : > { %v436_v44 = vpop.permute.xlu0 %435  ;;  %v4483_v45 = vpop.eup %4482  ;;  %4502 = vrcp.f32 %v844_v40  ;;  %v3738_v46 = vmul.f32 -1.442695, %v636_v41  ;;  %1121 = vrot.lane.b32.xlu0 %v998_v5, %s4844_s23  ;;  %v580_v15 = vmul.f32 %v5057_v60, %v441_v43  ;;  %v1000_v47 = vmul.f32 %v4481_v9, %v4962_v17 }
  0xd5   : > { %v4485_v16 = vpop.eup %4484  ;;  %4504 = vrcp.f32 %v843_v42  ;;  %v3737_v48 = vmul.f32 -1.442695, %v635_v10  ;;  %v579_v49 = vmul.f32 %v5057_v60, %v436_v44  ;;  %v999_v51 = vmul.f32 %v4483_v45, %v4965_v18 }
  0xd6   : > { %v4487_v52 = vpop.eup %4486  ;;  %v846_v1 = vadd.f32 1.0, %v4485_v16  ;;  %4506 = vpow2.f32 %v3735_v38  ;;  %v638_v3 = vadd.f32 %v5059_v61, %v580_v15 }
  0xd7   : > { %v4489_v53 = vpop.eup %4488  ;;  %v845_v54 = vadd.f32 1.0, %v4487_v52  ;;  %4508 = vpow2.f32 %v3738_v46  ;;  %v637_v12 = vadd.f32 %v5059_v61, %v579_v49  ;;  %1123 = vrot.lane.b32.xlu1 %v999_v51, %s4844_s23  ;;  %v451_v55 = vpop.permute.xlu1 %450 }
  0xd8   : > { %v446_v2 = vpop.permute.xlu0 %445  ;;  %v4491_v50 = vpop.eup %4490  ;;  %4510 = vrcp.f32 %v846_v1  ;;  %v3740_v11 = vmul.f32 -1.442695, %v638_v3  ;;  %1125 = vrot.lane.b32.xlu0 %v1000_v47, %s4844_s23  ;;  %v582_v18 = vmul.f32 %v5057_v60, %v451_v55  ;;  %v1002_v59 = vmul.f32 %v4489_v53, %v4970_v19 }
  0xd9   : > { %v581_v4 = vmul.f32 %v5057_v60, %v446_v2  ;;  %v4493_v57 = vpop.eup %4492  ;;  %4512 = vrcp.f32 %v845_v54  ;;  %v848_v17 = vadd.f32 1.0, %v4491_v50  ;;  %v3739_v58 = vmul.f32 -1.442695, %v637_v12 }
  0xda   : > { %v4495_v8 = vpop.eup %4494  ;;  %4514 = vpow2.f32 %v3737_v48  ;;  %v640_v62 = vadd.f32 %v5059_v61, %v582_v18  ;;  %v1001_v7 = vmul.f32 %v4493_v57, %v4973_v20 }
  0xdb   : > { %v639_v63 = vadd.f32 %v5059_v61, %v581_v4  ;;  %v4497_v13 = vpop.eup %4496  ;;  %4516 = vrcp.f32 %v848_v17  ;;  %v461_v0 = vpop.permute.xlu1 %460  ;;  %v1004_v41 = vmul.f32 %v4495_v8, %v4978_v21 }
  0xdc   : > { %v456_v33 = vpop.permute.xlu0 %455  ;;  %v4499_v35 = vpop.eup %4498  ;;  %4518 = vpow2.f32 %v3740_v11  ;;  %v3742_v14 = vmul.f32 -1.442695, %v640_v62  ;;  %1127 = vrot.lane.b32.xlu1 %v1001_v7, %s4844_s23  ;;  %1129 = vrot.lane.b32.xlu0 %v1002_v59, %s4844_s23  ;;  %v584_v19 = vmul.f32 %v5057_v60, %v461_v0  ;;  %v1003_v20 = vmul.f32 %v4497_v13, %v4981_v22 }
  0xdd   : > { %v3741_v36 = vmul.f32 -1.442695, %v639_v63  ;;  %v4501_v37 = vpop.eup %4500  ;;  %v847_v38 = vadd.f32 1.0, %v4499_v35  ;;  %4520 = vpow2.f32 %v3739_v58  ;;  %v583_v6 = vmul.f32 %v5057_v60, %v456_v33 }
  0xde   : > { %v4503_v5 = vpop.eup %4502  ;;  %v850_v39 = vadd.f32 1.0, %v4501_v37  ;;  %4522 = vpow2.f32 %v3742_v14  ;;  %v642_v40 = vadd.f32 %v5059_v61, %v584_v19 }
  0xdf   : > { %v4505_v10 = vpop.eup %4504  ;;  %4524 = vrcp.f32 %v847_v38  ;;  %v641_v9 = vadd.f32 %v5059_v61, %v583_v6  ;;  %v471_v42 = vpop.permute.xlu1 %470  ;;  %v1006_v44 = vmul.f32 %v4503_v5, %v4986_v23 }
  0xe0   : > { %v466_v43 = vpop.permute.xlu0 %465  ;;  %v4507_v45 = vpop.eup %4506  ;;  %4526 = vrcp.f32 %v850_v39  ;;  %v3744_v46 = vmul.f32 -1.442695, %v642_v40  ;;  %1131 = vrot.lane.b32.xlu1 %v1003_v20, %s4844_s23  ;;  %1133 = vrot.lane.b32.xlu0 %v1004_v41, %s4844_s23  ;;  %v586_v22 = vmul.f32 %v5057_v60, %v471_v42  ;;  %v1005_v49 = vmul.f32 %v4505_v10, %v4989_v24 }
  0xe1   : > { %v585_v15 = vmul.f32 %v5057_v60, %v466_v43  ;;  %v4509_v21 = vpop.eup %4508  ;;  %v849_v16 = vadd.f32 1.0, %v4507_v45  ;;  %4528 = vpow2.f32 %v3741_v36  ;;  %v3743_v48 = vmul.f32 -1.442695, %v641_v9 }
  0xe2   : > { %v4511_v51 = vpop.eup %4510  ;;  %v852_v52 = vadd.f32 1.0, %v4509_v21  ;;  %4530 = vpow2.f32 %v3744_v46  ;;  %v644_v23 = vadd.f32 %v5059_v61, %v586_v22 }
  0xe3   : > { %v643_v1 = vadd.f32 %v5059_v61, %v585_v15  ;;  %v4513_v3 = vpop.eup %4512  ;;  %4532 = vrcp.f32 %v849_v16  ;;  %v481_v47 = vpop.permute.xlu1 %480  ;;  %v1008_v17 = vmul.f32 %v4511_v51, %v4994_v25 }
  0xe4   : > { %v476_v53 = vpop.permute.xlu0 %475  ;;  %v4515_v54 = vpop.eup %4514  ;;  %4534 = vrcp.f32 %v852_v52  ;;  %v3746_v12 = vmul.f32 -1.442695, %v644_v23  ;;  %1135 = vrot.lane.b32.xlu1 %v1005_v49, %s4844_s23  ;;  %1137 = vrot.lane.b32.xlu0 %v1006_v44, %s4844_s23  ;;  %v588_v24 = vmul.f32 %v5057_v60, %v481_v47  ;;  %v1007_v18 = vmul.f32 %v4513_v3, %v4997_v26 }
  0xe5   : > { %v3745_v55 = vmul.f32 -1.442695, %v643_v1  ;;  %v4517_v2 = vpop.eup %4516  ;;  %v851_v50 = vadd.f32 1.0, %v4515_v54  ;;  %4536 = vpow2.f32 %v3743_v48  ;;  %v587_v11 = vmul.f32 %v5057_v60, %v476_v53 }
  0xe6   : > { %v4519_v4 = vpop.eup %4518  ;;  %4538 = vpow2.f32 %v3746_v12  ;;  %v646_v57 = vadd.f32 %v5059_v61, %v588_v24  ;;  %v1010_v38 = vmul.f32 %v4517_v2, %v5002_v27 }
  0xe7   : > { %v4521_v58 = vpop.eup %4520  ;;  %4540 = vrcp.f32 %v851_v50  ;;  %v854_v59 = vadd.f32 1.0, %v4519_v4  ;;  %v645_v8 = vadd.f32 %v5059_v61, %v587_v11  ;;  %v491_v62 = vpop.permute.xlu1 %490 }
  0xe8   : > { %v486_v63 = vpop.permute.xlu0 %485  ;;  %v4523_v7 = vpop.eup %4522  ;;  %v853_v13 = vadd.f32 1.0, %v4521_v58  ;;  %4542 = vpow2.f32 %v3745_v55  ;;  %v3748_v0 = vmul.f32 -1.442695, %v646_v57  ;;  %1139 = vrot.lane.b32.xlu1 %v1007_v18, %s4844_s23  ;;  %1141 = vrot.lane.b32.xlu0 %v1008_v17, %s4844_s23  ;;  %v590_v26 = vmul.f32 %v5057_v60, %v491_v62 }
  0xe9   : > { %v4525_v33 = vpop.eup %4524  ;;  %4544 = vrcp.f32 %v854_v59  ;;  %v856_v25 = vadd.f32 1.0, %v4523_v7  ;;  %v3747_v35 = vmul.f32 -1.442695, %v645_v8  ;;  %v589_v14 = vmul.f32 %v5057_v60, %v486_v63  ;;  %v5224_v63 = vld [vmem:[%s4895_s20 + $0x108] sm:$0xff] }
  0xea   : > { %v4527_v36 = vpop.eup %4526  ;;  %4546 = vrcp.f32 %v853_v13  ;;  %v648_v19 = vadd.f32 %v5059_v61, %v590_v26  ;;  %v1009_v37 = vmul.f32 %v4525_v33, %v5005_v28 }
  0xeb   : > { %v4529_v6 = vpop.eup %4528  ;;  %4548 = vrcp.f32 %v856_v25  ;;  %v647_v20 = vadd.f32 %v5059_v61, %v589_v14  ;;  %v501_v5 = vpop.permute.xlu1 %500  ;;  %v1012_v22 = vmul.f32 %v4527_v36, %v5010_v29 }
  0xec   : > { %v496_v39 = vpop.permute.xlu0 %495  ;;  %v4531_v40 = vpop.eup %4530  ;;  %v855_v41 = vadd.f32 1.0, %v4529_v6  ;;  %4550 = vpow2.f32 %v3748_v0  ;;  %v3750_v10 = vmul.f32 -1.442695, %v648_v19  ;;  %1143 = vrot.lane.b32.xlu1 %v1009_v37, %s4844_s23  ;;  %1145 = vrot.lane.b32.xlu0 %v1010_v38, %s4844_s23  ;;  %v592_v9 = vmul.f32 %v5057_v60, %v501_v5  ;;  %v5232_v38 = vld [vmem:[%s4895_s20 + $0x110] sm:$0xff]  ;;  %v5236_v5 = vld [vmem:[%s4895_s20 + $0x118] sm:$0x3] }
  0xed   : > { %v4533_v42 = vpop.eup %4532  ;;  %v858_v28 = vadd.f32 1.0, %v4531_v40  ;;  %4552 = vpow2.f32 %v3747_v35  ;;  %v3749_v27 = vmul.f32 -1.442695, %v647_v20  ;;  %v591_v43 = vmul.f32 %v5057_v60, %v496_v39 }
  0xee   : > { %v4535_v44 = vpop.eup %4534  ;;  %4554 = vrcp.f32 %v855_v41  ;;  %v650_v45 = vadd.f32 %v5059_v61, %v592_v9  ;;  %v1011_v46 = vmul.f32 %v4533_v42, %v5013_v30 }
  0xef   : > { %v4537_v15 = vpop.eup %4536  ;;  %4556 = vrcp.f32 %v858_v28  ;;  %v649_v21 = vadd.f32 %v5059_v61, %v591_v43  ;;  %v511_v16 = vpop.permute.xlu1 %510  ;;  %v1014_v3 = vmul.f32 %v4535_v44, %v5018_v31 }
  0xf0   : > { %v506_v48 = vpop.permute.xlu0 %505  ;;  %v4539_v49 = vpop.eup %4538  ;;  %v857_v51 = vadd.f32 1.0, %v4537_v15  ;;  %4558 = vpow2.f32 %v3750_v10  ;;  %v3752_v52 = vmul.f32 -1.442695, %v650_v45  ;;  %1147 = vrot.lane.b32.xlu1 %v1011_v46, %s4844_s23  ;;  %1149 = vrot.lane.b32.xlu0 %v1012_v22, %s4844_s23  ;;  %v594_v23 = vmul.f32 %v5057_v60, %v511_v16 }
  0xf1   : > { %v4541_v1 = vpop.eup %4540  ;;  %v860_v30 = vadd.f32 1.0, %v4539_v49  ;;  %4560 = vpow2.f32 %v3749_v27  ;;  %v593_v29 = vmul.f32 %v5057_v60, %v506_v48  ;;  %v3751_v53 = vmul.f32 -1.442695, %v649_v21  ;;  %v5246_v21 = vld [vmem:[%s4895_s20 + $0x120] sm:$0xff] }
  0xf2   : > { %v4543_v47 = vpop.eup %4542  ;;  %4562 = vrcp.f32 %v857_v51  ;;  %v652_v54 = vadd.f32 %v5059_v61, %v594_v23  ;;  %v1013_v12 = vmul.f32 %v4541_v1, %v5021_v32 }
  0xf3   : > { %v4545_v55 = vpop.eup %4544  ;;  %4564 = vrcp.f32 %v860_v30  ;;  %v859_v24 = vadd.f32 1.0, %v4543_v47  ;;  %v651_v2 = vadd.f32 %v5059_v61, %v593_v29  ;;  %v521_v50 = vpop.permute.xlu1 %520 }
  0xf4   : > { %v516_v11 = vpop.permute.xlu0 %515  ;;  %v4547_v18 = vpop.eup %4546  ;;  %4566 = vpow2.f32 %v3752_v52  ;;  %v3754_v4 = vmul.f32 -1.442695, %v652_v54  ;;  %1151 = vrot.lane.b32.xlu1 %v1013_v12, %s4844_s23  ;;  %1153 = vrot.lane.b32.xlu0 %v1014_v3, %s4844_s23  ;;  %v596_v31 = vmul.f32 %v5057_v60, %v521_v50  ;;  %v1016_v7 = vmul.f32 %v5224_v63, %v4545_v55  ;;  %v5252_v52 = vld [vmem:[%s4895_s20 + $0x128] sm:$0xff]  ;;  %v5258_v3 = vld [vmem:[%s4895_s20 + $0x130] sm:$0x3] }
  0xf5   : > { %v595_v57 = vmul.f32 %v5057_v60, %v516_v11  ;;  %v4549_v32 = vpop.eup %4548  ;;  %4568 = vrcp.f32 %v859_v24  ;;  %v3753_v17 = vmul.f32 -1.442695, %v651_v2  ;;  %v1015_v58 = vmul.f32 %v4547_v18, %v5027_v34  ;;  %v5262_v24 = vld [vmem:[%s4895_s20 + $0x138] sm:$0xff] }
  0xf6   : > { %v4551_v59 = vpop.eup %4550  ;;  %4570 = vpow2.f32 %v3751_v53  ;;  %v654_v8 = vadd.f32 %v5059_v61, %v596_v31  ;;  %v1018_v39 = vmul.f32 %v5236_v5, %v4549_v32  ;;  %v5268_v31 = vld [vmem:[%s4895_s20 + $0x140] sm:$0xff] }
  0xf7   : > { %v653_v62 = vadd.f32 %v5059_v61, %v595_v57  ;;  %v4553_v13 = vpop.eup %4552  ;;  %v862_v0 = vadd.f32 1.0, %v4551_v59  ;;  %4572 = vpow2.f32 %v3754_v4  ;;  %v531_v26 = vpop.permute.xlu1 %530 }
  0xf8   : > { %v526_v33 = vpop.permute.xlu0 %525  ;;  %v4555_v25 = vpop.eup %4554  ;;  %v861_v35 = vadd.f32 1.0, %v4553_v13  ;;  %4574 = vpow2.f32 %v3753_v17  ;;  %v3756_v34 = vmul.f32 -1.442695, %v654_v8  ;;  %1155 = vrot.lane.b32.xlu1 %v1015_v58, %s4844_s23  ;;  %1157 = vrot.lane.b32.xlu0 %v1016_v7, %s4844_s23  ;;  %v598_v19 = vmul.f32 %v5057_v60, %v531_v26  ;;  %v5272_v58 = vld [vmem:[%s4895_s20 + $0x148] sm:$0x3] }
  0xf9   : > { %v3755_v14 = vmul.f32 -1.442695, %v653_v62  ;;  %v4557_v36 = vpop.eup %4556  ;;  %4576 = vrcp.f32 %v862_v0  ;;  %v597_v37 = vmul.f32 %v5057_v60, %v526_v33  ;;  %v1017_v6 = vmul.f32 %v5232_v38, %v4555_v25  ;;  %v5278_v0 = vld [vmem:[%s4895_s20 + $0x150] sm:$0xff] }
  0xfa   : > { %v4559_v20 = vpop.eup %4558  ;;  %4578 = vrcp.f32 %v861_v35  ;;  %v656_v10 = vadd.f32 %v5059_v61, %v598_v19  ;;  %v1020_v23 = vmul.f32 %v5252_v52, %v4557_v36  ;;  %v5282_v35 = vld [vmem:[%s4895_s20 + $0x158] sm:$0xff] }
  0xfb   : > { %v4561_v40 = vpop.eup %4560  ;;  %v864_v41 = vadd.f32 1.0, %v4559_v20  ;;  %4580 = vpow2.f32 %v3756_v34  ;;  %v655_v9 = vadd.f32 %v5059_v61, %v597_v37  ;;  %v541_v42 = vpop.permute.xlu1 %540 }
  0xfc   : > { %v536_v28 = vpop.permute.xlu0 %535  ;;  %v4563_v27 = vpop.eup %4562  ;;  %v863_v43 = vadd.f32 1.0, %v4561_v40  ;;  %4582 = vpow2.f32 %v3755_v14  ;;  %1159 = vrot.lane.b32.xlu1 %v1017_v6, %s4844_s23  ;;  %1161 = vrot.lane.b32.xlu0 %v1018_v39, %s4844_s23  ;;  %v600_v44 = vmul.f32 %v5057_v60, %v541_v42  ;;  %v3758_v22 = vmul.f32 -1.442695, %v656_v10  ;;  %v5288_v39 = vld [vmem:[%s4895_s20 + $0x160] sm:$0x3] }
  0xfd   : > { %v599_v45 = vmul.f32 %v5057_v60, %v536_v28  ;;  %v4565_v46 = vpop.eup %4564  ;;  %4584 = vrcp.f32 %v864_v41  ;;  %v3757_v15 = vmul.f32 -1.442695, %v655_v9  ;;  %v1019_v16 = vmul.f32 %v5246_v21, %v4563_v27  ;;  %v5292_v41 = vld [vmem:[%s4895_s20 + $0x168] sm:$0xff]  ;;  %v5298_v28 = vld [vmem:[%s4895_s20 + $0x170] sm:$0xff] }
  0xfe   : > { %v4567_v48 = vpop.eup %4566  ;;  %4586 = vrcp.f32 %v863_v43  ;;  %v658_v49 = vadd.f32 %v5059_v61, %v600_v44  ;;  %v1022_v2 = vmul.f32 %v5262_v24, %v4565_v46 }
  0xff   : > { %v657_v51 = vadd.f32 %v5059_v61, %v599_v45  ;;  %v4569_v60 = vpop.eup %4568  ;;  %v866_v1 = vadd.f32 1.0, %v4567_v48  ;;  %4588 = vpow2.f32 %v3758_v22  ;;  %v5302_v45 = vld [vmem:[%s4895_s20 + $0x178] sm:$0x3] }
 0x100   : > { %v4571_v30 = vpop.eup %4570  ;;  %4590 = vpow2.f32 %v3757_v15  ;;  %v3760_v29 = vmul.f32 -1.442695, %v658_v49  ;;  %1163 = vrot.lane.b32.xlu1 %v1019_v16, %s4844_s23  ;;  %1165 = vrot.lane.b32.xlu0 %v1020_v23, %s4844_s23  ;;  %v1021_v47 = vmul.f32 %v5258_v3, %v4569_v60  ;;  %v5308_v15 = vld [vmem:[%s4895_s20 + $0x180] sm:$0xff]  ;;  %v5312_v49 = vld [vmem:[%s4895_s20 + $0x188] sm:$0xff] }
 0x101   : > { %v4573_v61 = vpop.eup %4572  ;;  %4592 = vrcp.f32 %v866_v1  ;;  %v865_v53 = vadd.f32 1.0, %v4571_v30  ;;  %v3759_v55 = vmul.f32 -1.442695, %v657_v51  ;;  %v4761_v60 = vld [vmem:[%s4895_s20 + $0x190] sm:$0x3]  ;;  %v4762_v30 = vld [vmem:[%s4895_s20 + $0x198] sm:$0xff] }
 0x102   : > { %v4575_v54 = vpop.eup %4574  ;;  %v868_v12 = vadd.f32 1.0, %v4573_v61  ;;  %4594 = vpow2.f32 %v3760_v29 }
 0x103   : > { %v4577_v50 = vpop.eup %4576  ;;  %4596 = vrcp.f32 %v865_v53  ;;  %v867_v11 = vadd.f32 1.0, %v4575_v54  ;;  %v4763_v53 = vld [vmem:[%s4895_s20 + $0x1a0] sm:$0xff] }
 0x104   : > { %v4579_v18 = vpop.eup %4578  ;;  %4598 = vrcp.f32 %v868_v12  ;;  %1167 = vrot.lane.b32.xlu1 %v1021_v47, %s4844_s23  ;;  %1169 = vrot.lane.b32.xlu0 %v1022_v2, %s4844_s23  ;;  %v1024_v59 = vmul.f32 %v5272_v58, %v4577_v50  ;;  %v4764_v12 = vld [vmem:[%s4895_s20 + $0x1a8] sm:$0x3] }
 0x105   : > { %v4581_v4 = vpop.eup %4580  ;;  %4600 = vrcp.f32 %v867_v11  ;;  %v1023_v57 = vmul.f32 %v5268_v31, %v4579_v18 }
 0x106   : > { %v4583_v32 = vpop.eup %4582  ;;  %v870_v17 = vadd.f32 1.0, %v4581_v4  ;;  %4602 = vpow2.f32 %v3759_v55 }
 0x107   : > { %v4585_v8 = vpop.eup %4584  ;;  %v869_v62 = vadd.f32 1.0, %v4583_v32  ;;  %v4765_v32 = vld [vmem:[%s4895_s20 + $0x18] sm:$0xff] }
 0x108   : > { %v4587_v7 = vpop.eup %4586  ;;  %4604 = vrcp.f32 %v870_v17  ;;  %1171 = vrot.lane.b32.xlu1 %v1023_v57, %s4844_s23  ;;  %1173 = vrot.lane.b32.xlu0 %v1024_v59, %s4844_s23  ;;  %v1026_v34 = vmul.f32 %v5282_v35, %v4585_v8  ;;  %v4766_v8 = vld [vmem:[%s4895_s20 + $0x28] sm:$0x3] }
 0x109   : > { %v4589_v13 = vpop.eup %4588  ;;  %4606 = vrcp.f32 %v869_v62  ;;  %v1025_v26 = vmul.f32 %v5278_v0, %v4587_v7  ;;  %v4767_v7 = vld [vmem:[%s4895_s20 + $0x20] sm:$0xff] }
 0x10a   : > { %v4591_v33 = vpop.eup %4590  ;;  %v872_v25 = vadd.f32 1.0, %v4589_v13 }
 0x10b   : > { %v4593_v14 = vpop.eup %4592  ;;  %v871_v36 = vadd.f32 1.0, %v4591_v33 }
 0x10c   : > { %v4595_v19 = vpop.eup %4594  ;;  %4608 = vrcp.f32 %v872_v25  ;;  %1175 = vrot.lane.b32.xlu1 %v1025_v26, %s4844_s23  ;;  %1177 = vrot.lane.b32.xlu0 %v1026_v34, %s4844_s23  ;;  %v1028_v10 = vmul.f32 %v5292_v41, %v4593_v14  ;;  %v4768_v14 = vld [vmem:[%s4895_s20 + $0x30] sm:$0xff] }
 0x10d   : > { %v4597_v37 = vpop.eup %4596  ;;  %4610 = vrcp.f32 %v871_v36  ;;  %v874_v6 = vadd.f32 1.0, %v4595_v19  ;;  %v4769_v19 = vld [vmem:[%s4895_s20 + $0x38] sm:$0xff] }
 0x10e   : > { %v4599_v20 = vpop.eup %4598  ;;  %v1027_v40 = vmul.f32 %v5288_v39, %v4597_v37 }
 0x10f   : > { %v4601_v9 = vpop.eup %4600  ;;  %4612 = vrcp.f32 %v874_v6  ;;  %v1030_v46 = vmul.f32 %v5302_v45, %v4599_v20 }
 0x110   : > { %v4603_v42 = vpop.eup %4602  ;;  %1179 = vrot.lane.b32.xlu1 %v1027_v40, %s4844_s23  ;;  %1181 = vrot.lane.b32.xlu0 %v1028_v10, %s4844_s23  ;;  %v1029_v27 = vmul.f32 %v5298_v28, %v4601_v9 }
 0x111   : > { %v873_v43 = vadd.f32 1.0, %v4603_v42 }
 0x112   : > { %v4605_v44 = vpop.eup %4604 }
 0x113   : > { %v4607_v22 = vpop.eup %4606  ;;  %4614 = vrcp.f32 %v873_v43  ;;  %v1032_v51 = vmul.f32 %v5312_v49, %v4605_v44  ;;  %v4770_v44 = vld [vmem:[%s4895_s20 + $0x48] sm:$0xff] }
 0x114   : > { %1183 = vrot.lane.b32.xlu1 %v1029_v27, %s4844_s23  ;;  %1185 = vrot.lane.b32.xlu0 %v1030_v46, %s4844_s23  ;;  %v1031_v16 = vmul.f32 %v5308_v15, %v4607_v22  ;;  %v4771_v22 = vld [vmem:[%s4895_s20 + $0x50] sm:$0xff] }
 0x116   : > { %v4609_v48 = vpop.eup %4608 }
 0x117   : > { %v4611_v23 = vpop.eup %4610  ;;  %v1034_v29 = vmul.f32 %v4762_v30, %v4609_v48 }
 0x118   : > { %1187 = vrot.lane.b32.xlu1 %v1031_v16, %s4844_s23  ;;  %1189 = vrot.lane.b32.xlu0 %v1032_v51, %s4844_s23  ;;  %v1033_v1 = vmul.f32 %v4761_v60, %v4611_v23 }
 0x119   : > { %v4613_v47 = vpop.eup %4612 }
 0x11a   : > { %v1036_v55 = vmul.f32 %v4764_v12, %v4613_v47 }
 0x11c   : > { %1191 = vrot.lane.b32.xlu1 %v1033_v1, %s4844_s23  ;;  %1193 = vrot.lane.b32.xlu0 %v1034_v29, %s4844_s23  ;;  %v4772_v1 = vld [vmem:[%s4895_s20 + $0x60] sm:$0xff]  ;;  %v4773_v29 = vld [vmem:[%s4895_s20 + $0x68] sm:$0xff] }
 0x11d   : > { %v4615_v61 = vpop.eup %4614 }
 0x11e   : > { %v1035_v54 = vmul.f32 %v4763_v53, %v4615_v61 }
 0x120   : > { %1195 = vrot.lane.b32.xlu1 %v1035_v54, %s4844_s23  ;;  %1197 = vrot.lane.b32.xlu0 %v1036_v55, %s4844_s23  ;;  %v4774_v55 = vld [vmem:[%s4895_s20 + $0x78] sm:$0xff]  ;;  %s4852_s23 = smov 119  }
 0x12e   : > { %v5325_v2 = vpop.permute.xlu1 %3911  ;;  %v5327_v50 = vpop.permute.xlu0 %3906 }
 0x12f   : > { %v3914_v11 = vunpack.i.h.bf16 %v5325_v2 }
 0x131   : > { %v5332_v17 = vsel %vm1253_vm0, %v4765_v32, %v3914_v11 }
 0x132   : > { %v3917_v18 = vpop.permute.xlu0 %3916  ;;  %7638 = vst [vmem:[#allocation3_spill] sm:$0xff] %v5332_v17  ;;  %v1362_v34 = vrot.slane %v5332_v17, 1 }
 0x133   : > { %v3919_v4 = vunpack.i.h.bf16 %v3917_v18  ;;  %v3918_v57 = vunpack.i.l.bf16 %v3917_v18  ;;  %v4775_v18 = vld [vmem:[%s4895_s20 + $0x80] sm:$0xff] }
 0x135   : > { %v1104_v59 = vpop.permute.xlu1 %1103  ;;  %v5336_v62 = vsel %vm1253_vm0, %v4766_v8, %v3919_v4  ;;  %v5340_v13 = vsel %vm1253_vm0, %v4767_v7, %v3918_v57  ;;  %v3909_v8 = vunpack.i.h.bf16 %v5327_v50  ;;  %v3908_v7 = vunpack.i.l.bf16 %v5327_v50 }
 0x136   : > { %7639 = vst [vmem:[#allocation4_spill] sm:$0xff] %v5340_v13  ;;  %v1106_v26 = vpop.permute.xlu0 %1105  ;;  %v1365_v33 = vrot.slane %v5336_v62, 1  ;;  %v1363_v25 = vrot.slane %v5340_v13, 1  ;;  %v5347_v36 = vsel %vm1253_vm0, %v4768_v14, %v1104_v59  ;;  %v3920_v6 = vpack.i.bf16 %v5340_v13, %v5332_v17  ;;  %v4777_v14 = vld [vmem:[%s4895_s20 + $0x98] sm:$0xff] }
 0x137   : > { %7640 = vst [vmem:[#allocation5_spill] sm:$0xff] %v5347_v36  ;;  %v5351_v37 = vsel %vm1253_vm0, %v4769_v19, %v1106_v26  ;;  %v3913_v59 = vunpack.i.l.bf16 %v5325_v2 }
 0x138   : > { %v3925_v40 = vpack.i.bf16 %v5351_v37, %v5347_v36  ;;  %3921 = vrot.lane.b32.xlu1 %v3920_v6, %s4845_s24  ;;  %v1364_v9 = vsel %vm1356_vm1, %v1362_v34, %v1363_v25  ;;  %v1366_v42 = vsel %vm1356_vm1, %v1363_v25, %v1365_v33  ;;  %v4776_v25 = vld [vmem:[%s4895_s20 + $0x58] sm:$0x3]  ;;  %v4778_v6 = vld [vmem:[%s4895_s20 + $0x90] sm:$0xff] }
 0x139   : > { %v5355_v20 = vpop.permute.xlu1 %1107  ;;  %v5363_v43 = vpack.i.bf16 %v1366_v42, %v1364_v9  ;;  %v4780_v9 = vld [vmem:[%s4895_s20 + $0x8] sm:$0xff] }
 0x13a   : > { %v1110_v10 = vpop.permute.xlu0 %1109  ;;  %3926 = vrot.lane.b32.xlu0 %v3925_v40, %s4845_s24  ;;  %v5423_v42 = vsel %vm1253_vm0, %v4780_v9, %v3909_v8 }
 0x13b   : > { %7641 = vst [vmem:[#allocation6_spill] sm:$0xff] %v5363_v43  ;;  %v5367_v46 = vsel %vm1253_vm0, %v4770_v44, %v1110_v10  ;;  %v4779_v10 = vld [vmem:[%s4895_s20 + $0x10] sm:$0x3]  ;;  %7642 = vst [vmem:[#allocation7_spill] sm:$0xff] %v5423_v42 }
 0x13c   : > { %v5419_v50 = vsel %vm1253_vm0, %v4779_v10, %v3913_v59 }
 0x13d   : > { %v1112_v27 = vpop.permute.xlu1 %1111 }
 0x13e   : > { %v5371_v16 = vsel %vm1253_vm0, %v4771_v22, %v1112_v27  ;;  %v1114_v48 = vpop.permute.xlu0 %1113  ;;  %v4781_v27 = vld [vmem:[%s4895_s20] sm:$0xff] }
 0x13f   : > { %v3930_v51 = vpack.i.bf16 %v5371_v16, %v5367_v46  ;;  %v5405_v34 = vsel %vm1253_vm0, %v4776_v25, %v1114_v48  ;;  %v5427_v44 = vsel %vm1253_vm0, %v4781_v27, %v3908_v7  ;;  %v4784_v7 = vld [vmem:[%s4895_s20 + $0xb0] sm:$0xff] }
 0x140   : > { %7643 = vst [vmem:[#allocation8_spill] sm:$0xff] %v5427_v44  ;;  %v1375_v22 = vrot.slane %v5405_v34, 1 }
 0x141   : > { %v1116_v23 = vpop.permute.xlu1 %1115  ;;  %3931 = vrot.lane.b32.xlu1 %v3930_v51, %s4845_s24 }
 0x142   : > { %v1118_v60 = vpop.permute.xlu0 %1117  ;;  %v5378_v30 = vsel %vm1253_vm0, %v4772_v1, %v1116_v23  ;;  %v4782_v23 = vld [vmem:[%s4895_s20 + $0x88] sm:$0x3]  ;;  %v1373_v1 = vrot.slane %v5371_v16, 1 }
 0x143   : > { %v5382_v47 = vsel %vm1253_vm0, %v4773_v29, %v1118_v60  ;;  %v1360_v29 = vrot.slane %v5419_v50, 1 }
 0x144   : > { %v3935_v61 = vpack.i.bf16 %v5382_v47, %v5378_v30 }
 0x145   : > { %v5386_v53 = vpop.permute.xlu1 %1119 }
 0x146   : > { %3936 = vrot.lane.b32.xlu0 %v3935_v61, %s4845_s24  ;;  %v1122_v54 = vpop.permute.xlu0 %1121  ;;  %v1358_v61 = vrot.slane %v5423_v42, 1 }
 0x147   : > { %v5391_v11 = vsel %vm1253_vm0, %v4774_v55, %v1122_v54  ;;  %v1357_v54 = vrot.slane %v5427_v44, 1 }
 0x149   : > { %v1124_v12 = vpop.permute.xlu1 %1123 }
 0x14a   : > { %v5395_v4 = vsel %vm1253_vm0, %v4775_v18, %v1124_v12  ;;  %v1126_v57 = vpop.permute.xlu0 %1125  ;;  %v4783_v12 = vld [vmem:[%s4895_s20 + $0x40] sm:$0x3]  ;;  %v1372_v18 = vrot.slane %v5367_v46, 1 }
 0x14b   : > { %v3940_v32 = vpack.i.bf16 %v5395_v4, %v5391_v11  ;;  %v5432_v60 = vsel %vm1253_vm0, %v4782_v23, %v1126_v57  ;;  %v5442_v55 = vsel %vm1253_vm0, %v4783_v12, %v5355_v20  ;;  %v5446_v57 = vsel %vm1356_vm1, %v1373_v1, %v1375_v22 }
 0x14c   : > { %7644 = vst [vmem:[#allocation9_spill] sm:$0xff] %v5446_v57  ;;  %v1383_v20 = vrot.slane %v5395_v4, 1  ;;  %v1370_v10 = vrot.slane %v5442_v55, 1  ;;  %v1359_v22 = vsel %vm1356_vm1, %v1357_v54, %v1358_v61  ;;  %v1382_v23 = vrot.slane %v5391_v11, 1 }
 0x14d   : > { %3941 = vrot.lane.b32.xlu1 %v3940_v32, %s4845_s24  ;;  %v1385_v32 = vrot.slane %v5432_v60, 1 }
 0x14e   : > { %v1128_v26 = vpop.permute.xlu1 %1127  ;;  %v1130_v33 = vpop.permute.xlu0 %1129 }
 0x14f   : > { %v5409_v19 = vsel %vm1253_vm0, %v4777_v14, %v1130_v33  ;;  %v5413_v40 = vsel %vm1253_vm0, %v4778_v6, %v1128_v26  ;;  %v4785_v33 = vld [vmem:[%s4895_s20 + $0xb8] sm:$0x3]  ;;  %v4786_v14 = vld [vmem:[%s4895_s20 + $0xa8] sm:$0xff]  ;;  %v5477_v12 = vsel %vm1356_vm1, %v1383_v20, %v1385_v32  ;;  %v5492_v32 = vsel %vm1356_vm1, %v1382_v23, %v1383_v20 }
 0x150   : > { %v3945_v2 = vpack.i.bf16 %v5409_v19, %v5413_v40  ;;  %7647 = vst [vmem:[#allocation12_spill] sm:$0xff] %v5477_v12  ;;  %7648 = vst [vmem:[#allocation13_spill] sm:$0xff] %v5492_v32 }
 0x152   : > { %v1132_v48 = vpop.permute.xlu1 %1131  ;;  %v1134_v51 = vpop.permute.xlu0 %1133  ;;  %3946 = vrot.lane.b32.xlu0 %v3945_v2, %s4845_s24  ;;  %v5465_v2 = vsel %vm1356_vm1, %v1372_v18, %v1373_v1 }
 0x153   : > { %v5462_v6 = vsel %vm1253_vm0, %v4786_v14, %v1134_v51  ;;  %7645 = vst [vmem:[#allocation10_spill] sm:$0xff] %v5465_v2  ;;  %v5472_v27 = vpack.i.bf16 %v5446_v57, %v5465_v2  ;;  %v4788_v2 = vld [vmem:[%s4895_s20 + $0xa0] sm:$0x3] }
 0x154   : > { %v1392_v56 = vrot.slane %v5462_v6, 1 }
 0x155   : > { %7646 = vst [vmem:[#allocation11_spill] sm:$0xff] %v5472_v27 }
 0x156   : > { %v1136_v59 = vpop.permute.xlu1 %1135  ;;  %v1138_v8 = vpop.permute.xlu0 %1137  ;;  %3961 = vrot.lane.b32.xlu0 %v5363_v43, %s4846_s25 }
 0x157   : > { %v5451_v26 = vsel %vm1253_vm0, %v4784_v7, %v1136_v59  ;;  %v5455_v25 = vsel %vm1253_vm0, %v4785_v33, %v1138_v8  ;;  %v1361_v59 = vsel %vm1356_vm1, %v1358_v61, %v1360_v29  ;;  %v1368_v8 = vrot.slane %v5351_v37, 1  ;;  %v4787_v7 = vld [vmem:[%s4895_s20 + $0x70] sm:$0x3] }
 0x158   : > { %v3950_v9 = vpack.i.bf16 %v5451_v26, %v5462_v6  ;;  %v1395_v51 = vrot.slane %v5455_v25, 1  ;;  %v5485_v33 = vsel %vm1253_vm0, %v4787_v7, %v5386_v53  ;;  %v1393_v54 = vrot.slane %v5451_v26, 1 }
 0x159   : > { %v1367_v29 = vrot.slane %v5347_v36, 1  ;;  %v5496_v61 = vsel %vm1356_vm1, %v1368_v8, %v1370_v10  ;;  %v3955_v14 = vpack.i.bf16 %v1361_v59, %v1359_v22  ;;  %v5500_v53 = vpack.i.bf16 %v5477_v12, %v5492_v32  ;;  %v4789_v12 = vld [vmem:[%s4895_s20 + $0xd8] sm:$0xff] }
 0x15a   : > { %v1140_v1 = vpop.permute.xlu1 %1139  ;;  %v1142_v18 = vpop.permute.xlu0 %1141  ;;  %3951 = vrot.lane.b32.xlu1 %v3950_v9, %s4845_s24  ;;  %3971 = vrot.lane.b32.xlu0 %v5472_v27, %s4846_s25  ;;  %7649 = vst [vmem:[#allocation14_spill] sm:$0xff] %v5496_v61  ;;  %v1378_v9 = vrot.slane %v5382_v47, 1  ;;  %v1380_v7 = vrot.slane %v5485_v33, 1  ;;  %v5506_v20 = vsel %vm1356_vm1, %v1393_v54, %v1395_v51  ;;  %v5510_v10 = vsel %vm1253_vm0, %v4788_v2, %v1132_v48 }
 0x15b   : > { %7650 = vst [vmem:[#allocation15_spill] sm:$0xff] %v5500_v53  ;;  %7651 = vst [vmem:[#allocation16_spill] sm:$0xff] %v5506_v20  ;;  %v1377_v22 = vrot.slane %v5378_v30, 1  ;;  %v5517_v59 = vsel %vm1356_vm1, %v1367_v29, %v1368_v8  ;;  %v5520_v51 = vsel %vm1356_vm1, %v1392_v56, %v1393_v54  ;;  %v1390_v8 = vrot.slane %v5510_v10, 1 }
 0x15c   : > { %7652 = vst [vmem:[#allocation17_spill] sm:$0xff] %v5517_v59  ;;  %7653 = vst [vmem:[#allocation18_spill] sm:$0xff] %v5520_v51  ;;  %v5528_v48 = vpack.i.bf16 %v5496_v61, %v5517_v59  ;;  %v3990_v2 = vpack.i.bf16 %v5506_v20, %v5520_v51  ;;  %v4791_v61 = vld [vmem:[%s4895_s20 + $0xe0] sm:$0xff] }
 0x15d   : > { %v5537_v54 = vsel %vm1356_vm1, %v1377_v22, %v1378_v9 }
 0x15e   : > { %v1144_v23 = vpop.permute.xlu1 %1143  ;;  %v1146_v57 = vpop.permute.xlu0 %1145  ;;  %3956 = vrot.lane.b32.xlu1 %v3955_v14, %s4846_s25  ;;  %3981 = vrot.lane.b32.xlu0 %v5500_v53, %s4846_s25  ;;  %7655 = vst [vmem:[#allocation20_spill] sm:$0xff] %v5528_v48  ;;  %v5533_v14 = vsel %vm1356_vm1, %v1378_v9, %v1380_v7  ;;  %7657 = vst [vmem:[#allocation22_spill] sm:$0xff] %v5537_v54  ;;  %v4792_v7 = vld [vmem:[%s4895_s20 + $0xe8] sm:$0x3]  ;;  %v1388_v9 = vrot.slane %v5409_v19, 1 }
 0x15f   : > { %v5524_v32 = vsel %vm1253_vm0, %v4789_v12, %v1146_v57  ;;  %7656 = vst [vmem:[#allocation21_spill] sm:$0xff] %v5533_v14  ;;  %v4790_v57 = vld [vmem:[%s4895_s20 + $0xd0] sm:$0x3] }
 0x160   : > { %7654 = vst [vmem:[#allocation19_spill] sm:$0xff] %v5524_v32  ;;  %v5541_v12 = vsel %vm1253_vm0, %v4790_v57, %v1144_v23  ;;  %v1402_v22 = vrot.slane %v5524_v32, 1  ;;  %v4793_v57 = vld [vmem:[%s4895_s20 + $0xc8] sm:$0xff] }
 0x161   : > { %v5561_v51 = vsel %vm1253_vm0, %v4793_v57, %v1142_v18  ;;  %v4794_v18 = vld [vmem:[%s4895_s20 + $0xc0] sm:$0xff] }
 0x162   : > { %v1148_v29 = vpop.permute.xlu1 %1147  ;;  %v1150_v56 = vpop.permute.xlu0 %1149  ;;  %3966 = vrot.lane.b32.xlu1 %v5528_v48, %s4846_s25  ;;  %3991 = vrot.lane.b32.xlu0 %v3990_v2, %s4846_s25  ;;  %7659 = vst [vmem:[#allocation24_spill] sm:$0xff] %v5561_v51  ;;  %v5568_v2 = vsel %vm1356_vm1, %v1388_v9, %v1390_v8  ;;  %v5579_v57 = vsel %vm1253_vm0, %v4794_v18, %v1140_v1  ;;  %v4795_v8 = vld [vmem:[%s4895_s20 + $0xf8] sm:$0xff] }
 0x163   : > { %v5545_v59 = vsel %vm1253_vm0, %v4791_v61, %v1148_v29  ;;  %v5551_v20 = vsel %vm1253_vm0, %v4792_v7, %v1150_v56  ;;  %v1387_v29 = vrot.slane %v5413_v40, 1  ;;  %v5565_v56 = vpack.i.bf16 %v5533_v14, %v5537_v54  ;;  %7661 = vst [vmem:[#allocation26_spill] sm:$0xff] %v5568_v2  ;;  %7664 = vst [vmem:[#allocation29_spill] sm:$0xff] %v5579_v57 }
 0x164   : > { %7658 = vst [vmem:[#allocation23_spill] sm:$0xff] %v5545_v59  ;;  %v1403_v23 = vrot.slane %v5545_v59, 1  ;;  %v1405_v61 = vrot.slane %v5551_v20, 1  ;;  %v1400_v7 = vrot.slane %v5541_v12, 1  ;;  %v1398_v54 = vrot.slane %v5561_v51, 1 }
 0x165   : > { %7660 = vst [vmem:[#allocation25_spill] sm:$0xff] %v5565_v56 }
 0x166   : > { %v5572_v48 = vsel %vm1356_vm1, %v1403_v23, %v1405_v61  ;;  %v1152_v53 = vpop.permute.xlu1 %1151  ;;  %v1154_v27 = vpop.permute.xlu0 %1153  ;;  %v5575_v43 = vsel %vm1356_vm1, %v1402_v22, %v1403_v23  ;;  %3976 = vrot.lane.b32.xlu1 %v5565_v56, %s4846_s25  ;;  %v5591_v22 = vsel %vm1356_vm1, %v1387_v29, %v1388_v9  ;;  %v4796_v23 = vld [vmem:[%s4895_s20 + $0xf0] sm:$0xff]  ;;  %v4797_v9 = vld [vmem:[%s4895_s20 + $0x100] sm:$0x3] }
 0x167   : > { %7662 = vst [vmem:[#allocation27_spill] sm:$0xff] %v5572_v48  ;;  %7663 = vst [vmem:[#allocation28_spill] sm:$0xff] %v5575_v43  ;;  %v5585_v14 = vsel %vm1253_vm0, %v4795_v8, %v1154_v27  ;;  %v4000_v61 = vpack.i.bf16 %v5572_v48, %v5575_v43  ;;  %v5595_v1 = vsel %vm1253_vm0, %v4796_v23, %v1152_v53  ;;  %v1397_v27 = vrot.slane %v5579_v57, 1 }
 0x168   : > { %7665 = vst [vmem:[#allocation30_spill] sm:$0xff] %v5591_v22  ;;  %7666 = vst [vmem:[#allocation31_spill] sm:$0xff] %v5595_v1  ;;  %v3985_v18 = vpack.i.bf16 %v5568_v2, %v5591_v22  ;;  %v5602_v8 = vsel %vm1356_vm1, %v1398_v54, %v1400_v7  ;;  %v1408_v48 = vrot.slane %v5585_v14, 1  ;;  %v1407_v53 = vrot.slane %v5595_v1, 1 }
 0x169   : > { %4001 = vrot.lane.b32.xlu0 %v4000_v61, %s4846_s25  ;;  %7667 = vst [vmem:[#allocation32_spill] sm:$0xff] %v5602_v8  ;;  %v5613_v61 = vsel %vm1356_vm1, %v1397_v27, %v1398_v54 }
 0x16a   : > { %v1156_v43 = vpop.permute.xlu1 %1155  ;;  %v1158_v56 = vpop.permute.xlu0 %1157  ;;  %3986 = vrot.lane.b32.xlu1 %v3985_v18, %s4846_s25  ;;  %7668 = vst [vmem:[#allocation33_spill] sm:$0xff] %v5613_v61  ;;  %v3995_v2 = vpack.i.bf16 %v5602_v8, %v5613_v61  ;;  %v5625_v18 = vsel %vm1356_vm1, %v1407_v53, %v1408_v48 }
 0x16b   : > { %v5607_v29 = vsel %vm1253_vm0, %v4797_v9, %v1156_v43  ;;  %v5617_v7 = vsel %vm1253_vm0, %v5224_v63, %v1158_v56 }
 0x16c   : > { %v1410_v23 = vrot.slane %v5607_v29, 1  ;;  %v1412_v56 = vrot.slane %v5617_v7, 1 }
 0x16e   : > { %v5622_v22 = vsel %vm1356_vm1, %v1408_v48, %v1410_v23  ;;  %v1160_v43 = vpop.permute.xlu1 %1159  ;;  %v1162_v9 = vpop.permute.xlu0 %1161  ;;  %3996 = vrot.lane.b32.xlu1 %v3995_v2, %s4846_s25 }
 0x16f   : > { %7669 = vst [vmem:[#allocation34_spill] sm:$0xff] %v5622_v22  ;;  %v5629_v1 = vsel %vm1253_vm0, %v5232_v38, %v1160_v43  ;;  %v5634_v63 = vsel %vm1253_vm0, %v5236_v5, %v1162_v9  ;;  %v4005_v54 = vpack.i.bf16 %v5622_v22, %v5625_v18 }
 0x170   : > { %v1413_v27 = vrot.slane %v5629_v1, 1  ;;  %v1415_v48 = vrot.slane %v5634_v63, 1 }
 0x172   : > { %v5642_v53 = vsel %vm1356_vm1, %v1413_v27, %v1415_v48  ;;  %v1164_v38 = vpop.permute.xlu1 %1163  ;;  %v1166_v23 = vpop.permute.xlu0 %1165  ;;  %v5645_v2 = vsel %vm1356_vm1, %v1412_v56, %v1413_v27  ;;  %4006 = vrot.lane.b32.xlu1 %v4005_v54, %s4846_s25 }
 0x173   : > { %7670 = vst [vmem:[#allocation35_spill] sm:$0xff] %v5642_v53  ;;  %7671 = vst [vmem:[#allocation36_spill] sm:$0xff] %v5645_v2  ;;  %v5650_v5 = vsel %vm1253_vm0, %v5252_v52, %v1166_v23  ;;  %v4010_v43 = vpack.i.bf16 %v5642_v53, %v5645_v2  ;;  %v5656_v9 = vsel %vm1253_vm0, %v5246_v21, %v1164_v38 }
 0x174   : > { %v1418_v48 = vrot.slane %v5650_v5, 1  ;;  %v1417_v52 = vrot.slane %v5656_v9, 1 }
 0x175   : > { %4011 = vrot.lane.b32.xlu0 %v4010_v43, %s4846_s25 }
 0x176   : > { %v1168_v8 = vpop.permute.xlu1 %1167  ;;  %v1170_v56 = vpop.permute.xlu0 %1169  ;;  %v5674_v61 = vsel %vm1356_vm1, %v1417_v52, %v1418_v48 }
 0x177   : > { %v5662_v54 = vsel %vm1253_vm0, %v5258_v3, %v1168_v8  ;;  %v5668_v23 = vsel %vm1253_vm0, %v5262_v24, %v1170_v56  ;;  %7673 = vst [vmem:[#allocation38_spill] sm:$0xff] %v5674_v61 }
 0x178   : > { %v1420_v27 = vrot.slane %v5662_v54, 1  ;;  %v1422_v56 = vrot.slane %v5668_v23, 1 }
 0x17a   : > { %v5671_v21 = vsel %vm1356_vm1, %v1418_v48, %v1420_v27  ;;  %v1172_v38 = vpop.permute.xlu1 %1171  ;;  %v1174_v43 = vpop.permute.xlu0 %1173 }
 0x17b   : > { %7672 = vst [vmem:[#allocation37_spill] sm:$0xff] %v5671_v21  ;;  %v5678_v3 = vsel %vm1253_vm0, %v5268_v31, %v1172_v38  ;;  %v5682_v8 = vsel %vm1253_vm0, %v5272_v58, %v1174_v43  ;;  %v4015_v24 = vpack.i.bf16 %v5671_v21, %v5674_v61  ;;  %v1441_v21 = vrot.slane %v5419_v50, 2 }
 0x17c   : > { %v1423_v27 = vrot.slane %v5678_v3, 1  ;;  %v1425_v53 = vrot.slane %v5682_v8, 1  ;;  %v1439_v61 = vrot.slane %v5423_v42, 2 }
 0x17d   : > { %4016 = vrot.lane.b32.xlu1 %v4015_v24, %s4846_s25  ;;  %v1438_v24 = vrot.slane %v5427_v44, 2  ;;  %v1443_v44 = vrot.slane %v5332_v17, 2  ;;  %v1446_v17 = vrot.slane %v5336_v62, 2  ;;  %v1448_v62 = vrot.slane %v5347_v36, 2 }
 0x17e   : > { %v5691_v48 = vsel %vm1356_vm1, %v1423_v27, %v1425_v53  ;;  %v1176_v31 = vpop.permute.xlu1 %1175  ;;  %v1178_v52 = vpop.permute.xlu0 %1177  ;;  %v5694_v38 = vsel %vm1356_vm1, %v1422_v56, %v1423_v27 }
 0x17f   : > { %7674 = vst [vmem:[#allocation39_spill] sm:$0xff] %v5691_v48  ;;  %7675 = vst [vmem:[#allocation40_spill] sm:$0xff] %v5694_v38  ;;  %v5698_v58 = vsel %vm1253_vm0, %v5282_v35, %v1178_v52  ;;  %v4020_v43 = vpack.i.bf16 %v5691_v48, %v5694_v38  ;;  %v5707_v53 = vsel %vm1253_vm0, %v5278_v0, %v1176_v31  ;;  %v1444_v48 = vrot.slane %v5340_v13, 2 }
 0x180   : > { %v1428_v56 = vrot.slane %v5698_v58, 1  ;;  %v1427_v50 = vrot.slane %v5707_v53, 1  ;;  %v1440_v31 = vsel %vm1437_vm2, %v1438_v24, %v1439_v61  ;;  %v1451_v38 = vrot.slane %v5442_v55, 2 }
 0x181   : > { %4021 = vrot.lane.b32.xlu0 %v4020_v43, %s4846_s25  ;;  %v1442_v43 = vsel %vm1437_vm2, %v1439_v61, %v1441_v21  ;;  %v5759_v13 = vsel %vm1437_vm2, %v1443_v44, %v1444_v48 }
 0x182   : > { %v1180_v35 = vpop.permute.xlu1 %1179  ;;  %v1182_v27 = vpop.permute.xlu0 %1181  ;;  %v5730_v22 = vsel %vm1356_vm1, %v1427_v50, %v1428_v56 }
 0x183   : > { %v5713_v52 = vsel %vm1253_vm0, %v5288_v39, %v1180_v35  ;;  %v5720_v0 = vsel %vm1253_vm0, %v5292_v41, %v1182_v27  ;;  %7678 = vst [vmem:[#allocation43_spill] sm:$0xff] %v5730_v22 }
 0x184   : > { %v1430_v42 = vrot.slane %v5713_v52, 1  ;;  %7676 = vst [vmem:[#allocation41_spill] sm:$0xff] %v5720_v0  ;;  %v1432_v21 = vrot.slane %v5720_v0, 1 }
 0x186   : > { %v5727_v39 = vsel %vm1356_vm1, %v1428_v56, %v1430_v42  ;;  %v1184_v35 = vpop.permute.xlu1 %1183  ;;  %v1186_v2 = vpop.permute.xlu0 %1185  ;;  %v1449_v42 = vrot.slane %v5351_v37, 2 }
 0x187   : > { %7677 = vst [vmem:[#allocation42_spill] sm:$0xff] %v5727_v39  ;;  %v5735_v41 = vsel %vm1253_vm0, %v5298_v28, %v1184_v35  ;;  %v5739_v61 = vsel %vm1253_vm0, %v5302_v45, %v1186_v2  ;;  %v4025_v55 = vpack.i.bf16 %v5727_v39, %v5730_v22  ;;  %v4035_v28 = vpack.i.bf16 %v1442_v43, %v1440_v31  ;;  %v7694_v22 = vld [vmem:[#allocation31_spill] sm:$0xff] }
 0x188   : > { %v1433_v24 = vrot.slane %v5735_v41, 1  ;;  %v1435_v56 = vrot.slane %v5739_v61, 1  ;;  %v5750_v27 = vsel %vm1437_vm2, %v1449_v42, %v1451_v38  ;;  %v1456_v39 = vrot.slane %v5405_v34, 2 }
 0x189   : > { %4026 = vrot.lane.b32.xlu1 %v4025_v55, %s4846_s25  ;;  %v1454_v43 = vrot.slane %v5371_v16, 2  ;;  %v5775_v44 = vsel %vm1437_vm2, %v1448_v62, %v1449_v42  ;;  %v5778_v34 = vsel %vm1437_vm2, %v1444_v48, %v1446_v17  ;;  %v1459_v42 = vrot.slane %v5382_v47, 2 }
 0x18a   : > { %v5753_v45 = vsel %vm1356_vm1, %v1433_v24, %v1435_v56  ;;  %v1188_v2 = vpop.permute.xlu1 %1187  ;;  %v1190_v50 = vpop.permute.xlu0 %1189  ;;  %v5756_v35 = vsel %vm1356_vm1, %v1432_v21, %v1433_v24  ;;  %v1461_v21 = vrot.slane %v5485_v33, 2  ;;  %v1453_v33 = vrot.slane %v5367_v46, 2 }
 0x18b   : > { %7679 = vst [vmem:[#allocation44_spill] sm:$0xff] %v5753_v45  ;;  %7680 = vst [vmem:[#allocation45_spill] sm:$0xff] %v5756_v35  ;;  %v5764_v55 = vsel %vm1253_vm0, %v5308_v15, %v1188_v2  ;;  %v5768_v38 = vsel %vm1253_vm0, %v5312_v49, %v1190_v50  ;;  %v4030_v31 = vpack.i.bf16 %v5753_v45, %v5756_v35  ;;  %v1458_v50 = vrot.slane %v5378_v30, 2 }
 0x18c   : > { %7681 = vst [vmem:[#allocation46_spill] sm:$0xff] %v5764_v55  ;;  %7682 = vst [vmem:[#allocation47_spill] sm:$0xff] %v5768_v38  ;;  %v1521_v15 = vrot.slane %v5764_v55, 1  ;;  %v1526_v24 = vrot.slane %v5764_v55, 2  ;;  %v7573_v49 = vrot.slane %v5768_v38, 1  ;;  %v7574_v56 = vrot.slane %v5768_v38, 2 }
 0x18d   : > { %4036 = vrot.lane.b32.xlu1 %v4035_v28, %s4847_s26  ;;  %4031 = vrot.lane.b32.xlu0 %v4030_v31, %s4846_s25  ;;  %v4045_v17 = vpack.i.bf16 %v5750_v27, %v5775_v44  ;;  %v5791_v48 = vsel %vm1437_vm2, %v1454_v43, %v1456_v39  ;;  %v4040_v62 = vpack.i.bf16 %v5778_v34, %v5759_v13  ;;  %v1466_v39 = vrot.slane %v5432_v60, 2  ;;  %s4853_s25 = smov 8  }
 0x18e   : > { %v5798_v2 = vsel %vm1356_vm1, %v1521_v15, %v7573_v49  ;;  %v5803_v28 = vsel %vm1437_vm2, %v1526_v24, %v7574_v56  ;;  %v5807_v31 = vsel %vm1437_vm2, %v1459_v42, %v1461_v21  ;;  %v1471_v45 = vrot.slane %v5510_v10, 2 }
 0x18f   : > { %7683 = vst [vmem:[#allocation48_spill] sm:$0xff] %v5798_v2  ;;  %7684 = vst [vmem:[#allocation49_spill] sm:$0xff] %v5803_v28  ;;  %v1464_v15 = vrot.slane %v5395_v4, 2  ;;  %v1469_v49 = vrot.slane %v5409_v19, 2  ;;  %v5816_v24 = vsel %vm1437_vm2, %v1458_v50, %v1459_v42  ;;  %v5819_v56 = vsel %vm1437_vm2, %v1453_v33, %v1454_v43 }
 0x190   : > { %v1463_v21 = vrot.slane %v5391_v11, 2  ;;  %v1476_v60 = vrot.slane %v5455_v25, 2  ;;  %v4055_v10 = vpack.i.bf16 %v5807_v31, %v5816_v24  ;;  %v1468_v28 = vrot.slane %v5413_v40, 2 }
 0x191   : > { %4046 = vrot.lane.b32.xlu1 %v4045_v17, %s4847_s26  ;;  %4041 = vrot.lane.b32.xlu0 %v4040_v62, %s4847_s26  ;;  %v4050_v17 = vpack.i.bf16 %v5791_v48, %v5819_v56  ;;  %v5828_v62 = vsel %vm1437_vm2, %v1464_v15, %v1466_v39  ;;  %v5832_v42 = vsel %vm1437_vm2, %v1469_v49, %v1471_v45  ;;  %v1481_v43 = vrot.slane %v5541_v12, 2 }
 0x192   : > { %7685 = vst [vmem:[#allocation50_spill] sm:$0xff] %v5828_v62  ;;  %7686 = vst [vmem:[#allocation51_spill] sm:$0xff] %v5832_v42  ;;  %v1474_v33 = vrot.slane %v5451_v26, 2  ;;  %v1479_v25 = vrot.slane %v5561_v51, 2  ;;  %v5840_v50 = vsel %vm1437_vm2, %v1468_v28, %v1469_v49  ;;  %v5843_v39 = vsel %vm1437_vm2, %v1463_v21, %v1464_v15 }
 0x193   : > { %7687 = vst [vmem:[#allocation52_spill] sm:$0xff] %v5840_v50  ;;  %7688 = vst [vmem:[#allocation53_spill] sm:$0xff] %v5843_v39  ;;  %v1473_v2 = vrot.slane %v5462_v6, 2  ;;  %v4065_v12 = vpack.i.bf16 %v5832_v42, %v5840_v50  ;;  %v1486_v49 = vrot.slane %v5551_v20, 2  ;;  %v1491_v28 = vrot.slane %v5607_v29, 2 }
 0x194   : > { %v5847_v45 = vsel %vm1437_vm2, %v1474_v33, %v1476_v60  ;;  %v5855_v35 = vsel %vm1437_vm2, %v1479_v25, %v1481_v43  ;;  %v1484_v15 = vrot.slane %v5545_v59, 2  ;;  %v1489_v21 = vrot.slane %v5585_v14, 2 }
 0x195   : > { %4056 = vrot.lane.b32.xlu1 %v4055_v10, %s4847_s26  ;;  %4051 = vrot.lane.b32.xlu0 %v4050_v17, %s4847_s26  ;;  %7689 = vst [vmem:[#allocation54_spill] sm:$0xff] %v5847_v45  ;;  %v4060_v10 = vpack.i.bf16 %v5828_v62, %v5843_v39  ;;  %v1478_v17 = vrot.slane %v5579_v57, 2  ;;  %7690 = vst [vmem:[#allocation55_spill] sm:$0xff] %v5855_v35  ;;  %v5867_v42 = vsel %vm1437_vm2, %v1473_v2, %v1474_v33 }
 0x196   : > { %7692 = vst [vmem:[#allocation57_spill] sm:$0xff] %v5867_v42  ;;  %v1483_v43 = vrot.slane %v5524_v32, 2  ;;  %v1496_v20 = vrot.slane %v5634_v63, 2  ;;  %v1488_v50 = vrot.slane %v7694_v22, 2  ;;  %v1501_v2 = vrot.slane %v5662_v54, 2 }
 0x197   : > { %v5864_v60 = vsel %vm1437_vm2, %v1478_v17, %v1479_v25  ;;  %v5880_v25 = vsel %vm1437_vm2, %v1489_v21, %v1491_v28  ;;  %v1494_v33 = vrot.slane %v5629_v1, 2  ;;  %v1499_v63 = vrot.slane %v5650_v5, 2 }
 0x198   : > { %7691 = vst [vmem:[#allocation56_spill] sm:$0xff] %v5864_v60  ;;  %v4075_v29 = vpack.i.bf16 %v5855_v35, %v5864_v60  ;;  %v5888_v17 = vsel %vm1437_vm2, %v1488_v50, %v1489_v21  ;;  %v1493_v35 = vrot.slane %v5617_v7, 2  ;;  %v1506_v50 = vrot.slane %v5682_v8, 2  ;;  %v2576_v8 = vld [vmem:[%s7516_s2] sm:$0xff] }
 0x199   : > { %4066 = vrot.lane.b32.xlu1 %v4065_v12, %s4847_s26  ;;  %4061 = vrot.lane.b32.xlu0 %v4060_v10, %s4847_s26  ;;  %v4070_v12 = vpack.i.bf16 %v5847_v45, %v5867_v42  ;;  %v5876_v10 = vsel %vm1437_vm2, %v1484_v15, %v1486_v49  ;;  %v5891_v49 = vsel %vm1437_vm2, %v1483_v43, %v1484_v15  ;;  %v1511_v15 = vrot.slane %v5713_v52, 2  ;;  %v2577_v52 = vld [vmem:[%s7516_s2 + $0x8] sm:$0xff] }
 0x19a   : > { %7693 = vst [vmem:[#allocation58_spill] sm:$0xff] %v5876_v10  ;;  %7695 = vst [vmem:[#allocation59_spill] sm:$0xff] %v5891_v49  ;;  %v5895_v28 = vsel %vm1437_vm2, %v1494_v33, %v1496_v20  ;;  %v4085_v54 = vpack.i.bf16 %v5880_v25, %v5888_v17  ;;  %v5903_v60 = vsel %vm1437_vm2, %v1499_v63, %v1501_v2  ;;  %v1504_v43 = vrot.slane %v5678_v3, 2 }
 0x19b   : > { %v5910_v21 = vsel %vm1437_vm2, %v1493_v35, %v1494_v33  ;;  %v1509_v20 = vrot.slane %v5698_v58, 2  ;;  %v1503_v2 = vrot.slane %v5668_v23, 2  ;;  %v1516_v62 = vrot.slane %v5739_v61, 2  ;;  %v2579_v61 = vld [vmem:[%s7516_s2 + $0x18] sm:$0xff] }
 0x19c   : > { %v4090_v33 = vpack.i.bf16 %v5895_v28, %v5910_v21  ;;  %v1514_v39 = vrot.slane %v5735_v41, 2 }
 0x19d   : > { %4076 = vrot.lane.b32.xlu1 %v4075_v29, %s4847_s26  ;;  %4071 = vrot.lane.b32.xlu0 %v4070_v12, %s4847_s26  ;;  %v4080_v29 = vpack.i.bf16 %v5876_v10, %v5891_v49  ;;  %v1498_v12 = vrot.slane %v5656_v9, 2  ;;  %v5935_v42 = vsel %vm1437_vm2, %v1509_v20, %v1511_v15 }
 0x19e   : > { %7697 = vst [vmem:[#allocation61_spill] sm:$0xff] %v5935_v42 }
 0x19f   : > { %v5915_v45 = vsel %vm1437_vm2, %v1498_v12, %v1499_v63  ;;  %v3831_v63 = vpack.c.bf16 %v2577_v52, %v2576_v8  ;;  %v1508_v12 = vrot.slane %v5707_v53, 2  ;;  %v5945_v52 = vsel %vm1437_vm2, %v1503_v2, %v1504_v43 }
 0x1a0   : > { %v4095_v35 = vpack.i.bf16 %v5903_v60, %v5915_v45  ;;  %7699 = vst [vmem:[#allocation63_spill] sm:$0xff] %v5945_v52  ;;  %v1513_v2 = vrot.slane %v5720_v0, 2 }
 0x1a1   : > { %4086 = vrot.lane.b32.xlu1 %v4085_v54, %s4847_s26  ;;  %4081 = vrot.lane.b32.xlu0 %v4080_v29, %s4847_s26  ;;  %v4848_v54 = vmov 0.0|0.0   ;;  %v5931_v29 = vsel %vm1437_vm2, %v1504_v43, %v1506_v50  ;;  %v5942_v8 = vsel %vm1437_vm2, %v1508_v12, %v1509_v20  ;;  %v2578_v50 = vld [vmem:[%s7516_s2 + $0x10] sm:$0xff]  ;;  %v2581_v12 = vld [vmem:[%s7516_s2 + $0x28] sm:$0xff] }
 0x1a2   : > { %3830 = vmatprep.subr.bf16.mxu0 %v4848_v54  ;;  %3861 = vmatprep.subr.bf16.mxu1 %v4848_v54  ;;  %7696 = vst [vmem:[#allocation60_spill] sm:$0xff] %v5931_v29  ;;  %7698 = vst [vmem:[#allocation62_spill] sm:$0xff] %v5942_v8  ;;  %v4105_v15 = vpack.i.bf16 %v5935_v42, %v5942_v8  ;;  %v4100_v20 = vpack.i.bf16 %v5931_v29, %v5945_v52 }
 0x1a3   : > { %3832 = vmatpush1.bf16.msra.mxu0 %v3831_v63  ;;  %3871 = vmatpush1.bf16.msra.mxu1 %v3831_v63  ;;  %v3834_v43 = vpack.c.bf16 %v2579_v61, %v2578_v50  ;;  %v2580_v63 = vld [vmem:[%s7516_s2 + $0x20] sm:$0xff]  ;;  %v2582_v61 = vld [vmem:[%s7516_s2 + $0x30] sm:$0xff] }
 0x1a4   : > { %3833 = vmatprep.subr.bf16.mxu0 %v4848_v54  ;;  %3862 = vmatprep.subr.bf16.mxu1 %v4848_v54 }
 0x1a5   : > { %4096 = vrot.lane.b32.xlu1 %v4095_v35, %s4847_s26  ;;  %4091 = vrot.lane.b32.xlu0 %v4090_v33, %s4847_s26  ;;  %v5961_v35 = vsel %vm1437_vm2, %v1514_v39, %v1516_v62  ;;  %v5966_v33 = vsel %vm1437_vm2, %v1513_v2, %v1514_v39  ;;  %v4120_v62 = vpack.i.bf16 %v5545_v59, %v5524_v32  ;;  %v7723_v59 = vld [vmem:[#allocation36_spill] sm:$0xff] }
 0x1a6   : > { %7700 = vst [vmem:[#allocation64_spill] sm:$0xff] %v5961_v35  ;;  %7701 = vst [vmem:[#allocation65_spill] sm:$0xff] %v5966_v33  ;;  %v4110_v50 = vpack.i.bf16 %v5961_v35, %v5966_v33  ;;  %v3837_v39 = vpack.c.bf16 %v2581_v12, %v2580_v63  ;;  %v2584_v63 = vld [vmem:[%s7516_s2 + $0x40] sm:$0xff]  ;;  %v2585_v12 = vld [vmem:[%s7516_s2 + $0x48] sm:$0xff] }
 0x1a7   : > { %3835 = vmatpush1.bf16.msra.mxu0 %v3834_v43  ;;  %3872 = vmatpush1.bf16.msra.mxu1 %v3834_v43  ;;  %v4115_v43 = vpack.i.bf16 %v5561_v51, %v5579_v57 }
 0x1a8   : > { %3836 = vmatprep.subr.bf16.mxu0 %v4848_v54  ;;  %3863 = vmatprep.subr.bf16.mxu1 %v4848_v54 }
 0x1a9   : > { %4106 = vrot.lane.b32.xlu1 %v4105_v15, %s4847_s26  ;;  %4101 = vrot.lane.b32.xlu0 %v4100_v20, %s4847_s26  ;;  %v2583_v15 = vld [vmem:[%s7516_s2 + $0x38] sm:$0xff]  ;;  %v4130_v20 = vpack.i.bf16 %v5629_v1, %v5617_v7 }
 0x1aa   : > { %v3840_v2 = vpack.c.bf16 %v2583_v15, %v2582_v61  ;;  %v2586_v61 = vld [vmem:[%s7516_s2 + $0x50] sm:$0xff]  ;;  %v2587_v15 = vld [vmem:[%s7516_s2 + $0x58] sm:$0xff] }
 0x1ab   : > { %3838 = vmatpush1.bf16.msra.mxu0 %v3837_v39  ;;  %3873 = vmatpush1.bf16.msra.mxu1 %v3837_v39  ;;  %v3843_v39 = vpack.c.bf16 %v2585_v12, %v2584_v63  ;;  %v6022_v63 = vpop.permute.xlu1 %1191  ;;  %v2588_v12 = vld [vmem:[%s7516_s2 + $0x60] sm:$0xff] }
 0x1ac   : > { %3839 = vmatprep.subr.bf16.mxu0 %v4848_v54  ;;  %3864 = vmatprep.subr.bf16.mxu1 %v4848_v54  ;;  %7702 = vst [vmem:[#allocation66_spill] sm:$0xff] %v6022_v63 }
 0x1ad   : > { %4121 = vrot.lane.b32.xlu1 %v4120_v62, %s4845_s24  ;;  %4111 = vrot.lane.b32.xlu0 %v4110_v50, %s4847_s26  ;;  %v4140_v62 = vpack.i.bf16 %v5678_v3, %v5668_v23  ;;  %v4125_v50 = vpack.i.bf16 %v5585_v14, %v7694_v22  ;;  %s4854_s26 = smov 102  }
 0x1af   : > { %3841 = vmatpush1.bf16.msra.mxu0 %v3840_v2  ;;  %3874 = vmatpush1.bf16.msra.mxu1 %v3840_v2  ;;  %v3846_v2 = vpack.c.bf16 %v2587_v15, %v2586_v61  ;;  %v7703_v61 = vld [vmem:[#allocation6_spill] sm:$0xff]  ;;  %v2590_v15 = vld [vmem:[%s7516_s2 + $0x70] sm:$0xff] }
 0x1b0   : > { %3842 = vmatprep.subr.bf16.mxu0 %v4848_v54  ;;  %3865 = vmatprep.subr.bf16.mxu1 %v4848_v54 }
 0x1b1   : > { %4131 = vrot.lane.b32.xlu1 %v4130_v20, %s4845_s24  ;;  %4116 = vrot.lane.b32.xlu0 %v4115_v43, %s4845_s24  ;;  %v4150_v20 = vpack.i.bf16 %v5735_v41, %v5720_v0  ;;  %v4135_v43 = vpack.i.bf16 %v5650_v5, %v5656_v9 }
 0x1b3   : > { %3844 = vmatpush1.bf16.msra.mxu0 %v3843_v39  ;;  %3875 = vmatpush1.bf16.msra.mxu1 %v3843_v39 }
 0x1b4   : > { %3845 = vmatprep.subr.bf16.mxu0 %v4848_v54  ;;  %3866 = vmatprep.subr.bf16.mxu1 %v4848_v54 }
 0x1b5   : > { %4141 = vrot.lane.b32.xlu1 %v4140_v62, %s4845_s24  ;;  %4126 = vrot.lane.b32.xlu0 %v4125_v50, %s4845_s24  ;;  %v2589_v62 = vld [vmem:[%s7516_s2 + $0x68] sm:$0xff]  ;;  %v4145_v50 = vpack.i.bf16 %v5698_v58, %v5707_v53 }
 0x1b6   : > { %v3849_v39 = vpack.c.bf16 %v2589_v62, %v2588_v12  ;;  %v7705_v62 = vld [vmem:[#allocation11_spill] sm:$0xff] }
 0x1b7   : > { %3847 = vmatpush1.bf16.msra.mxu0 %v3846_v2  ;;  %3876 = vmatpush1.bf16.msra.mxu1 %v3846_v2  ;;  %v6047_v2 = vpop.permute.xlu1 %1195 }
 0x1b8   : > { %3848 = vmatprep.subr.bf16.mxu0 %v4848_v54  ;;  %3867 = vmatprep.subr.bf16.mxu1 %v4848_v54  ;;  %7704 = vst [vmem:[#allocation6_spill] sm:$0xff] %v6047_v2  ;;  %v2594_v2 = vld [vmem:[%s7516_s2 + $0x90] sm:$0xff] }
 0x1b9   : > { %4151 = vrot.lane.b32.xlu1 %v4150_v20, %s4845_s24  ;;  %4136 = vrot.lane.b32.xlu0 %v4135_v43, %s4845_s24  ;;  %v2591_v20 = vld [vmem:[%s7516_s2 + $0x78] sm:$0xff]  ;;  %v4155_v43 = vpack.i.bf16 %v5768_v38, %v5764_v55  ;;  %v4210_v38 = vpack.i.bf16 %v5585_v14, %v5351_v37 }
 0x1ba   : > { %v3852_v12 = vpack.c.bf16 %v2591_v20, %v2590_v15  ;;  %v6064_v20 = vpop.permute.xlu0 %1193 }
 0x1bb   : > { %3850 = vmatpush1.bf16.msra.mxu0 %v3849_v39  ;;  %3877 = vmatpush1.bf16.msra.mxu1 %v3849_v39  ;;  %v2593_v39 = vld [vmem:[%s7516_s2 + $0x88] sm:$0xff]  ;;  %7707 = vst [vmem:[#allocation67_spill] sm:$0xff] %v6064_v20  ;;  %v7715_v20 = vld [vmem:[#allocation17_spill] sm:$0xff] }
 0x1bc   : > { %3851 = vmatprep.subr.bf16.mxu0 %v4848_v54  ;;  %3868 = vmatprep.subr.bf16.mxu1 %v4848_v54 }
 0x1bd   : > { %4161 = vrot.lane.b32.xlu1 %v7703_v61, %s4849_s7  ;;  %4146 = vrot.lane.b32.xlu0 %v4145_v50, %s4845_s24  ;;  %v2592_v50 = vld [vmem:[%s7516_s2 + $0x80] sm:$0xff]  ;;  %v6060_v61 = vpop.permute.xlu1 %3921 }
 0x1be   : > { %7706 = vst [vmem:[#allocation11_spill] sm:$0xff] %v6060_v61  ;;  %v3855_v15 = vpack.c.bf16 %v2593_v39, %v2592_v50 }
 0x1bf   : > { %3853 = vmatpush1.bf16.msra.mxu0 %v3852_v12  ;;  %3878 = vmatpush1.bf16.msra.mxu1 %v3852_v12  ;;  %v2595_v12 = vld [vmem:[%s7516_s2 + $0x98] sm:$0x1] }
 0x1c0   : > { %3854 = vmatprep.subr.bf16.mxu0 %v4848_v54  ;;  %3869 = vmatprep.subr.bf16.mxu1 %v4848_v54  ;;  %v3858_v50 = vpack.c.bf16 %v2595_v12, %v2594_v2  ;;  %v6085_v2 = vpop.permute.xlu0 %1197  ;;  %v7713_v12 = vld [vmem:[#allocation30_spill] sm:$0xff] }
 0x1c1   : > { %4171 = vrot.lane.b32.xlu1 %v7705_v62, %s4849_s7  ;;  %4156 = vrot.lane.b32.xlu0 %v4155_v43, %s4845_s24  ;;  %v7708_v43 = vld [vmem:[#allocation15_spill] sm:$0xff]  ;;  %v7709_v62 = vld [vmem:[#allocation20_spill] sm:$0xff]  ;;  %v6076_v39 = vpop.permute.xlu1 %3931 }
 0x1c2   : > { %7710 = vst [vmem:[#allocation15_spill] sm:$0xff] %v6076_v39  ;;  %7712 = vst [vmem:[#allocation20_spill] sm:$0xff] %v6085_v2  ;;  %v7717_v2 = vld [vmem:[#allocation27_spill] sm:$0xff]  ;;  %v3934_v51 = vunpack.i.h.bf16 %v6076_v39 }
 0x1c3   : > { %3856 = vmatpush1.bf16.msra.mxu0 %v3855_v15  ;;  %3879 = vmatpush1.bf16.msra.mxu1 %v3855_v15 }
 0x1c4   : > { %3857 = vmatprep.subr.bf16.mxu0 %v4848_v54  ;;  %3870 = vmatprep.subr.bf16.mxu1 %v4848_v54  ;;  %v6094_v54 = vpop.permute.xlu0 %3926 }
 0x1c5   : > { %4181 = vrot.lane.b32.xlu1 %v7708_v43, %s4849_s7  ;;  %4166 = vrot.lane.b32.xlu0 %v7709_v62, %s4849_s7  ;;  %v4190_v43 = vpack.i.bf16 %v5891_v49, %v5759_v13  ;;  %v7711_v62 = vld [vmem:[#allocation25_spill] sm:$0xff]  ;;  %v6087_v15 = vpop.permute.xlu1 %3941  ;;  %v7714_v13 = vld [vmem:[#allocation28_spill] sm:$0xff] }
 0x1c6   : > { %v4185_v49 = vpack.i.bf16 %v7714_v13, %v7713_v12  ;;  %7716 = vst [vmem:[#allocation25_spill] sm:$0xff] %v6094_v54  ;;  %v7727_v54 = vld [vmem:[#allocation9_spill] sm:$0xff]  ;;  %v3943_v39 = vunpack.i.l.bf16 %v6087_v15 }
 0x1c7   : > { %3860 = vmatpush1.bf16.msk.msra.mxu0 %vm3859_vm5, %v3858_v50  ;;  %3880 = vmatpush1.bf16.msk.msra.mxu1 %vm3859_vm5, %v3858_v50  ;;  %v4195_v50 = vpack.i.bf16 %v7694_v22, %v5347_v36 }
 0x1c9   : > { %4191 = vrot.lane.b32.xlu1 %v4190_v43, %s4851_s22  ;;  %4176 = vrot.lane.b32.xlu0 %v7711_v62, %s4849_s7  ;;  %v6103_v62 = vpop.permute.xlu0 %3936 }
 0x1ca   : > { %v3939_v42 = vunpack.i.h.bf16 %v6103_v62 }
 0x1cc   : > { %v6096_v43 = vpop.permute.xlu1 %3951 }
 0x1cd   : > { %2120 = vrot.lane.b32.xlu1 %v7715_v20, %s4852_s23  ;;  %4186 = vrot.lane.b32.xlu0 %v4185_v49, %s4849_s7  ;;  %v4200_v20 = vpack.i.bf16 %v5625_v18, %v7717_v2  ;;  %v6112_v13 = vpop.permute.xlu0 %3946  ;;  %v4205_v2 = vpack.i.bf16 %v5876_v10, %v5778_v34  ;;  %v4220_v34 = vpack.i.bf16 %v5617_v7, %v5367_v46 }
 0x1d0   : > { %v6107_v49 = vpop.permute.xlu1 %3956 }
 0x1d1   : > { %2216 = vrot.lane.b32.xlu1 %v5775_v44, %s4853_s25  ;;  %4196 = vrot.lane.b32.xlu0 %v4195_v50, %s4854_s26  ;;  %7718 = vst [vmem:[#allocation17_spill] sm:$0xff] %v6107_v49  ;;  %v6123_v63 = vpop.permute.xlu0 %3961 }
 0x1d2   : > { %7720 = vst [vmem:[#allocation69_spill] sm:$0xff] %v6123_v63  ;;  %v3944_v63 = vunpack.i.h.bf16 %v6087_v15  ;;  %v3954_v15 = vunpack.i.h.bf16 %v6096_v43 }
 0x1d4   : > { %v6119_v50 = vpop.permute.xlu1 %3966 }
 0x1d5   : > { %4201 = vrot.lane.b32.xlu1 %v4200_v20, %s4849_s7  ;;  %2152 = vrot.lane.b32.xlu0 %v5625_v18, %s4852_s23  ;;  %7719 = vst [vmem:[#allocation68_spill] sm:$0xff] %v6119_v50  ;;  %v7721_v20 = vld [vmem:[#allocation34_spill] sm:$0xff]  ;;  %v6134_v22 = vpop.permute.xlu0 %3971  ;;  %v3969_v33 = vunpack.i.h.bf16 %v6119_v50  ;;  %v3938_v50 = vunpack.i.l.bf16 %v6103_v62  ;;  %v3948_v62 = vunpack.i.l.bf16 %v6112_v13 }
 0x1d6   : > { %v4225_v55 = vpack.i.bf16 %v7723_v59, %v7721_v20 }
 0x1d8   : > { %v6128_v18 = vpop.permute.xlu1 %3976 }
 0x1d9   : > { %4211 = vrot.lane.b32.xlu1 %v4210_v38, %s4854_s26  ;;  %2248 = vrot.lane.b32.xlu0 %v5888_v17, %s4853_s25  ;;  %v7722_v38 = vld [vmem:[#allocation14_spill] sm:$0xff]  ;;  %v6145_v36 = vpop.permute.xlu0 %3981  ;;  %v3979_v49 = vunpack.i.h.bf16 %v6128_v18 }
 0x1da   : > { %v3984_v57 = vunpack.i.h.bf16 %v6145_v36  ;;  %v3983_v8 = vunpack.i.l.bf16 %v6145_v36  ;;  %v3978_v36 = vunpack.i.l.bf16 %v6128_v18 }
 0x1dc   : > { %v6141_v10 = vpop.permute.xlu1 %3986  ;;  %v2323_v18 = vsel %vm2312_vm6, %v5391_v11, %v3983_v8 }
 0x1dd   : > { %2154 = vrot.lane.b32.xlu1 %v7721_v20, %s4852_s23  ;;  %4206 = vrot.lane.b32.xlu0 %v4205_v2, %s4851_s22  ;;  %v4215_v2 = vpack.i.bf16 %v5888_v17, %v5775_v44  ;;  %v6156_v35 = vpop.permute.xlu0 %3991  ;;  %v4230_v44 = vpack.i.bf16 %v5880_v25, %v5750_v27 }
 0x1e1   : > { %2250 = vrot.lane.b32.xlu1 %v5880_v25, %s4853_s25  ;;  %2122 = vrot.lane.b32.xlu0 %v7722_v38, %s4852_s23  ;;  %v6150_v38 = vpop.permute.xlu1 %3996  ;;  %v6163_v17 = vpop.permute.xlu0 %4001  ;;  %v4235_v25 = vpack.i.bf16 %v5629_v1, %v5371_v16 }
 0x1e2   : > { %7724 = vst [vmem:[#allocation34_spill] sm:$0xff] %v6150_v38  ;;  %7726 = vst [vmem:[#allocation14_spill] sm:$0xff] %v6163_v17  ;;  %v3974_v17 = vunpack.i.h.bf16 %v6134_v22  ;;  %v3949_v38 = vunpack.i.h.bf16 %v6112_v13 }
 0x1e5   : > { %4221 = vrot.lane.b32.xlu1 %v4220_v34, %s4854_s26  ;;  %2218 = vrot.lane.b32.xlu0 %v5750_v27, %s4853_s25  ;;  %v7725_v34 = vld [vmem:[#allocation10_spill] sm:$0xff] }
 0x1e9   : > { %2156 = vrot.lane.b32.xlu1 %v7723_v59, %s4852_s23  ;;  %4216 = vrot.lane.b32.xlu0 %v4215_v2, %s4851_s22  ;;  %v6165_v2 = vpop.permute.xlu1 %4006 }
 0x1ed   : > { %2252 = vrot.lane.b32.xlu1 %v5910_v21, %s4853_s25  ;;  %2124 = vrot.lane.b32.xlu0 %v7725_v34, %s4852_s23  ;;  %v6172_v34 = vpop.permute.xlu0 %4011 }
 0x1ef   : > { %v6174_v27 = vpop.permute.xlu1 %4016 }
 0x1f1   : > { %4231 = vrot.lane.b32.xlu1 %v4230_v44, %s4851_s22  ;;  %2220 = vrot.lane.b32.xlu0 %v5819_v56, %s4853_s25 }
 0x1f3   : > { %v6181_v44 = vpop.permute.xlu0 %4021 }
 0x1f5   : > { %2126 = vrot.lane.b32.xlu1 %v7727_v54, %s4852_s23  ;;  %4226 = vrot.lane.b32.xlu0 %v4225_v55, %s4849_s7  ;;  %v4240_v54 = vpack.i.bf16 %v5910_v21, %v5819_v56  ;;  %v7728_v55 = vld [vmem:[#allocation35_spill] sm:$0xff]  ;;  %v7730_v56 = vld [vmem:[#allocation22_spill] sm:$0xff] }
 0x1f6   : > { %v7731_v21 = vld [vmem:[#allocation38_spill] sm:$0xff] }
 0x1f9   : > { %2222 = vrot.lane.b32.xlu1 %v5791_v48, %s4853_s25  ;;  %4236 = vrot.lane.b32.xlu0 %v4235_v25, %s4854_s26  ;;  %v4245_v25 = vpack.i.bf16 %v5656_v9, %v5378_v30 }
 0x1fb   : > { %v6183_v59 = vpop.permute.xlu1 %4026 }
 0x1fd   : > { %4241 = vrot.lane.b32.xlu1 %v4240_v54, %s4851_s22  ;;  %2158 = vrot.lane.b32.xlu0 %v7728_v55, %s4852_s23  ;;  %v4250_v54 = vpack.i.bf16 %v7731_v21, %v7728_v55 }
 0x1ff   : > { %v6190_v20 = vpop.permute.xlu1 %4036  ;;  %v6192_v32 = vpop.permute.xlu0 %4031 }
 0x200   : > { %7729 = vst [vmem:[#allocation36_spill] sm:$0xff] %v6190_v20 }
 0x201   : > { %2128 = vrot.lane.b32.xlu1 %v7730_v56, %s4852_s23  ;;  %2254 = vrot.lane.b32.xlu0 %v5895_v28, %s4853_s25  ;;  %v3973_v56 = vunpack.i.l.bf16 %v6134_v22  ;;  %v2318_v22 = vsel %vm2312_vm6, %v5351_v37, %v3969_v33  ;;  %v2324_v33 = vsel %vm2312_vm6, %v5395_v4, %v3984_v57  ;;  %v3989_v57 = vunpack.i.h.bf16 %v6141_v10 }
 0x203   : > { %v6214_v61 = vpop.permute.xlu1 %4046  ;;  %v6216_v55 = vpop.permute.xlu0 %4041  ;;  %v2319_v37 = vsel %vm2312_vm6, %v5367_v46, %v3973_v56  ;;  %v2321_v46 = vsel %vm2312_vm6, %v5378_v30, %v3978_v36 }
 0x204   : > { %7732 = vst [vmem:[#allocation10_spill] sm:$0xff] %v6214_v61  ;;  %7733 = vst [vmem:[#allocation9_spill] sm:$0xff] %v6216_v55  ;;  %v4049_v20 = vunpack.i.h.bf16 %v6214_v61  ;;  %v3953_v55 = vunpack.i.l.bf16 %v6096_v43  ;;  %v2320_v61 = vsel %vm2312_vm6, %v5371_v16, %v3974_v17  ;;  %v2322_v17 = vsel %vm2312_vm6, %v5382_v47, %v3979_v49 }
 0x205   : > { %2224 = vrot.lane.b32.xlu1 %v5816_v24, %s4853_s25  ;;  %4246 = vrot.lane.b32.xlu0 %v4245_v25, %s4854_s26 }
 0x206   : > { %v2351_v13 = vsel %vm2345_vm7, %v2318_v22, %v4049_v20  ;;  %v3988_v20 = vunpack.i.l.bf16 %v6141_v10 }
 0x207   : > { %v4057_v29 = vpop.permute.xlu1 %4056  ;;  %v4052_v25 = vpop.permute.xlu0 %4051  ;;  %v6242_v12 = vsel %vm2378_vm8, %v2351_v13, %v3934_v51 }
 0x208   : > { %v4059_v43 = vunpack.i.h.bf16 %v4057_v29  ;;  %v4058_v52 = vunpack.i.l.bf16 %v4057_v29  ;;  %v4054_v0 = vunpack.i.h.bf16 %v4052_v25  ;;  %v4053_v16 = vunpack.i.l.bf16 %v4052_v25 }
 0x209   : > { %4251 = vrot.lane.b32.xlu1 %v4250_v54, %s4849_s7  ;;  %2160 = vrot.lane.b32.xlu0 %v7731_v21, %s4852_s23 }
 0x20a   : > { %v2354_v51 = vsel %vm2345_vm7, %v2321_v46, %v4058_v52  ;;  %v2355_v29 = vsel %vm2345_vm7, %v2322_v17, %v4059_v43  ;;  %v2352_v8 = vsel %vm2345_vm7, %v2319_v37, %v4053_v16  ;;  %v2353_v49 = vsel %vm2345_vm7, %v2320_v61, %v4054_v0 }
 0x20b   : > { %v4067_v56 = vpop.permute.xlu1 %4066  ;;  %v4062_v22 = vpop.permute.xlu0 %4061  ;;  %v6258_v30 = vsel %vm2378_vm8, %v2354_v51, %v3943_v39  ;;  %v6261_v10 = vsel %vm2378_vm8, %v2355_v29, %v3944_v63  ;;  %v6264_v54 = vsel %vm2378_vm8, %v2352_v8, %v3938_v50  ;;  %v6267_v21 = vsel %vm2378_vm8, %v2353_v49, %v3939_v42  ;;  %v7735_v8 = vld [vmem:[#allocation37_spill] sm:$0xff] }
 0x20c   : > { %v4069_v52 = vunpack.i.h.bf16 %v4067_v56  ;;  %v4068_v36 = vunpack.i.l.bf16 %v4067_v56  ;;  %v4064_v13 = vunpack.i.h.bf16 %v4062_v22  ;;  %v4063_v37 = vunpack.i.l.bf16 %v4062_v22 }
 0x20d   : > { %v3994_v0 = vunpack.i.h.bf16 %v6156_v35  ;;  %v3993_v61 = vunpack.i.l.bf16 %v6156_v35  ;;  %v2326_v39 = vsel %vm2312_vm6, %v5409_v19, %v3989_v57  ;;  %v2325_v63 = vsel %vm2312_vm6, %v5413_v40, %v3988_v20  ;;  %2256 = vrot.lane.b32.xlu0 %v5915_v45, %s4853_s25 }
 0x20e   : > { %v7734_v50 = vpack.i.bf16 %v5650_v5, %v5382_v47  ;;  %v2358_v42 = vsel %vm2345_vm7, %v2325_v63, %v4068_v36  ;;  %v2359_v25 = vsel %vm2345_vm7, %v2326_v39, %v4069_v52  ;;  %v2356_v35 = vsel %vm2345_vm7, %v2323_v18, %v4063_v37  ;;  %v7737_v37 = vld [vmem:[#allocation21_spill] sm:$0xff] }
 0x20f   : > { %v2357_v43 = vsel %vm2345_vm7, %v2324_v33, %v4064_v13  ;;  %v6285_v16 = vpop.permute.xlu1 %4076  ;;  %v4072_v17 = vpop.permute.xlu0 %4071  ;;  %v6288_v46 = vsel %vm2378_vm8, %v2356_v35, %v3948_v62  ;;  %v6294_v57 = vsel %vm2378_vm8, %v2358_v42, %v3953_v55  ;;  %v6297_v20 = vsel %vm2378_vm8, %v2359_v25, %v3954_v15 }
 0x210   : > { %4261 = vrot.lane.b32.xlu1 %v7734_v50, %s4854_s26  ;;  %v6291_v47 = vsel %vm2378_vm8, %v2357_v43, %v3949_v38  ;;  %v4074_v51 = vunpack.i.h.bf16 %v4072_v17  ;;  %v4073_v29 = vunpack.i.l.bf16 %v4072_v17  ;;  %v2328_v33 = vsel %vm2312_vm6, %v5451_v26, %v3994_v0 }
 0x211   : > { %v2327_v18 = vsel %vm2312_vm6, %v5462_v6, %v3993_v61  ;;  %v4009_v62 = vunpack.i.h.bf16 %v6165_v2  ;;  %v7736_v38 = vpack.i.bf16 %v5895_v28, %v5791_v48  ;;  %v4014_v49 = vunpack.i.h.bf16 %v6172_v34 }
 0x212   : > { %v6311_v55 = vsel %vm2345_vm7, %v2327_v18, %v4073_v29  ;;  %v6314_v15 = vsel %vm2345_vm7, %v2328_v33, %v4074_v51  ;;  %v4013_v56 = vunpack.i.l.bf16 %v6172_v34  ;;  %v4019_v28 = vunpack.i.h.bf16 %v6174_v27 }
 0x213   : > { %4256 = vrot.lane.b32.xlu0 %v7736_v38, %s4851_s22  ;;  %v6318_v22 = vpop.permute.xlu1 %4086  ;;  %v6320_v52 = vpop.permute.xlu0 %4081  ;;  %v2334_v48 = vsel %vm2312_vm6, %v5585_v14, %v4009_v62  ;;  %v4018_v13 = vunpack.i.l.bf16 %v6174_v27  ;;  %v4270_v0 = vpack.i.bf16 %v5668_v23, %v5391_v11  ;;  %v2336_v61 = vsel %vm2312_vm6, %v5629_v1, %v4014_v49 }
 0x214   : > { %2162 = vrot.lane.b32.xlu1 %v7735_v8, %s4852_s23  ;;  %v4089_v36 = vunpack.i.h.bf16 %v6318_v22  ;;  %v2335_v14 = vsel %vm2312_vm6, %v5617_v7, %v4013_v56  ;;  %v4024_v39 = vunpack.i.h.bf16 %v6181_v44  ;;  %v4023_v27 = vunpack.i.l.bf16 %v6181_v44 }
 0x215   : > { %v2338_v17 = vsel %vm2312_vm6, %v5650_v5, %v4019_v28  ;;  %v2337_v11 = vsel %vm2312_vm6, %v5656_v9, %v4018_v13  ;;  %v4029_v1 = vunpack.i.h.bf16 %v6183_v59  ;;  %v4028_v7 = vunpack.i.l.bf16 %v6183_v59 }
 0x216   : > { %v2367_v34 = vsel %vm2345_vm7, %v2334_v48, %v4089_v36  ;;  %v2340_v9 = vsel %vm2312_vm6, %v5678_v3, %v4024_v39  ;;  %v2339_v59 = vsel %vm2312_vm6, %v5668_v23, %v4023_v27  ;;  %v4265_v62 = vpack.i.bf16 %v5915_v45, %v5816_v24  ;;  %v7738_v23 = vld [vmem:[#allocation40_spill] sm:$0xff] }
 0x217   : > { %2130 = vrot.lane.b32.xlu0 %v7737_v37, %s4852_s23  ;;  %v4097_v63 = vpop.permute.xlu1 %4096  ;;  %v4092_v50 = vpop.permute.xlu0 %4091  ;;  %v2342_v48 = vsel %vm2312_vm6, %v5698_v58, %v4029_v1  ;;  %v2341_v28 = vsel %vm2312_vm6, %v5707_v53, %v4028_v7  ;;  %v4034_v13 = vunpack.i.h.bf16 %v6192_v32  ;;  %v4033_v37 = vunpack.i.l.bf16 %v6192_v32 }
 0x218   : > { %2258 = vrot.lane.b32.xlu1 %v5903_v60, %s4853_s25  ;;  %v4099_v42 = vunpack.i.h.bf16 %v4097_v63  ;;  %v4098_v25 = vunpack.i.l.bf16 %v4097_v63  ;;  %v4094_v35 = vunpack.i.h.bf16 %v4092_v50  ;;  %v4093_v43 = vunpack.i.l.bf16 %v4092_v50  ;;  %v7739_v50 = vld [vmem:[#allocation41_spill] sm:$0xff] }
 0x219   : > { %v2344_v32 = vsel %vm2312_vm6, %v5735_v41, %v4034_v13  ;;  %v4280_v7 = vpack.i.bf16 %v5903_v60, %v5807_v31 }
 0x21a   : > { %v2370_v44 = vsel %vm2345_vm7, %v2337_v11, %v4098_v25  ;;  %v2371_v51 = vsel %vm2345_vm7, %v2338_v17, %v4099_v42  ;;  %v6352_v29 = vsel %vm2345_vm7, %v2335_v14, %v4093_v43  ;;  %v6355_v5 = vsel %vm2345_vm7, %v2336_v61, %v4094_v35  ;;  %v7740_v25 = vld [vmem:[#allocation63_spill] sm:$0xff]  ;;  %v7741_v35 = vld [vmem:[#allocation13_spill] sm:$0xff] }
 0x21b   : > { %2226 = vrot.lane.b32.xlu0 %v5807_v31, %s4853_s25  ;;  %v4107_v33 = vpop.permute.xlu1 %4106  ;;  %v4102_v18 = vpop.permute.xlu0 %4101  ;;  %v2343_v42 = vsel %vm2312_vm6, %v7739_v50, %v4033_v37  ;;  %v4285_v37 = vpack.i.bf16 %v5678_v3, %v5395_v4 }
 0x21c   : > { %4271 = vrot.lane.b32.xlu1 %v4270_v0, %s4854_s26  ;;  %v4109_v38 = vunpack.i.h.bf16 %v4107_v33  ;;  %v4108_v49 = vunpack.i.l.bf16 %v4107_v33  ;;  %v4104_v56 = vunpack.i.h.bf16 %v4102_v18  ;;  %v4103_v36 = vunpack.i.l.bf16 %v4102_v18  ;;  %v7742_v18 = vld [vmem:[#allocation53_spill] sm:$0xff] }
 0x21e   : > { %v2374_v24 = vsel %vm2345_vm7, %v2341_v28, %v4108_v49  ;;  %v2375_v45 = vsel %vm2345_vm7, %v2342_v48, %v4109_v38  ;;  %v2372_v0 = vsel %vm2345_vm7, %v2339_v59, %v4103_v36  ;;  %v2373_v61 = vsel %vm2345_vm7, %v2340_v9, %v4104_v56  ;;  %v7745_v28 = vld [vmem:[#allocation12_spill] sm:$0xff] }
 0x21f   : > { %4266 = vrot.lane.b32.xlu0 %v4265_v62, %s4851_s22  ;;  %v6376_v14 = vpop.permute.xlu1 %4121  ;;  %v4112_v39 = vpop.permute.xlu0 %4111  ;;  %v4275_v56 = vpack.i.bf16 %v7738_v23, %v7735_v8 }
 0x220   : > { %2164 = vrot.lane.b32.xlu1 %v7738_v23, %s4852_s23  ;;  %v4114_v27 = vunpack.i.h.bf16 %v4112_v39  ;;  %v4113_v63 = vunpack.i.l.bf16 %v4112_v39 }
 0x222   : > { %v2376_v43 = vsel %vm2345_vm7, %v2343_v42, %v4113_v63  ;;  %v2377_v17 = vsel %vm2345_vm7, %v2344_v32, %v4114_v27  ;;  %v7746_v63 = vld [vmem:[#allocation50_spill] sm:$0xff] }
 0x223   : > { %2132 = vrot.lane.b32.xlu0 %v7741_v35, %s4852_s23  ;;  %v6388_v11 = vpop.permute.xlu1 %4131  ;;  %v4117_v1 = vpop.permute.xlu0 %4116  ;;  %v4290_v35 = vpack.i.bf16 %v7740_v25, %v7742_v18 }
 0x224   : > { %2260 = vrot.lane.b32.xlu1 %v7740_v25, %s4853_s25  ;;  %v4134_v9 = vunpack.i.h.bf16 %v6388_v11  ;;  %v4119_v59 = vunpack.i.h.bf16 %v4117_v1  ;;  %v4118_v33 = vunpack.i.l.bf16 %v4117_v1  ;;  %v7748_v25 = vld [vmem:[#allocation30_spill] sm:$0xff] }
 0x226   : > { %v6397_v62 = vsel %vm2378_vm8, %v2367_v34, %v4134_v9  ;;  %v6401_v38 = vsel %vm2378_vm8, %v6311_v55, %v4118_v33  ;;  %v6405_v49 = vsel %vm2378_vm8, %v6314_v15, %v4119_v59 }
 0x227   : > { %2228 = vrot.lane.b32.xlu0 %v7742_v18, %s4853_s25  ;;  %7743 = vst [vmem:[#allocation35_spill] sm:$0xff] %v6401_v38  ;;  %7744 = vst [vmem:[#allocation22_spill] sm:$0xff] %v6405_v49  ;;  %v4142_v31 = vpop.permute.xlu1 %4141  ;;  %v6407_v60 = vpop.permute.xlu0 %4126  ;;  %v7749_v18 = vld [vmem:[#allocation60_spill] sm:$0xff] }
 0x228   : > { %4281 = vrot.lane.b32.xlu1 %v4280_v7, %s4851_s22  ;;  %v4144_v36 = vunpack.i.h.bf16 %v4142_v31  ;;  %v4143_v48 = vunpack.i.l.bf16 %v4142_v31 }
 0x22a   : > { %v6415_v55 = vsel %vm2378_vm8, %v2370_v44, %v4143_v48  ;;  %v6418_v34 = vsel %vm2378_vm8, %v2371_v51, %v4144_v36  ;;  %v4295_v36 = vpack.i.bf16 %v5707_v53, %v5413_v40  ;;  %v7752_v48 = vld [vmem:[#allocation52_spill] sm:$0xff] }
 0x22b   : > { %4276 = vrot.lane.b32.xlu0 %v4275_v56, %s4849_s7  ;;  %v4152_v15 = vpop.permute.xlu1 %4151  ;;  %v4137_v13 = vpop.permute.xlu0 %4136  ;;  %v7756_v40 = vld [vmem:[#allocation8_spill] sm:$0xff] }
 0x22c   : > { %2134 = vrot.lane.b32.xlu1 %v7745_v28, %s4852_s23  ;;  %v4154_v39 = vunpack.i.h.bf16 %v4152_v15  ;;  %v4153_v8 = vunpack.i.l.bf16 %v4152_v15  ;;  %v4139_v23 = vunpack.i.h.bf16 %v4137_v13  ;;  %v4138_v27 = vunpack.i.l.bf16 %v4137_v13  ;;  %v7753_v28 = vld [vmem:[#allocation17_spill] sm:$0xff] }
 0x22d   : > { %v3958_v15 = vunpack.i.l.bf16 %v7753_v28 }
 0x22e   : > { %v6426_v44 = vsel %vm2378_vm8, %v2374_v24, %v4153_v8  ;;  %v6429_v51 = vsel %vm2378_vm8, %v2375_v45, %v4154_v39  ;;  %v6433_v32 = vsel %vm2378_vm8, %v6352_v29, %v4138_v27  ;;  %v6437_v4 = vsel %vm2378_vm8, %v6355_v5, %v4139_v23  ;;  %v7747_v45 = vld [vmem:[#allocation39_spill] sm:$0xff]  ;;  %v7755_v39 = vld [vmem:[#allocation36_spill] sm:$0xff]  ;;  %v7757_v23 = vld [vmem:[#allocation34_spill] sm:$0xff] }
 0x22f   : > { %4286 = vrot.lane.b32.xlu0 %v4285_v37, %s4854_s26  ;;  %v6439_v3 = vpop.permute.xlu1 %4161  ;;  %v4147_v42 = vpop.permute.xlu0 %4146  ;;  %v4038_v8 = vunpack.i.l.bf16 %v7755_v39  ;;  %v2313_v53 = vsel %vm2312_vm6, %v7756_v40, %v3958_v15  ;;  %v3998_v27 = vunpack.i.l.bf16 %v7757_v23  ;;  %v7759_v15 = vld [vmem:[#allocation62_spill] sm:$0xff] }
 0x230   : > { %2230 = vrot.lane.b32.xlu1 %v7746_v63, %s4853_s25  ;;  %v4149_v1 = vunpack.i.h.bf16 %v4147_v42  ;;  %v4148_v24 = vunpack.i.l.bf16 %v4147_v42 }
 0x232   : > { %v6447_v29 = vsel %vm2378_vm8, %v2372_v0, %v4148_v24  ;;  %v6450_v7 = vsel %vm2378_vm8, %v2373_v61, %v4149_v1  ;;  %v4310_v1 = vpack.i.bf16 %v5698_v58, %v5409_v19  ;;  %v7758_v24 = vld [vmem:[#allocation11_spill] sm:$0xff]  ;;  %v4305_v58 = vpack.i.bf16 %v7749_v18, %v7746_v63  ;;  %v7761_v63 = vld [vmem:[#allocation42_spill] sm:$0xff] }
 0x233   : > { %2166 = vrot.lane.b32.xlu0 %v7747_v45, %s4852_s23  ;;  %v6452_v5 = vpop.permute.xlu1 %4171  ;;  %v4157_v9 = vpop.permute.xlu0 %4156 }
 0x234   : > { %4291 = vrot.lane.b32.xlu1 %v4290_v35, %s4851_s22  ;;  %v4159_v59 = vunpack.i.h.bf16 %v4157_v9  ;;  %v4158_v33 = vunpack.i.l.bf16 %v4157_v9  ;;  %v2346_v9 = vsel %vm2345_vm7, %v2313_v53, %v4038_v8 }
 0x236   : > { %v6459_v31 = vsel %vm2378_vm8, %v2376_v43, %v4158_v33  ;;  %v6462_v0 = vsel %vm2378_vm8, %v2377_v17, %v4159_v59  ;;  %v7754_v17 = vld [vmem:[#allocation43_spill] sm:$0xff]  ;;  %v4078_v59 = vunpack.i.l.bf16 %v6285_v16  ;;  %v4163_v33 = vunpack.i.l.bf16 %v6439_v3 }
 0x237   : > { %2262 = vrot.lane.b32.xlu0 %v7749_v18, %s4853_s25  ;;  %7750 = vst [vmem:[#allocation38_spill] sm:$0xff] %v6459_v31  ;;  %7751 = vst [vmem:[#allocation37_spill] sm:$0xff] %v6462_v0  ;;  %v6464_v56 = vpop.permute.xlu1 %4181  ;;  %v6466_v61 = vpop.permute.xlu0 %4166  ;;  %v4300_v37 = vpack.i.bf16 %v7754_v17, %v7747_v45  ;;  %v3923_v45 = vunpack.i.l.bf16 %v7758_v24 }
 0x238   : > { %2136 = vrot.lane.b32.xlu1 %v7748_v25, %s4852_s23  ;;  %v4123_v25 = vunpack.i.l.bf16 %v6376_v14 }
 0x239   : > { %v2379_v8 = vsel %vm2378_vm8, %v2346_v9, %v3923_v45 }
 0x23a   : > { %v2412_v0 = vsel %vm2411_vm9, %v2379_v8, %v4163_v33  ;;  %v3959_v8 = vunpack.i.h.bf16 %v7753_v28  ;;  %v4320_v28 = vpack.i.bf16 %v7739_v50, %v5462_v6  ;;  %v7766_v50 = vld [vmem:[#allocation51_spill] sm:$0xff] }
 0x23b   : > { %4296 = vrot.lane.b32.xlu0 %v4295_v36, %s4854_s26  ;;  %v4192_v13 = vpop.permute.xlu1 %4191  ;;  %v6474_v43 = vpop.permute.xlu0 %4176 }
 0x23c   : > { %2232 = vrot.lane.b32.xlu1 %v7752_v48, %s4853_s25  ;;  %v4193_v36 = vunpack.i.l.bf16 %v4192_v13 }
 0x23e   : > { %v2445_v18 = vsel %vm2444_vm12, %v2412_v0, %v4193_v36  ;;  %v4039_v36 = vunpack.i.h.bf16 %v7755_v39 }
 0x23f   : > { %2168 = vrot.lane.b32.xlu0 %v7754_v17, %s4852_s23  ;;  %v2121_v42 = vpop.permute.xlu1 %2120  ;;  %v6485_v35 = vpop.permute.xlu0 %4186  ;;  %v7760_v17 = vld [vmem:[#allocation29_spill] sm:$0xff] }
 0x240   : > { %4301 = vrot.lane.b32.xlu1 %v4300_v37, %s4849_s7  ;;  %v4189_v19 = vunpack.i.h.bf16 %v6485_v35  ;;  %v2329_v37 = vsel %vm2312_vm6, %v7760_v17, %v3998_v27 }
 0x243   : > { %2264 = vrot.lane.b32.xlu0 %v7759_v15, %s4853_s25  ;;  %v2217_v40 = vpop.permute.xlu1 %2216  ;;  %v4197_v53 = vpop.permute.xlu0 %4196 }
 0x244   : > { %4311 = vrot.lane.b32.xlu1 %v4310_v1, %s4854_s26  ;;  %v2362_v1 = vsel %vm2345_vm7, %v2329_v37, %v4078_v59  ;;  %v4198_v49 = vunpack.i.l.bf16 %v4197_v53  ;;  %v2544_v38 = vsel %vm2543_vm10, %v2121_v42, %v2217_v40  ;;  %v4199_v45 = vunpack.i.h.bf16 %v4197_v53 }
 0x245   : > { %v2395_v31 = vsel %vm2378_vm8, %v2362_v1, %v4123_v25  ;;  %3762 = vmatprep.mubr.msk.f32.mxu0 %vm2600_vm11, %v2544_v38  ;;  %v4194_v59 = vunpack.i.h.bf16 %v4192_v13  ;;  %v7762_v38 = vld [vmem:[#allocation61_spill] sm:$0xff]  ;;  %v4124_v40 = vunpack.i.h.bf16 %v6376_v14  ;;  %v7764_v1 = vld [vmem:[#allocation7_spill] sm:$0xff]  ;;  %v4164_v14 = vunpack.i.h.bf16 %v6439_v3 }
 0x246   : > { %v2428_v27 = vsel %vm2411_vm9, %v2395_v31, %v4189_v19  ;;  %v2478_v9 = vsel %vm2477_vm13, %v2445_v18, %v4198_v49  ;;  %v3999_v31 = vunpack.i.h.bf16 %v7757_v23  ;;  %v7763_v49 = vld [vmem:[#allocation26_spill] sm:$0xff]  ;;  %v4079_v19 = vunpack.i.h.bf16 %v6285_v16  ;;  %v7765_v18 = vld [vmem:[#allocation24_spill] sm:$0xff] }
 0x247   : > { %4306 = vrot.lane.b32.xlu0 %v4305_v58, %s4851_s22  ;;  %v6514_v33 = vpop.permute.xlu1 %4201  ;;  %v2153_v37 = vpop.permute.xlu0 %2152  ;;  %v2511_v25 = vsel %vm2510_vm14, %v2478_v9, %v2121_v42  ;;  %v2461_v0 = vsel %vm2444_vm12, %v2428_v27, %v4194_v59  ;;  %v2314_v23 = vsel %vm2312_vm6, %v7764_v1, %v3959_v8 }
 0x248   : > { %2170 = vrot.lane.b32.xlu1 %v7761_v63, %s4852_s23  ;;  %2766 = vmatmul.mubr.f32.vlgmr.msra.gmra.mrb[0].mxu0 %v2511_v25  ;;  %v2494_v13 = vsel %vm2477_vm13, %v2461_v0, %v4199_v45  ;;  %v4203_v39 = vunpack.i.l.bf16 %v6514_v33  ;;  %v2330_v27 = vsel %vm2312_vm6, %v7765_v18, %v3999_v31  ;;  %v2347_v6 = vsel %vm2345_vm7, %v2314_v23, %v4039_v36 }
 0x249   : > { %v2527_v16 = vsel %vm2510_vm14, %v2494_v13, %v2153_v37  ;;  %v3924_v45 = vunpack.i.h.bf16 %v7758_v24  ;;  %v2363_v9 = vsel %vm2345_vm7, %v2330_v27, %v4079_v19  ;;  %v4315_v31 = vpack.i.bf16 %v7759_v15, %v7752_v48  ;;  %v7769_v27 = vld [vmem:[#allocation65_spill] sm:$0xff] }
 0x24a   : > { %v2396_v8 = vsel %vm2378_vm8, %v2363_v9, %v4124_v40 }
 0x24b   : > { %2138 = vrot.lane.b32.xlu0 %v7763_v49, %s4852_s23  ;;  %v4212_v42 = vpop.permute.xlu1 %4211  ;;  %v2249_v58 = vpop.permute.xlu0 %2248  ;;  %v2380_v36 = vsel %vm2378_vm8, %v2347_v6, %v3924_v45  ;;  %v2429_v3 = vsel %vm2411_vm9, %v2396_v8, %v4203_v39  ;;  %v7768_v39 = vld [vmem:[#allocation69_spill] sm:$0xff]  ;;  %v7770_v6 = vld [vmem:[#allocation14_spill] sm:$0xff]  ;;  %v4083_v8 = vunpack.i.l.bf16 %v6320_v52 }
 0x24c   : > { %2266 = vrot.lane.b32.xlu1 %v7762_v38, %s4853_s25  ;;  %v2560_v53 = vsel %vm2543_vm10, %v2153_v37, %v2249_v58  ;;  %v4214_v13 = vunpack.i.h.bf16 %v4212_v42  ;;  %v7767_v58 = vld [vmem:[#allocation45_spill] sm:$0xff]  ;;  %v2413_v24 = vsel %vm2411_vm9, %v2380_v36, %v4164_v14  ;;  %v4213_v15 = vunpack.i.l.bf16 %v4212_v42 }
 0x24d   : > { %3778 = vmatprep.mubr.msk.f32.mxu1 %vm2600_vm11, %v2560_v53  ;;  %v4003_v14 = vunpack.i.l.bf16 %v7770_v6  ;;  %v7771_v45 = vld [vmem:[#allocation9_spill] sm:$0xff] }
 0x24e   : > { %2846 = vmatmul.mubr.f32.vlgmr.msra.gmra.mrb[0].mxu1 %v2527_v16  ;;  %v3963_v16 = vunpack.i.l.bf16 %v7768_v39  ;;  %v4043_v9 = vunpack.i.l.bf16 %v7771_v45 }
 0x24f   : > { %2234 = vrot.lane.b32.xlu0 %v7766_v50, %s4853_s25  ;;  %v2155_v59 = vpop.permute.xlu1 %2154  ;;  %v4207_v25 = vpop.permute.xlu0 %4206 }
 0x250   : > { %4321 = vrot.lane.b32.xlu1 %v4320_v28, %s4854_s26  ;;  %v4209_v37 = vunpack.i.h.bf16 %v4207_v25  ;;  %v4208_v0 = vunpack.i.l.bf16 %v4207_v25  ;;  %v7772_v25 = vld [vmem:[#allocation18_spill] sm:$0xff] }
 0x252   : > { %v2462_v19 = vsel %vm2444_vm12, %v2429_v3, %v4209_v37  ;;  %v2446_v48 = vsel %vm2444_vm12, %v2413_v24, %v4208_v0  ;;  %v4330_v0 = vpack.i.bf16 %v7762_v38, %v7766_v50  ;;  %v7773_v3 = vld [vmem:[#allocation3_spill] sm:$0xff]  ;;  %v4204_v24 = vunpack.i.h.bf16 %v6514_v33 }
 0x253   : > { %4316 = vrot.lane.b32.xlu0 %v4315_v31, %s4851_s22  ;;  %v2251_v28 = vpop.permute.xlu1 %2250  ;;  %v2123_v40 = vpop.permute.xlu0 %2122  ;;  %v2495_v53 = vsel %vm2477_vm13, %v2462_v19, %v4214_v13  ;;  %v2479_v42 = vsel %vm2477_vm13, %v2446_v48, %v4213_v15  ;;  %v4128_v31 = vunpack.i.l.bf16 %v6407_v60  ;;  %v2315_v13 = vsel %vm2312_vm6, %v7773_v3, %v3963_v16  ;;  %v7775_v48 = vld [vmem:[#allocation57_spill] sm:$0xff]  ;;  %v7777_v3 = vld [vmem:[#allocation16_spill] sm:$0xff] }
 0x254   : > { %2172 = vrot.lane.b32.xlu1 %v7767_v58, %s4852_s23  ;;  %v2561_v1 = vsel %vm2543_vm10, %v2155_v59, %v2251_v28  ;;  %v2528_v23 = vsel %vm2510_vm14, %v2495_v53, %v2155_v59  ;;  %v2512_v19 = vsel %vm2510_vm14, %v2479_v42, %v2123_v40  ;;  %v7774_v28 = vld [vmem:[#allocation19_spill] sm:$0xff]  ;;  %v2348_v38 = vsel %vm2345_vm7, %v2315_v13, %v4043_v9  ;;  %v7776_v15 = vld [vmem:[#allocation25_spill] sm:$0xff] }
 0x255   : > { %3779 = vmatprep.mubr.msk.f32.mxu1 %vm2600_vm11, %v2561_v1  ;;  %v2331_v53 = vsel %vm2312_vm6, %v7774_v28, %v4003_v14  ;;  %v4168_v50 = vunpack.i.l.bf16 %v6466_v61  ;;  %v3928_v1 = vunpack.i.l.bf16 %v7776_v15  ;;  %v4325_v14 = vpack.i.bf16 %v7761_v63, %v7763_v49 }
 0x256   : > { %2851 = vmatmul.mubr.f32.gmra.mrb[2].mxu1 %v2528_v23  ;;  %v2364_v33 = vsel %vm2345_vm7, %v2331_v53, %v4083_v8 }
 0x257   : > { %2140 = vrot.lane.b32.xlu0 %v7772_v25, %s4852_s23  ;;  %v4222_v59 = vpop.permute.xlu1 %4221  ;;  %v2219_v37 = vpop.permute.xlu0 %2218  ;;  %v2381_v9 = vsel %vm2378_vm8, %v2348_v38, %v3928_v1 }
 0x258   : > { %2268 = vrot.lane.b32.xlu1 %v7769_v27, %s4853_s25  ;;  %v2545_v36 = vsel %vm2543_vm10, %v2123_v40, %v2219_v37  ;;  %v2397_v37 = vsel %vm2378_vm8, %v2364_v33, %v4128_v31  ;;  %v2414_v13 = vsel %vm2411_vm9, %v2381_v9, %v4168_v50  ;;  %v4223_v49 = vunpack.i.l.bf16 %v4222_v59  ;;  %v7778_v50 = vld [vmem:[#allocation54_spill] sm:$0xff]  ;;  %v7781_v9 = vld [vmem:[#allocation4_spill] sm:$0xff] }
 0x259   : > { %3763 = vmatprep.mubr.msk.f32.mxu0 %vm2600_vm11, %v2545_v36  ;;  %v4224_v36 = vunpack.i.h.bf16 %v4222_v59 }
 0x25a   : > { %2771 = vmatmul.mubr.f32.gmra.mrb[2].mxu0 %v2512_v19 }
 0x25b   : > { %2236 = vrot.lane.b32.xlu0 %v7775_v48, %s4853_s25  ;;  %v2157_v23 = vpop.permute.xlu1 %2156  ;;  %v4217_v16 = vpop.permute.xlu0 %4216 }
 0x25c   : > { %4331 = vrot.lane.b32.xlu1 %v4330_v0, %s4851_s22  ;;  %v4219_v40 = vunpack.i.h.bf16 %v4217_v16  ;;  %v4218_v42 = vunpack.i.l.bf16 %v4217_v16  ;;  %v2430_v0 = vsel %vm2411_vm9, %v2397_v37, %v4204_v24  ;;  %v4335_v24 = vpack.i.bf16 %v5735_v41, %v5451_v26 }
 0x25d   : > { %v3964_v16 = vunpack.i.h.bf16 %v7768_v39  ;;  %v4044_v26 = vunpack.i.h.bf16 %v7771_v45  ;;  %v7780_v39 = vld [vmem:[#allocation46_spill] sm:$0xff]  ;;  %v4004_v45 = vunpack.i.h.bf16 %v7770_v6  ;;  %v7782_v6 = vld [vmem:[#allocation64_spill] sm:$0xff] }
 0x25e   : > { %v2463_v8 = vsel %vm2444_vm12, %v2430_v0, %v4219_v40  ;;  %v2447_v63 = vsel %vm2444_vm12, %v2414_v13, %v4218_v42  ;;  %v4340_v40 = vpack.i.bf16 %v7767_v58, %v7772_v25  ;;  %v7779_v42 = vld [vmem:[#allocation44_spill] sm:$0xff]  ;;  %v4084_v13 = vunpack.i.h.bf16 %v6320_v52 }
 0x25f   : > { %4326 = vrot.lane.b32.xlu0 %v4325_v14, %s4849_s7  ;;  %v2253_v31 = vpop.permute.xlu1 %2252  ;;  %v2125_v19 = vpop.permute.xlu0 %2124  ;;  %v2496_v53 = vsel %vm2477_vm13, %v2463_v8, %v4224_v36  ;;  %v2480_v33 = vsel %vm2477_vm13, %v2447_v63, %v4223_v49  ;;  %v4350_v14 = vpack.i.bf16 %v7780_v39, %v7760_v17  ;;  %v2316_v58 = vsel %vm2312_vm6, %v7781_v9, %v3964_v16  ;;  %v7783_v63 = vld [vmem:[#allocation23_spill] sm:$0xff] }
 0x260   : > { %2142 = vrot.lane.b32.xlu1 %v7777_v3, %s4852_s23  ;;  %v2562_v38 = vsel %vm2543_vm10, %v2157_v23, %v2253_v31  ;;  %v2529_v1 = vsel %vm2510_vm14, %v2496_v53, %v2157_v23  ;;  %v2513_v23 = vsel %vm2510_vm14, %v2480_v33, %v2125_v19  ;;  %v2349_v36 = vsel %vm2345_vm7, %v2316_v58, %v4044_v26 }
 0x261   : > { %3780 = vmatprep.mubr.msk.f32.mxu1 %vm2600_vm11, %v2562_v38  ;;  %v4169_v8 = vunpack.i.h.bf16 %v6466_v61  ;;  %v3929_v31 = vunpack.i.h.bf16 %v7776_v15  ;;  %v2332_v49 = vsel %vm2312_vm6, %v7783_v63, %v4004_v45  ;;  %v4345_v61 = vpack.i.bf16 %v7769_v27, %v7775_v48  ;;  %v7785_v48 = vld [vmem:[#allocation68_spill] sm:$0xff]  ;;  %v7786_v45 = vld [vmem:[#allocation10_spill] sm:$0xff] }
 0x262   : > { %2856 = vmatmul.mubr.f32.gmra.mrb[4].mxu1 %v2529_v1 }
 0x263   : > { %4336 = vrot.lane.b32.xlu0 %v4335_v24, %s4854_s26  ;;  %v4232_v59 = vpop.permute.xlu1 %4231  ;;  %v2221_v37 = vpop.permute.xlu0 %2220  ;;  %v2382_v38 = vsel %vm2378_vm8, %v2349_v36, %v3929_v31  ;;  %v4048_v36 = vunpack.i.l.bf16 %v7786_v45  ;;  %v7788_v31 = vld [vmem:[#allocation33_spill] sm:$0xff] }
 0x264   : > { %2238 = vrot.lane.b32.xlu1 %v7778_v50, %s4853_s25  ;;  %v2546_v41 = vsel %vm2543_vm10, %v2125_v19, %v2221_v37  ;;  %v4129_v19 = vunpack.i.h.bf16 %v6407_v60  ;;  %v4233_v53 = vunpack.i.l.bf16 %v4232_v59  ;;  %v2365_v60 = vsel %vm2345_vm7, %v2332_v49, %v4084_v13  ;;  %v7784_v37 = vld [vmem:[#allocation48_spill] sm:$0xff]  ;;  %v7787_v13 = vld [vmem:[#allocation49_spill] sm:$0xff] }
 0x265   : > { %3764 = vmatprep.mubr.msk.f32.mxu0 %vm2600_vm11, %v2546_v41  ;;  %v2415_v15 = vsel %vm2411_vm9, %v2382_v38, %v4169_v8  ;;  %v4234_v39 = vunpack.i.h.bf16 %v4232_v59 }
 0x266   : > { %2776 = vmatmul.mubr.f32.gmra.mrb[4].mxu0 %v2513_v23  ;;  %v2398_v16 = vsel %vm2378_vm8, %v2365_v60, %v4129_v19  ;;  %v3968_v23 = vunpack.i.l.bf16 %v7785_v48 }
 0x267   : > { %2174 = vrot.lane.b32.xlu0 %v7779_v42, %s4852_s23  ;;  %v2127_v25 = vpop.permute.xlu1 %2126  ;;  %v6623_v0 = vpop.permute.xlu0 %4226 }
 0x268   : > { %4341 = vrot.lane.b32.xlu1 %v4340_v40, %s4849_s7  ;;  %v4228_v17 = vunpack.i.l.bf16 %v6623_v0  ;;  %v2448_v40 = vsel %vm2444_vm12, %v2415_v15, %v4233_v53  ;;  %v7789_v53 = vld [vmem:[#allocation5_spill] sm:$0xff]  ;;  %v4008_v15 = vunpack.i.l.bf16 %v6165_v2  ;;  %v4229_v48 = vunpack.i.h.bf16 %v6623_v0 }
 0x269   : > { %v2317_v59 = vsel %vm2312_vm6, %v7789_v53, %v3968_v23 }
 0x26a   : > { %v2431_v26 = vsel %vm2411_vm9, %v2398_v16, %v4228_v17  ;;  %v2350_v38 = vsel %vm2345_vm7, %v2317_v59, %v4048_v36  ;;  %v4088_v16 = vunpack.i.l.bf16 %v6318_v22  ;;  %v4798_v36 = vld [vmem:[%s4895_s20 + $0x190] sm:$0x3] }
 0x26b   : > { %2270 = vrot.lane.b32.xlu0 %v7782_v6, %s4853_s25  ;;  %v2223_v52 = vpop.permute.xlu1 %2222  ;;  %v4237_v24 = vpop.permute.xlu0 %4236  ;;  %v2464_v8 = vsel %vm2444_vm12, %v2431_v26, %v4234_v39  ;;  %v7792_v39 = vld [vmem:[#allocation31_spill] sm:$0xff] }
 0x26c   : > { %4351 = vrot.lane.b32.xlu1 %v4350_v14, %s4854_s26  ;;  %v2547_v1 = vsel %vm2543_vm10, %v2127_v25, %v2223_v52  ;;  %v4238_v33 = vunpack.i.l.bf16 %v4237_v24  ;;  %v4239_v41 = vunpack.i.h.bf16 %v4237_v24  ;;  %v4173_v52 = vunpack.i.l.bf16 %v6452_v5 }
 0x26d   : > { %3765 = vmatprep.mubr.msk.f32.mxu0 %vm2600_vm11, %v2547_v1 }
 0x26e   : > { %v2481_v27 = vsel %vm2477_vm13, %v2448_v40, %v4238_v33  ;;  %v2497_v19 = vsel %vm2477_vm13, %v2464_v8, %v4239_v41  ;;  %v4355_v41 = vpack.i.bf16 %v7779_v42, %v7777_v3  ;;  %v7794_v3 = vld [vmem:[#allocation66_spill] sm:$0xff] }
 0x26f   : > { %4346 = vrot.lane.b32.xlu0 %v4345_v61, %s4851_s22  ;;  %v4242_v14 = vpop.permute.xlu1 %4241  ;;  %v2159_v9 = vpop.permute.xlu0 %2158  ;;  %v2514_v58 = vsel %vm2510_vm14, %v2481_v27, %v2127_v25  ;;  %v4360_v25 = vpack.i.bf16 %v7782_v6, %v7778_v50  ;;  %v7790_v61 = vld [vmem:[#allocation15_spill] sm:$0xff]  ;;  %v7791_v50 = vld [vmem:[#allocation56_spill] sm:$0xff]  ;;  %v4133_v6 = vunpack.i.l.bf16 %v6388_v11  ;;  %v1304_v42 = vsel %vm1253_vm0, %v4798_v36, %v7794_v3 }
 0x270   : > { %2176 = vrot.lane.b32.xlu1 %v7784_v37, %s4852_s23  ;;  %2781 = vmatmul.mubr.f32.gmra.mrb[6].mxu0 %v2514_v58  ;;  %v3933_v60 = vunpack.i.l.bf16 %v7790_v61  ;;  %v4243_v1 = vunpack.i.l.bf16 %v4242_v14  ;;  %v2530_v33 = vsel %vm2510_vm14, %v2497_v19, %v2159_v9  ;;  %v4244_v58 = vunpack.i.h.bf16 %v4242_v14  ;;  %v7793_v11 = vld [vmem:[#allocation32_spill] sm:$0xff]  ;;  %v7796_v61 = vld [vmem:[#allocation55_spill] sm:$0xff] }
 0x272   : > { %v2383_v40 = vsel %vm2378_vm8, %v2350_v38, %v3933_v60 }
 0x273   : > { %2144 = vrot.lane.b32.xlu0 %v7788_v31, %s4852_s23  ;;  %v2129_v17 = vpop.permute.xlu1 %2128  ;;  %v2255_v49 = vpop.permute.xlu0 %2254  ;;  %v2416_v27 = vsel %vm2411_vm9, %v2383_v40, %v4173_v52 }
 0x274   : > { %2272 = vrot.lane.b32.xlu1 %v7787_v13, %s4853_s25  ;;  %v2563_v24 = vsel %vm2543_vm10, %v2159_v9, %v2255_v49  ;;  %v2333_v9 = vsel %vm2312_vm6, %v7792_v39, %v4008_v15  ;;  %v2449_v45 = vsel %vm2444_vm12, %v2416_v27, %v4243_v1 }
 0x275   : > { %3781 = vmatprep.mubr.msk.f32.mxu1 %vm2600_vm11, %v2563_v24  ;;  %v2366_v0 = vsel %vm2345_vm7, %v2333_v9, %v4088_v16  ;;  %v1524_v24 = vrot.slane %v1304_v42, 1  ;;  %v1529_v16 = vrot.slane %v1304_v42, 2 }
 0x276   : > { %2861 = vmatmul.mubr.f32.gmra.mrb[6].mxu1 %v2530_v33  ;;  %v2399_v14 = vsel %vm2378_vm8, %v2366_v0, %v4133_v6  ;;  %v7797_v6 = vld [vmem:[#allocation67_spill] sm:$0xff] }
 0x277   : > { %2240 = vrot.lane.b32.xlu0 %v7791_v50, %s4853_s25  ;;  %v2225_v26 = vpop.permute.xlu1 %2224  ;;  %v4247_v2 = vpop.permute.xlu0 %4246  ;;  %v2432_v52 = vsel %vm2411_vm9, %v2399_v14, %v4229_v48 }
 0x278   : > { %4361 = vrot.lane.b32.xlu1 %v4360_v25, %s4851_s22  ;;  %v2548_v22 = vsel %vm2543_vm10, %v2129_v17, %v2225_v26  ;;  %v4248_v23 = vunpack.i.l.bf16 %v4247_v2  ;;  %v4249_v8 = vunpack.i.h.bf16 %v4247_v2  ;;  %v7795_v25 = vld [vmem:[#allocation47_spill] sm:$0xff]  ;;  %v2465_v60 = vsel %vm2444_vm12, %v2432_v52, %v4244_v58  ;;  %v4800_v2 = vld [vmem:[%s4895_s20 + $0x1a0] sm:$0xff] }
 0x279   : > { %3766 = vmatprep.mubr.msk.f32.mxu0 %vm2600_vm11, %v2548_v22  ;;  %v4365_v38 = vpack.i.bf16 %v7795_v25, %v7765_v18  ;;  %v4799_v18 = vld [vmem:[%s4895_s20 + $0x198] sm:$0xff] }
 0x27a   : > { %v2482_v19 = vsel %vm2477_vm13, %v2449_v45, %v4248_v23  ;;  %v2498_v15 = vsel %vm2477_vm13, %v2465_v60, %v4249_v8  ;;  %v1305_v40 = vsel %vm1253_vm0, %v4799_v18, %v7797_v6  ;;  %v4174_v23 = vunpack.i.h.bf16 %v6452_v5 }
 0x27b   : > { %4356 = vrot.lane.b32.xlu0 %v4355_v41, %s4849_s7  ;;  %v6694_v53 = vpop.permute.xlu1 %4251  ;;  %v2161_v59 = vpop.permute.xlu0 %2160  ;;  %v2515_v49 = vsel %vm2510_vm14, %v2482_v19, %v2129_v17  ;;  %v4370_v17 = vpack.i.bf16 %v7784_v37, %v7788_v31  ;;  %v7798_v41 = vld [vmem:[#allocation6_spill] sm:$0xff]  ;;  %v7799_v37 = vrot.slane %v7795_v25, 1  ;;  %v4380_v39 = vpack.i.bf16 %v1305_v40, %v7774_v28 }
 0x27c   : > { %2146 = vrot.lane.b32.xlu1 %v7793_v11, %s4852_s23  ;;  %2786 = vmatmul.mubr.f32.gmra.mrb[8].mxu0 %v2515_v49  ;;  %v6714_v27 = vsel %vm1253_vm0, %v4800_v2, %v7798_v41  ;;  %v4253_v48 = vunpack.i.l.bf16 %v6694_v53  ;;  %v2531_v22 = vsel %vm2510_vm14, %v2498_v15, %v2161_v59  ;;  %v7800_v5 = vrot.slane %v7795_v25, 2 }
 0x27d   : > { %v6721_v31 = vsel %vm1356_vm1, %v7799_v37, %v1524_v24  ;;  %v1535_v45 = vrot.slane %v6714_v27, 1  ;;  %v1534_v19 = vrot.slane %v1305_v40, 1  ;;  %v2417_v28 = vsel %vm2411_vm9, %v6242_v12, %v4174_v23 }
 0x27e   : > { %v2433_v42 = vsel %vm2411_vm9, %v6397_v62, %v4253_v48  ;;  %v1530_v8 = vsel %vm1437_vm2, %v7800_v5, %v1529_v16  ;;  %v4375_v62 = vpack.i.bf16 %v7787_v13, %v7791_v50  ;;  %v1539_v13 = vrot.slane %v1305_v40, 2 }
 0x27f   : > { %4366 = vrot.lane.b32.xlu0 %v4365_v38, %s4854_s26  ;;  %v2257_v33 = vpop.permute.xlu0 %2256  ;;  %v1536_v12 = vsel %vm1356_vm1, %v1534_v19, %v1535_v45  ;;  %v4254_v18 = vunpack.i.h.bf16 %v6694_v53  ;;  %v4178_v40 = vunpack.i.l.bf16 %v6474_v43  ;;  %v4390_v2 = vpack.i.bf16 %v1530_v8, %v7796_v61  ;;  %v4801_v19 = vld [vmem:[%s4895_s20 + $0x1a8] sm:$0x3] }
 0x280   : > { %2242 = vrot.lane.b32.xlu1 %v7796_v61, %s4853_s25  ;;  %v2564_v26 = vsel %vm2543_vm10, %v2161_v59, %v2257_v33  ;;  %v1540_v59 = vrot.slane %v6714_v27, 2 }
 0x281   : > { %3782 = vmatprep.mubr.msk.f32.mxu1 %vm2600_vm11, %v2564_v26  ;;  %v7801_v26 = vld [vmem:[#allocation28_spill] sm:$0xff]  ;;  %v2434_v53 = vsel %vm2411_vm9, %v6433_v32, %v4254_v18  ;;  %v4385_v32 = vpack.i.bf16 %v6721_v31, %v7793_v11 }
 0x282   : > { %v4262_v1 = vpop.permute.xlu1 %4261  ;;  %2866 = vmatmul.mubr.f32.gmra.mrb[8].mxu1 %v2531_v22  ;;  %v1541_v16 = vsel %vm1437_vm2, %v1539_v13, %v1540_v59 }
 0x283   : > { %2178 = vrot.lane.b32.xlu0 %v6721_v31, %s4852_s23  ;;  %v4264_v0 = vunpack.i.h.bf16 %v4262_v1  ;;  %v4263_v24 = vunpack.i.l.bf16 %v4262_v1 }
 0x284   : > { %4371 = vrot.lane.b32.xlu1 %v4370_v17, %s4849_s7 }
 0x285   : > { %v4257_v58 = vpop.permute.xlu0 %4256 }
 0x286   : > { %v2163_v9 = vpop.permute.xlu1 %2162  ;;  %v4259_v36 = vunpack.i.h.bf16 %v4257_v58  ;;  %v4258_v3 = vunpack.i.l.bf16 %v4257_v58 }
 0x287   : > { %2274 = vrot.lane.b32.xlu0 %v1530_v8, %s4853_s25  ;;  %v7803_v8 = vld [vmem:[#allocation27_spill] sm:$0xff] }
 0x288   : > { %4381 = vrot.lane.b32.xlu1 %v4380_v39, %s4854_s26  ;;  %v2466_v14 = vsel %vm2444_vm12, %v2433_v42, %v4259_v36  ;;  %v2450_v25 = vsel %vm2444_vm12, %v2417_v28, %v4258_v3  ;;  %v2418_v39 = vsel %vm2411_vm9, %v6264_v54, %v4178_v40  ;;  %v7804_v28 = vld [vmem:[#allocation20_spill] sm:$0xff] }
 0x289   : > { %v2131_v38 = vpop.permute.xlu0 %2130  ;;  %v2499_v52 = vsel %vm2477_vm13, %v2466_v14, %v4264_v0  ;;  %v2483_v50 = vsel %vm2477_vm13, %v2450_v25, %v4263_v24  ;;  %v1307_v14 = vsel %vm1253_vm0, %v4801_v19, %v7804_v28  ;;  %v7805_v25 = vld [vmem:[#allocation58_spill] sm:$0xff] }
 0x28a   : > { %v2259_v49 = vpop.permute.xlu1 %2258  ;;  %v2532_v15 = vsel %vm2510_vm14, %v2499_v52, %v2163_v9  ;;  %v2516_v6 = vsel %vm2510_vm14, %v2483_v50, %v2131_v38  ;;  %v1537_v52 = vrot.slane %v1307_v14, 1  ;;  %v1542_v13 = vrot.slane %v1307_v14, 2 }
 0x28b   : > { %v2565_v60 = vsel %vm2543_vm10, %v2163_v9, %v2259_v49  ;;  %4376 = vrot.lane.b32.xlu0 %v4375_v62, %s4851_s22  ;;  %v7802_v9 = vld [vmem:[#allocation59_spill] sm:$0xff]  ;;  %v4395_v49 = vpack.i.bf16 %v6714_v27, %v7783_v63  ;;  %v4179_v63 = vunpack.i.h.bf16 %v6474_v43 }
 0x28c   : > { %2180 = vrot.lane.b32.xlu1 %v1536_v12, %s4852_s23  ;;  %3783 = vmatprep.mubr.msk.f32.mxu1 %vm2600_vm11, %v2565_v60  ;;  %v3214_v60 = vld [vmem:[%s6794_s30] sm:$0xff] }
 0x28d   : > { %2871 = vmatmul.mubr.f32.gmra.mrb[10].mxu1 %v2532_v15  ;;  %v2227_v1 = vpop.permute.xlu0 %2226 }
 0x28e   : > { %v4272_v17 = vpop.permute.xlu1 %4271  ;;  %v2549_v33 = vsel %vm2543_vm10, %v2131_v38, %v2227_v1 }
 0x28f   : > { %3767 = vmatprep.mubr.msk.f32.mxu0 %vm2600_vm11, %v2549_v33  ;;  %2148 = vrot.lane.b32.xlu0 %v7801_v26, %s4852_s23  ;;  %v4274_v23 = vunpack.i.h.bf16 %v4272_v17  ;;  %v4273_v0 = vunpack.i.l.bf16 %v4272_v17  ;;  %v1538_v17 = vsel %vm1356_vm1, %v1535_v45, %v1537_v52  ;;  %v3216_v33 = vld [vmem:[%s6794_s30 + $0x10] sm:$0xff]  ;;  %v1543_v45 = vsel %vm1437_vm2, %v1540_v59, %v1542_v13  ;;  %v3226_v13 = vld [vmem:[%s6794_s30 + $0x60] sm:$0xff] }
 0x290   : > { %2276 = vrot.lane.b32.xlu1 %v1541_v16, %s4853_s25  ;;  %2791 = vmatmul.mubr.f32.gmra.mrb[10].mxu0 %v2516_v6  ;;  %v2419_v6 = vsel %vm2411_vm9, %v6267_v21, %v4179_v63 }
 0x291   : > { %v4267_v48 = vpop.permute.xlu0 %4266 }
 0x292   : > { %v2165_v41 = vpop.permute.xlu1 %2164  ;;  %v4269_v37 = vunpack.i.h.bf16 %v4267_v48  ;;  %v4268_v22 = vunpack.i.l.bf16 %v4267_v48  ;;  %v3218_v48 = vld [vmem:[%s6794_s30 + $0x20] sm:$0xff] }
 0x293   : > { %2244 = vrot.lane.b32.xlu0 %v7802_v9, %s4853_s25 }
 0x294   : > { %4391 = vrot.lane.b32.xlu1 %v4390_v2, %s4851_s22  ;;  %v2467_v61 = vsel %vm2444_vm12, %v2434_v53, %v4269_v37  ;;  %v2451_v42 = vsel %vm2444_vm12, %v2418_v39, %v4268_v22  ;;  %v3215_v53 = vld [vmem:[%s6794_s30 + $0x8] sm:$0xff]  ;;  %v3220_v39 = vld [vmem:[%s6794_s30 + $0x30] sm:$0xff] }
 0x295   : > { %v2133_v36 = vpop.permute.xlu0 %2132  ;;  %v2500_v3 = vsel %vm2477_vm13, %v2467_v61, %v4274_v23  ;;  %v2484_v11 = vsel %vm2477_vm13, %v2451_v42, %v4273_v0  ;;  %v3222_v0 = vld [vmem:[%s6794_s30 + $0x40] sm:$0xff] }
 0x296   : > { %v2261_v58 = vpop.permute.xlu1 %2260  ;;  %v2533_v54 = vsel %vm2510_vm14, %v2500_v3, %v2165_v41  ;;  %v2517_v24 = vsel %vm2510_vm14, %v2484_v11, %v2133_v36 }
 0x297   : > { %v2566_v5 = vsel %vm2543_vm10, %v2165_v41, %v2261_v58  ;;  %4386 = vrot.lane.b32.xlu0 %v4385_v32, %s4849_s7  ;;  %v3217_v58 = vld [vmem:[%s6794_s30 + $0x18] sm:$0xff] }
 0x298   : > { %2150 = vrot.lane.b32.xlu1 %v7803_v8, %s4852_s23  ;;  %3784 = vmatprep.mubr.msk.f32.mxu1 %vm2600_vm11, %v2566_v5  ;;  %v3219_v8 = vld [vmem:[%s6794_s30 + $0x28] sm:$0xff] }
 0x299   : > { %2876 = vmatmul.mubr.f32.gmra.mrb[12].mxu1 %v2533_v54  ;;  %v2229_v62 = vpop.permute.xlu0 %2228 }
 0x29a   : > { %v4282_v31 = vpop.permute.xlu1 %4281  ;;  %v2550_v38 = vsel %vm2543_vm10, %v2133_v36, %v2229_v62  ;;  %v4183_v36 = vunpack.i.l.bf16 %v6464_v56 }
 0x29b   : > { %3768 = vmatprep.mubr.msk.f32.mxu0 %vm2600_vm11, %v2550_v38  ;;  %4396 = vrot.lane.b32.xlu0 %v4395_v49, %s4854_s26  ;;  %v4283_v50 = vunpack.i.l.bf16 %v4282_v31  ;;  %v4284_v37 = vunpack.i.h.bf16 %v4282_v31 }
 0x29c   : > { %2246 = vrot.lane.b32.xlu1 %v7805_v25, %s4853_s25  ;;  %2796 = vmatmul.mubr.f32.gmra.mrb[12].mxu0 %v2517_v24  ;;  %v2420_v19 = vsel %vm2411_vm9, %v6258_v30, %v4183_v36  ;;  %v3224_v30 = vld [vmem:[%s6794_s30 + $0x50] sm:$0xff] }
 0x29d   : > { %v6805_v15 = vpop.permute.xlu0 %4276  ;;  %v2452_v26 = vsel %vm2444_vm12, %v2419_v6, %v4283_v50  ;;  %v4184_v6 = vunpack.i.h.bf16 %v6464_v56 }
 0x29e   : > { %v2135_v12 = vpop.permute.xlu1 %2134  ;;  %v4278_v1 = vunpack.i.l.bf16 %v6805_v15  ;;  %v4279_v28 = vunpack.i.h.bf16 %v6805_v15 }
 0x29f   : > { %2182 = vrot.lane.b32.xlu0 %v1538_v17, %s4852_s23 }
 0x2a0   : > { %3278 = vrot.lane.b32.xlu1 %v3214_v60, %s4853_s25  ;;  %v2435_v2 = vsel %vm2411_vm9, %v6437_v4, %v4278_v1  ;;  %v3221_v60 = vld [vmem:[%s6794_s30 + $0x38] sm:$0xff]  ;;  %v3223_v1 = vld [vmem:[%s6794_s30 + $0x48] sm:$0xff] }
 0x2a1   : > { %v4287_v18 = vpop.permute.xlu0 %4286  ;;  %v2468_v23 = vsel %vm2444_vm12, %v2435_v2, %v4284_v37  ;;  %v2421_v37 = vsel %vm2411_vm9, %v6261_v10, %v4184_v6  ;;  %v3232_v10 = vld [vmem:[%s6794_s30 + $0x90] sm:$0xff] }
 0x2a2   : > { %v2231_v16 = vpop.permute.xlu1 %2230  ;;  %v4288_v40 = vunpack.i.l.bf16 %v4287_v18  ;;  %v4289_v41 = vunpack.i.h.bf16 %v4287_v18  ;;  %v3228_v18 = vld [vmem:[%s6794_s30 + $0x70] sm:$0xff] }
 0x2a3   : > { %v2551_v43 = vsel %vm2543_vm10, %v2135_v12, %v2231_v16  ;;  %2278 = vrot.lane.b32.xlu0 %v1543_v45, %s4853_s25 }
 0x2a4   : > { %3769 = vmatprep.mubr.msk.f32.mxu0 %vm2600_vm11, %v2551_v43  ;;  %3282 = vrot.lane.b32.xlu1 %v3216_v33, %s4853_s25  ;;  %v2485_v21 = vsel %vm2477_vm13, %v2452_v26, %v4288_v40  ;;  %v2501_v4 = vsel %vm2477_vm13, %v2468_v23, %v4289_v41  ;;  %v3225_v40 = vld [vmem:[%s6794_s30 + $0x58] sm:$0xff] }
 0x2a5   : > { %v2167_v27 = vpop.permute.xlu0 %2166  ;;  %v2518_v59 = vsel %vm2510_vm14, %v2485_v21, %v2135_v12  ;;  %v2436_v12 = vsel %vm2411_vm9, %v6415_v55, %v4279_v28 }
 0x2a6   : > { %v4292_v22 = vpop.permute.xlu1 %4291  ;;  %2801 = vmatmul.mubr.f32.gmra.mrb[14].mxu0 %v2518_v59  ;;  %v2534_v32 = vsel %vm2510_vm14, %v2501_v4, %v2167_v27 }
 0x2a7   : > { %3280 = vrot.lane.b32.xlu0 %v3215_v53, %s4853_s25  ;;  %v4293_v42 = vunpack.i.l.bf16 %v4292_v22  ;;  %v4294_v31 = vunpack.i.h.bf16 %v4292_v22 }
 0x2a8   : > { %3286 = vrot.lane.b32.xlu1 %v3218_v48, %s4853_s25  ;;  %v3230_v48 = vld [vmem:[%s6794_s30 + $0x80] sm:$0xff] }
 0x2a9   : > { %v2263_v61 = vpop.permute.xlu0 %2262  ;;  %v2453_v62 = vsel %vm2444_vm12, %v2420_v19, %v4293_v42  ;;  %v2469_v15 = vsel %vm2444_vm12, %v2436_v12, %v4294_v31 }
 0x2aa   : > { %v2137_v9 = vpop.permute.xlu1 %2136  ;;  %v2567_v3 = vsel %vm2543_vm10, %v2167_v27, %v2263_v61  ;;  %v3227_v27 = vld [vmem:[%s6794_s30 + $0x68] sm:$0xff] }
 0x2ab   : > { %3785 = vmatprep.mubr.msk.f32.mxu1 %vm2600_vm11, %v2567_v3  ;;  %3284 = vrot.lane.b32.xlu0 %v3217_v58, %s4853_s25  ;;  %v3229_v58 = vld [vmem:[%s6794_s30 + $0x78] sm:$0xff] }
 0x2ac   : > { %3290 = vrot.lane.b32.xlu1 %v3220_v39, %s4853_s25  ;;  %2881 = vmatmul.mubr.f32.gmra.mrb[14].mxu1 %v2534_v32 }
 0x2ad   : > { %v4297_v54 = vpop.permute.xlu0 %4296 }
 0x2ae   : > { %v2233_v5 = vpop.permute.xlu1 %2232  ;;  %v4298_v11 = vunpack.i.l.bf16 %v4297_v54  ;;  %v4299_v49 = vunpack.i.h.bf16 %v4297_v54 }
 0x2af   : > { %v2552_v14 = vsel %vm2543_vm10, %v2137_v9, %v2233_v5  ;;  %3288 = vrot.lane.b32.xlu0 %v3219_v8, %s4853_s25  ;;  %v4188_v5 = vunpack.i.l.bf16 %v6485_v35  ;;  %v3231_v8 = vld [vmem:[%s6794_s30 + $0x88] sm:$0xff] }
 0x2b0   : > { %3770 = vmatprep.mubr.msk.f32.mxu0 %vm2600_vm11, %v2552_v14  ;;  %3294 = vrot.lane.b32.xlu1 %v3222_v0, %s4853_s25  ;;  %v2486_v38 = vsel %vm2477_vm13, %v2453_v62, %v4298_v11  ;;  %v2502_v63 = vsel %vm2477_vm13, %v2469_v15, %v4299_v49  ;;  %v3234_v0 = vld [vmem:[%s6794_s30 + $0xa0] sm:$0xff]  ;;  %v3236_v62 = vld [vmem:[%s6794_s30 + $0xb0] sm:$0xff] }
 0x2b1   : > { %v2169_v25 = vpop.permute.xlu0 %2168  ;;  %v2519_v24 = vsel %vm2510_vm14, %v2486_v38, %v2137_v9  ;;  %v2422_v49 = vsel %vm2411_vm9, %v6288_v46, %v4188_v5  ;;  %v3238_v46 = vld [vmem:[%s6794_s30 + $0xc0] sm:$0xff]  ;;  %v3245_v5 = vld [vmem:[%s6794_s30 + $0xf8] sm:$0xff] }
 0x2b2   : > { %v6855_v52 = vpop.permute.xlu1 %4301  ;;  %2806 = vmatmul.mubr.f32.gmra.mrb[16].mxu0 %v2519_v24  ;;  %v2535_v55 = vsel %vm2510_vm14, %v2502_v63, %v2169_v25 }
 0x2b3   : > { %3292 = vrot.lane.b32.xlu0 %v3221_v60, %s4853_s25  ;;  %v4303_v16 = vunpack.i.l.bf16 %v6855_v52  ;;  %v4304_v42 = vunpack.i.h.bf16 %v6855_v52 }
 0x2b4   : > { %3298 = vrot.lane.b32.xlu1 %v3224_v30, %s4853_s25  ;;  %v3233_v30 = vld [vmem:[%s6794_s30 + $0x98] sm:$0xff] }
 0x2b5   : > { %v2265_v17 = vpop.permute.xlu0 %2264  ;;  %v2437_v41 = vsel %vm2411_vm9, %v6418_v34, %v4303_v16  ;;  %v2438_v11 = vsel %vm2411_vm9, %v6447_v29, %v4304_v42  ;;  %v3237_v16 = vld [vmem:[%s6794_s30 + $0xb8] sm:$0xff] }
 0x2b6   : > { %v4312_v50 = vpop.permute.xlu1 %4311  ;;  %v2568_v33 = vsel %vm2543_vm10, %v2169_v25, %v2265_v17 }
 0x2b7   : > { %3786 = vmatprep.mubr.msk.f32.mxu1 %vm2600_vm11, %v2568_v33  ;;  %3296 = vrot.lane.b32.xlu0 %v3223_v1, %s4853_s25  ;;  %v4314_v21 = vunpack.i.h.bf16 %v4312_v50  ;;  %v4313_v4 = vunpack.i.l.bf16 %v4312_v50  ;;  %v3240_v33 = vld [vmem:[%s6794_s30 + $0xd0] sm:$0xff] }
 0x2b8   : > { %3302 = vrot.lane.b32.xlu1 %v3226_v13, %s4853_s25  ;;  %2886 = vmatmul.mubr.f32.gmra.mrb[16].mxu1 %v2535_v55  ;;  %v3235_v13 = vld [vmem:[%s6794_s30 + $0xa8] sm:$0xff] }
 0x2b9   : > { %v4307_v45 = vpop.permute.xlu0 %4306 }
 0x2ba   : > { %v2171_v43 = vpop.permute.xlu1 %2170  ;;  %v4309_v26 = vunpack.i.h.bf16 %v4307_v45  ;;  %v4308_v2 = vunpack.i.l.bf16 %v4307_v45 }
 0x2bb   : > { %3300 = vrot.lane.b32.xlu0 %v3225_v40, %s4853_s25 }
 0x2bc   : > { %3306 = vrot.lane.b32.xlu1 %v3228_v18, %s4853_s25  ;;  %v2470_v56 = vsel %vm2444_vm12, %v2437_v41, %v4309_v26  ;;  %v2454_v34 = vsel %vm2444_vm12, %v2421_v37, %v4308_v2  ;;  %v3239_v2 = vld [vmem:[%s6794_s30 + $0xc8] sm:$0xff] }
 0x2bd   : > { %v2139_v53 = vpop.permute.xlu0 %2138  ;;  %v2503_v23 = vsel %vm2477_vm13, %v2470_v56, %v4314_v21  ;;  %v2487_v61 = vsel %vm2477_vm13, %v2454_v34, %v4313_v4  ;;  %v3244_v56 = vld [vmem:[%s6794_s30 + $0xf0] sm:$0xff] }
 0x2be   : > { %v2267_v22 = vpop.permute.xlu1 %2266  ;;  %v2536_v39 = vsel %vm2510_vm14, %v2503_v23, %v2171_v43  ;;  %v2520_v32 = vsel %vm2510_vm14, %v2487_v61, %v2139_v53  ;;  %v3241_v23 = vld [vmem:[%s6794_s30 + $0xd8] sm:$0xff]  ;;  %v3243_v61 = vld [vmem:[%s6794_s30 + $0xe8] sm:$0xff] }
 0x2bf   : > { %v2569_v59 = vsel %vm2543_vm10, %v2171_v43, %v2267_v22  ;;  %3304 = vrot.lane.b32.xlu0 %v3227_v27, %s4853_s25  ;;  %v3242_v43 = vld [vmem:[%s6794_s30 + $0xe0] sm:$0xff] }
 0x2c0   : > { %3787 = vmatprep.mubr.msk.f32.mxu1 %vm2600_vm11, %v2569_v59  ;;  %3310 = vrot.lane.b32.xlu1 %v3230_v48, %s4853_s25 }
 0x2c1   : > { %2891 = vmatmul.mubr.f32.gmra.mrb[18].mxu1 %v2536_v39  ;;  %v2235_v36 = vpop.permute.xlu0 %2234 }
 0x2c2   : > { %v4322_v9 = vpop.permute.xlu1 %4321  ;;  %v2553_v3 = vsel %vm2543_vm10, %v2139_v53, %v2235_v36 }
 0x2c3   : > { %3771 = vmatprep.mubr.msk.f32.mxu0 %vm2600_vm11, %v2553_v3  ;;  %3308 = vrot.lane.b32.xlu0 %v3229_v58, %s4853_s25  ;;  %v4324_v31 = vunpack.i.h.bf16 %v4322_v9  ;;  %v4323_v60 = vunpack.i.l.bf16 %v4322_v9 }
 0x2c4   : > { %3314 = vrot.lane.b32.xlu1 %v3232_v10, %s4853_s25  ;;  %2811 = vmatmul.mubr.f32.gmra.mrb[18].mxu0 %v2520_v32 }
 0x2c5   : > { %v4317_v19 = vpop.permute.xlu0 %4316 }
 0x2c6   : > { %v2173_v54 = vpop.permute.xlu1 %2172  ;;  %v4319_v28 = vunpack.i.h.bf16 %v4317_v19  ;;  %v4318_v14 = vunpack.i.l.bf16 %v4317_v19 }
 0x2c7   : > { %3312 = vrot.lane.b32.xlu0 %v3231_v8, %s4853_s25 }
 0x2c8   : > { %3318 = vrot.lane.b32.xlu1 %v3234_v0, %s4853_s25  ;;  %v2471_v38 = vsel %vm2444_vm12, %v2438_v11, %v4319_v28  ;;  %v2455_v29 = vsel %vm2444_vm12, %v2422_v49, %v4318_v14 }
 0x2c9   : > { %v2141_v25 = vpop.permute.xlu0 %2140  ;;  %v2504_v24 = vsel %vm2477_vm13, %v2471_v38, %v4324_v31  ;;  %v2488_v63 = vsel %vm2477_vm13, %v2455_v29, %v4323_v60 }
 0x2ca   : > { %v2269_v35 = vpop.permute.xlu1 %2268  ;;  %v2537_v12 = vsel %vm2510_vm14, %v2504_v24, %v2173_v54  ;;  %v2521_v1 = vsel %vm2510_vm14, %v2488_v63, %v2141_v25 }
 0x2cb   : > { %v2570_v52 = vsel %vm2543_vm10, %v2173_v54, %v2269_v35  ;;  %3316 = vrot.lane.b32.xlu0 %v3233_v30, %s4853_s25 }
 0x2cc   : > { %3788 = vmatprep.mubr.msk.f32.mxu1 %vm2600_vm11, %v2570_v52  ;;  %3322 = vrot.lane.b32.xlu1 %v3236_v62, %s4853_s25 }
 0x2cd   : > { %2896 = vmatmul.mubr.f32.gmra.mrb[20].mxu1 %v2537_v12  ;;  %v2237_v50 = vpop.permute.xlu0 %2236 }
 0x2ce   : > { %v4332_v15 = vpop.permute.xlu1 %4331  ;;  %v2554_v17 = vsel %vm2543_vm10, %v2141_v25, %v2237_v50 }
 0x2cf   : > { %3772 = vmatprep.mubr.msk.f32.mxu0 %vm2600_vm11, %v2554_v17  ;;  %3320 = vrot.lane.b32.xlu0 %v3235_v13, %s4853_s25  ;;  %v4333_v41 = vunpack.i.l.bf16 %v4332_v15  ;;  %v4334_v34 = vunpack.i.h.bf16 %v4332_v15 }
 0x2d0   : > { %3326 = vrot.lane.b32.xlu1 %v3238_v46, %s4853_s25  ;;  %2816 = vmatmul.mubr.f32.gmra.mrb[20].mxu0 %v2521_v1 }
 0x2d1   : > { %v4327_v18 = vpop.permute.xlu0 %4326 }
 0x2d2   : > { %v2143_v55 = vpop.permute.xlu1 %2142  ;;  %v4328_v6 = vunpack.i.l.bf16 %v4327_v18  ;;  %v4329_v40 = vunpack.i.h.bf16 %v4327_v18 }
 0x2d3   : > { %3324 = vrot.lane.b32.xlu0 %v3237_v16, %s4853_s25 }
 0x2d4   : > { %3330 = vrot.lane.b32.xlu1 %v3240_v33, %s4853_s25  ;;  %v2423_v45 = vsel %vm2411_vm9, %v6291_v47, %v4328_v6  ;;  %v2439_v47 = vsel %vm2411_vm9, %v6450_v7, %v4329_v40 }
 0x2d5   : > { %v4337_v48 = vpop.permute.xlu0 %4336  ;;  %v2456_v22 = vsel %vm2444_vm12, %v2423_v45, %v4333_v41  ;;  %v2472_v10 = vsel %vm2444_vm12, %v2439_v47, %v4334_v34 }
 0x2d6   : > { %v2239_v26 = vpop.permute.xlu1 %2238  ;;  %v4338_v37 = vunpack.i.l.bf16 %v4337_v48  ;;  %v4339_v27 = vunpack.i.h.bf16 %v4337_v48 }
 0x2d7   : > { %v2555_v21 = vsel %vm2543_vm10, %v2143_v55, %v2239_v26  ;;  %3328 = vrot.lane.b32.xlu0 %v3239_v2, %s4853_s25 }
 0x2d8   : > { %3773 = vmatprep.mubr.msk.f32.mxu0 %vm2600_vm11, %v2555_v21  ;;  %3334 = vrot.lane.b32.xlu1 %v3242_v43, %s4853_s25  ;;  %v2489_v53 = vsel %vm2477_vm13, %v2456_v22, %v4338_v37  ;;  %v2505_v7 = vsel %vm2477_vm13, %v2472_v10, %v4339_v27 }
 0x2d9   : > { %v2175_v4 = vpop.permute.xlu0 %2174  ;;  %v2522_v39 = vsel %vm2510_vm14, %v2489_v53, %v2143_v55 }
 0x2da   : > { %v4342_v59 = vpop.permute.xlu1 %4341  ;;  %2821 = vmatmul.mubr.f32.gmra.mrb[22].mxu0 %v2522_v39  ;;  %v2538_v42 = vsel %vm2510_vm14, %v2505_v7, %v2175_v4  ;;  %v7807_v39 = vld [vmem:[#allocation35_spill] sm:$0xff] }
 0x2db   : > { %3332 = vrot.lane.b32.xlu0 %v3241_v23, %s4853_s25  ;;  %v4344_v3 = vunpack.i.h.bf16 %v4342_v59  ;;  %v4343_v32 = vunpack.i.l.bf16 %v4342_v59  ;;  %v7806_v23 = vld [vmem:[#allocation38_spill] sm:$0xff] }
 0x2dc   : > { %3338 = vrot.lane.b32.xlu1 %v3244_v56, %s4853_s25 }
 0x2dd   : > { %v2271_v58 = vpop.permute.xlu0 %2270  ;;  %v2440_v28 = vsel %vm2411_vm9, %v6426_v44, %v4344_v3  ;;  %v2424_v11 = vsel %vm2411_vm9, %v6294_v57, %v4343_v32 }
 0x2de   : > { %v4352_v9 = vpop.permute.xlu1 %4351  ;;  %v2571_v36 = vsel %vm2543_vm10, %v2175_v4, %v2271_v58 }
 0x2df   : > { %3789 = vmatprep.mubr.msk.f32.mxu1 %vm2600_vm11, %v2571_v36  ;;  %3336 = vrot.lane.b32.xlu0 %v3243_v61, %s4853_s25  ;;  %v4354_v14 = vunpack.i.h.bf16 %v4352_v9  ;;  %v4353_v52 = vunpack.i.l.bf16 %v4352_v9 }
 0x2e0   : > { %2901 = vmatmul.mubr.f32.gmra.mrb[22].mxu1 %v2538_v42 }
 0x2e1   : > { %v4347_v54 = vpop.permute.xlu0 %4346 }
 0x2e2   : > { %v2177_v0 = vpop.permute.xlu1 %2176  ;;  %v4349_v8 = vunpack.i.h.bf16 %v4347_v54  ;;  %v4348_v19 = vunpack.i.l.bf16 %v4347_v54 }
 0x2e3   : > { %3340 = vrot.lane.b32.xlu0 %v3245_v5, %s4853_s25 }
 0x2e4   : > { %v2473_v62 = vsel %vm2444_vm12, %v2440_v28, %v4349_v8  ;;  %v2457_v30 = vsel %vm2444_vm12, %v2424_v11, %v4348_v19 }
 0x2e5   : > { %v2145_v35 = vpop.permute.xlu0 %2144  ;;  %v2506_v38 = vsel %vm2477_vm13, %v2473_v62, %v4354_v14  ;;  %v2490_v24 = vsel %vm2477_vm13, %v2457_v30, %v4353_v52  ;;  %v7808_v62 = vld [vmem:[#allocation22_spill] sm:$0xff] }
 0x2e6   : > { %v2273_v31 = vpop.permute.xlu1 %2272  ;;  %v2539_v44 = vsel %vm2510_vm14, %v2506_v38, %v2177_v0  ;;  %v2523_v60 = vsel %vm2510_vm14, %v2490_v24, %v2145_v35  ;;  %v7809_v24 = vld [vmem:[#allocation37_spill] sm:$0xff] }
 0x2e7   : > { %v2572_v49 = vsel %vm2543_vm10, %v2177_v0, %v2273_v31 }
 0x2e8   : > { %3790 = vmatprep.mubr.msk.f32.mxu1 %vm2600_vm11, %v2572_v49 }
 0x2e9   : > { %2906 = vmatmul.mubr.f32.gmra.mrb[24].mxu1 %v2539_v44  ;;  %v2241_v57 = vpop.permute.xlu0 %2240 }
 0x2ea   : > { %v4362_v25 = vpop.permute.xlu1 %4361  ;;  %v2556_v29 = vsel %vm2543_vm10, %v2145_v35, %v2241_v57 }
 0x2eb   : > { %3774 = vmatprep.mubr.msk.f32.mxu0 %vm2600_vm11, %v2556_v29  ;;  %v4363_v17 = vunpack.i.l.bf16 %v4362_v25  ;;  %v4364_v45 = vunpack.i.h.bf16 %v4362_v25 }
 0x2ec   : > { %2826 = vmatmul.mubr.f32.gmra.mrb[24].mxu0 %v2523_v60 }
 0x2ed   : > { %v4357_v46 = vpop.permute.xlu0 %4356 }
 0x2ee   : > { %v2147_v12 = vpop.permute.xlu1 %2146  ;;  %v4358_v15 = vunpack.i.l.bf16 %v4357_v46  ;;  %v4359_v63 = vunpack.i.h.bf16 %v4357_v46 }
 0x2f0   : > { %v2425_v13 = vsel %vm2411_vm9, %v6297_v20, %v4358_v15  ;;  %v2441_v18 = vsel %vm2411_vm9, %v6429_v51, %v4359_v63 }
 0x2f1   : > { %v4367_v33 = vpop.permute.xlu0 %4366  ;;  %v2458_v16 = vsel %vm2444_vm12, %v2425_v13, %v4363_v17  ;;  %v2474_v2 = vsel %vm2444_vm12, %v2441_v18, %v4364_v45 }
 0x2f2   : > { %v2243_v50 = vpop.permute.xlu1 %2242  ;;  %v4368_v55 = vunpack.i.l.bf16 %v4367_v33  ;;  %v4369_v6 = vunpack.i.h.bf16 %v4367_v33  ;;  %v7810_v33 = vld [vmem:[#allocation2_spill] sm:$0xff] }
 0x2f3   : > { %v2557_v1 = vsel %vm2543_vm10, %v2147_v12, %v2243_v50 }
 0x2f4   : > { %3775 = vmatprep.mubr.msk.f32.mxu0 %vm2600_vm11, %v2557_v1  ;;  %v2491_v40 = vsel %vm2477_vm13, %v2458_v16, %v4368_v55  ;;  %v2507_v21 = vsel %vm2477_vm13, %v2474_v2, %v4369_v6  ;;  %v2598_v55 = vsub.s32 0, %v7810_v33  ;;  %v4802_v6 = vld [vmem:[%s7517_s3] sm:$0x7] }
 0x2f5   : > { %v2179_v26 = vpop.permute.xlu0 %2178  ;;  %v2524_v20 = vsel %vm2510_vm14, %v2491_v40, %v2147_v12 }
 0x2f6   : > { %v4372_v43 = vpop.permute.xlu1 %4371  ;;  %2831 = vmatmul.mubr.f32.gmra.mrb[26].mxu0 %v2524_v20  ;;  %v2540_v51 = vsel %vm2510_vm14, %v2507_v21, %v2179_v26 }
 0x2f7   : > { %v4374_v22 = vunpack.i.h.bf16 %v4372_v43  ;;  %v4373_v56 = vunpack.i.l.bf16 %v4372_v43  ;;  %v7022_v43 = vrot.slane %v4802_v6, %v2598_v55 }
 0x2f9   : > { %v2275_v48 = vpop.permute.xlu0 %2274  ;;  %v2442_v34 = vsel %vm2411_vm9, %v7806_v23, %v4374_v22  ;;  %v2426_v10 = vsel %vm2411_vm9, %v7807_v39, %v4373_v56 }
 0x2fa   : > { %v4382_v41 = vpop.permute.xlu1 %4381  ;;  %v2573_v37 = vsel %vm2543_vm10, %v2179_v26, %v2275_v48 }
 0x2fb   : > { %3791 = vmatprep.mubr.msk.f32.mxu1 %vm2600_vm11, %v2573_v37  ;;  %v4384_v4 = vunpack.i.h.bf16 %v4382_v41  ;;  %v4383_v42 = vunpack.i.l.bf16 %v4382_v41 }
 0x2fc   : > { %2911 = vmatmul.mubr.f32.gmra.mrb[26].mxu1 %v2540_v51 }
 0x2fd   : > { %v4377_v27 = vpop.permute.xlu0 %4376 }
 0x2fe   : > { %v2181_v47 = vpop.permute.xlu1 %2180  ;;  %v4379_v59 = vunpack.i.h.bf16 %v4377_v27  ;;  %v4378_v53 = vunpack.i.l.bf16 %v4377_v27 }
 0x300   : > { %v2475_v7 = vsel %vm2444_vm12, %v2442_v34, %v4379_v59  ;;  %v2459_v3 = vsel %vm2444_vm12, %v2426_v10, %v4378_v53 }
 0x301   : > { %v2149_v58 = vpop.permute.xlu0 %2148  ;;  %v2508_v36 = vsel %vm2477_vm13, %v2475_v7, %v4384_v4  ;;  %v2492_v5 = vsel %vm2477_vm13, %v2459_v3, %v4383_v42 }
 0x302   : > { %v2277_v9 = vpop.permute.xlu1 %2276  ;;  %v2541_v32 = vsel %vm2510_vm14, %v2508_v36, %v2181_v47  ;;  %v2525_v19 = vsel %vm2510_vm14, %v2492_v5, %v2149_v58 }
 0x303   : > { %v2574_v61 = vsel %vm2543_vm10, %v2181_v47, %v2277_v9 }
 0x304   : > { %3792 = vmatprep.mubr.msk.f32.mxu1 %vm2600_vm11, %v2574_v61 }
 0x305   : > { %2916 = vmatmul.mubr.f32.gmra.mrb[28].mxu1 %v2541_v32  ;;  %v2245_v54 = vpop.permute.xlu0 %2244 }
 0x306   : > { %v4392_v0 = vpop.permute.xlu1 %4391  ;;  %v2558_v8 = vsel %vm2543_vm10, %v2149_v58, %v2245_v54 }
 0x307   : > { %3776 = vmatprep.mubr.msk.f32.mxu0 %vm2600_vm11, %v2558_v8  ;;  %v4393_v38 = vunpack.i.l.bf16 %v4392_v0  ;;  %v4394_v46 = vunpack.i.h.bf16 %v4392_v0 }
 0x308   : > { %2836 = vmatmul.mubr.f32.gmra.mrb[28].mxu0 %v2525_v19 }
 0x309   : > { %v4387_v14 = vpop.permute.xlu0 %4386 }
 0x30a   : > { %v2151_v28 = vpop.permute.xlu1 %2150  ;;  %v4388_v11 = vunpack.i.l.bf16 %v4387_v14  ;;  %v4389_v31 = vunpack.i.h.bf16 %v4387_v14 }
 0x30c   : > { %v2427_v49 = vsel %vm2411_vm9, %v7808_v62, %v4388_v11  ;;  %v2443_v57 = vsel %vm2411_vm9, %v7809_v24, %v4389_v31 }
 0x30d   : > { %v4397_v52 = vpop.permute.xlu0 %4396  ;;  %v2460_v25 = vsel %vm2444_vm12, %v2427_v49, %v4393_v38  ;;  %v2476_v13 = vsel %vm2444_vm12, %v2443_v57, %v4394_v46 }
 0x30e   : > { %v2247_v35 = vpop.permute.xlu1 %2246  ;;  %v4398_v44 = vunpack.i.l.bf16 %v4397_v52  ;;  %v4399_v29 = vunpack.i.h.bf16 %v4397_v52 }
 0x30f   : > { %v2559_v30 = vsel %vm2543_vm10, %v2151_v28, %v2247_v35 }
 0x310   : > { %3777 = vmatprep.mubr.msk.f32.mxu0 %vm2600_vm11, %v2559_v30  ;;  %v2493_v60 = vsel %vm2477_vm13, %v2460_v25, %v4398_v44  ;;  %v2509_v50 = vsel %vm2477_vm13, %v2476_v13, %v4399_v29 }
 0x311   : > { %v2183_v15 = vpop.permute.xlu0 %2182  ;;  %v2526_v63 = vsel %vm2510_vm14, %v2493_v60, %v2151_v28 }
 0x312   : > { %v7008_v12 = vpop.permute.xlu1 %3278  ;;  %2841 = vmatmul.mubr.f32.gmra.mrb[30].mxu0 %v2526_v63  ;;  %v2542_v18 = vsel %vm2510_vm14, %v2509_v50, %v2183_v15 }
 0x315   : > { %v2279_v1 = vpop.permute.xlu0 %2278 }
 0x316   : > { %v7013_v17 = vpop.permute.xlu1 %3282  ;;  %v2575_v16 = vsel %vm2543_vm10, %v2183_v15, %v2279_v1 }
 0x317   : > { %3793 = vmatprep.mubr.msk.f32.mxu1 %vm2600_vm11, %v2575_v16 }
 0x318   : > { %2921 = vmatmul.mubr.f32.gmra.mrb[30].mxu1 %v2542_v18 }
 0x319   : > { %v7027_v2 = vpop.permute.xlu0 %3280 }
 0x31a   : > { %v7024_v40 = vpop.permute.xlu1 %3286 }
 0x31b   : > { %v2767_v45 = vpop.f32.mrb[0].mxu0 }
 0x31c   : > { %v2768_v26 = vadd.f32 %v2767_v45, %v7022_v43  ;;  %v2769_v20 = vpop.f32.mrb[1].mxu0 }
 0x31d   : > { %v7032_v51 = vpop.permute.xlu0 %3284 }
 0x31e   : > { %v3794_v41 = vmul.f32 -1.442695, %v2768_v26  ;;  %v7029_v21 = vpop.permute.xlu1 %3290  ;;  %v3150_v54 = vadd.f32 0.5, %v2768_v26  ;;  %vm3118_vm15 = vcmp.ge.f32.partialorder %v2768_v26, 0.0 }
 0x320   : > { %4616 = vpow2.f32 %v3794_v41 }
 0x321   : > { %v2847_v48 = vpop.f32.mrb[0].mxu1  ;;  %v7036_v27 = vpop.permute.xlu0 %3288 }
 0x322   : > { %v2848_v37 = vadd.f32 %v2847_v48, %v7022_v43  ;;  %v2849_v22 = vpop.f32.mrb[1].mxu1  ;;  %v7034_v47 = vpop.permute.xlu1 %3294 }
 0x324   : > { %v3810_v56 = vmul.f32 -1.442695, %v2848_v37  ;;  %v3166_v24 = vadd.f32 0.5, %v2848_v37  ;;  %vm3134_vm0 = vcmp.ge.f32.partialorder %v2848_v37, 0.0 }
 0x325   : > { %v7045_v58 = vpop.permute.xlu0 %3292 }
 0x326   : > { %4618 = vpow2.f32 %v3810_v56  ;;  %v7041_v4 = vpop.permute.xlu1 %3298 }
 0x329   : > { %v2852_v59 = vpop.f32.mrb[2].mxu1  ;;  %v7049_v0 = vpop.permute.xlu0 %3296 }
 0x32a   : > { %v4617_v53 = vpop.eup %4616  ;;  %v7039_v23 = vadd.f32 %v2852_v59, %v7022_v43  ;;  %v2854_v34 = vpop.f32.mrb[3].mxu1 }
 0x32b   : > { %v3022_v39 = vadd.f32 1.0, %v4617_v53  ;;  %v7047_v42 = vpop.permute.xlu1 %3302 }
 0x32c   : > { %v3811_v10 = vmul.f32 -1.442695, %v7039_v23  ;;  %v3167_v37 = vadd.f32 0.5, %v7039_v23  ;;  %vm3135_vm2 = vcmp.ge.f32.partialorder %v7039_v23, 0.0 }
 0x32d   : > { %4620 = vrcp.f32 %v3022_v39  ;;  %v2772_v9 = vpop.f32.mrb[2].mxu0  ;;  %v7061_v30 = vpop.permute.xlu0 %3300 }
 0x32e   : > { %4622 = vpow2.f32 %v3811_v10  ;;  %v2773_v7 = vadd.f32 %v2772_v9, %v7022_v43  ;;  %v2774_v61 = vpop.f32.mrb[3].mxu0 }
 0x32f   : > { %v7054_v28 = vpop.permute.xlu1 %3306 }
 0x330   : > { %v4619_v36 = vpop.eup %4618  ;;  %v3795_v3 = vmul.f32 -1.442695, %v2773_v7  ;;  %v3151_v26 = vadd.f32 0.5, %v2773_v7  ;;  %vm3119_vm1 = vcmp.ge.f32.partialorder %v2773_v7, 0.0 }
 0x331   : > { %v3038_v32 = vadd.f32 1.0, %v4619_v36  ;;  %v7071_v63 = vpop.permute.xlu0 %3304 }
 0x332   : > { %4624 = vpow2.f32 %v3795_v3 }
 0x333   : > { %4626 = vrcp.f32 %v3038_v32  ;;  %v3311_v29 = vpop.permute.xlu1 %3310 }
 0x335   : > { %v2857_v5 = vpop.f32.mrb[4].mxu1  ;;  %v7077_v16 = vpop.permute.xlu0 %3308 }
 0x336   : > { %v7052_v8 = vadd.f32 %v2857_v5, %v7022_v43  ;;  %v2859_v19 = vpop.f32.mrb[5].mxu1 }
 0x337   : > { %v7056_v14 = vpop.eup %4620 }
 0x338   : > { %v4623_v11 = vpop.eup %4622  ;;  %v3182_v31 = vsel %vm3118_vm15, %v3150_v54, %v7056_v14  ;;  %v3812_v62 = vmul.f32 -1.442695, %v7052_v8  ;;  %vm3136_vm4 = vcmp.ge.f32.partialorder %v7052_v8, 0.0 }
 0x339   : > { %v3374_v49 = vsub.f32 %v3182_v31, %v7008_v12  ;;  %v3039_v35 = vadd.f32 1.0, %v4623_v11  ;;  %v2777_v38 = vpop.f32.mrb[4].mxu0  ;;  %v3313_v34 = vpop.permute.xlu0 %3312  ;;  %v3168_v11 = vadd.f32 0.5, %v7052_v8 }
 0x33a   : > { %4628 = vpow2.f32 %v3812_v62  ;;  %v7064_v52 = vadd.f32 %v2777_v38, %v7022_v43  ;;  %v2779_v44 = vpop.f32.mrb[5].mxu0 }
 0x33b   : > { %3438 = vrot.lane.b32.xlu1 %v3374_v49, %s4855_s6  ;;  %4630 = vrcp.f32 %v3039_v35  ;;  %v3315_v44 = vpop.permute.xlu1 %3314 }
 0x33c   : > { %v4625_v25 = vpop.eup %4624  ;;  %v3796_v57 = vmul.f32 -1.442695, %v7064_v52  ;;  %v3152_v5 = vadd.f32 0.5, %v7064_v52  ;;  %vm3120_vm3 = vcmp.ge.f32.partialorder %v7064_v52, 0.0 }
 0x33d   : > { %v7068_v60 = vpop.eup %4626  ;;  %v3023_v12 = vadd.f32 1.0, %v4625_v25 }
 0x33e   : > { %4632 = vpow2.f32 %v3796_v57  ;;  %v3198_v46 = vsel %vm3134_vm0, %v3166_v24, %v7068_v60 }
 0x33f   : > { %4634 = vrcp.f32 %v3023_v12  ;;  %v3390_v15 = vsub.f32 %v3198_v46, %v3311_v29 }
 0x341   : > { %3470 = vrot.lane.b32.xlu1 %v3390_v15, %s4855_s6 }
 0x343   : > { %v2782_v13 = vpop.f32.mrb[6].mxu0 }
 0x344   : > { %v4629_v50 = vpop.eup %4628  ;;  %v7075_v1 = vadd.f32 %v2782_v13, %v7022_v43  ;;  %v2784_v33 = vpop.f32.mrb[7].mxu0 }
 0x345   : > { %v3040_v55 = vadd.f32 1.0, %v4629_v50  ;;  %v7080_v6 = vpop.eup %4630 }
 0x346   : > { %v3797_v18 = vmul.f32 -1.442695, %v7075_v1  ;;  %v3199_v39 = vsel %vm3135_vm2, %v3167_v37, %v7080_v6  ;;  %v3153_v8 = vadd.f32 0.5, %v7075_v1  ;;  %vm3121_vm5 = vcmp.ge.f32.partialorder %v7075_v1, 0.0  ;;  %v3317_v1 = vpop.permute.xlu0 %3316 }
 0x347   : > { %v3391_v9 = vsub.f32 %v3199_v39, %v3313_v34 }
 0x348   : > { %v4633_v45 = vpop.eup %4632  ;;  %4636 = vpow2.f32 %v3797_v18 }
 0x349   : > { %v7082_v20 = vpop.eup %4634  ;;  %v3024_v41 = vadd.f32 1.0, %v4633_v45  ;;  %v2862_v48 = vpop.f32.mrb[6].mxu1  ;;  %4638 = vrcp.f32 %v3040_v55 }
 0x34a   : > { %v3183_v22 = vsel %vm3119_vm1, %v3151_v26, %v7082_v20  ;;  %v7087_v56 = vadd.f32 %v2862_v48, %v7022_v43  ;;  %v2864_v59 = vpop.f32.mrb[7].mxu1 }
 0x34b   : > { %4640 = vrcp.f32 %v3024_v41  ;;  %v3375_v53 = vsub.f32 %v3183_v22, %v7027_v2 }
 0x34c   : > { %v3813_v10 = vmul.f32 -1.442695, %v7087_v56  ;;  %v3169_v48 = vadd.f32 0.5, %v7087_v56  ;;  %vm3137_vm6 = vcmp.ge.f32.partialorder %v7087_v56, 0.0 }
 0x34d   : > { %3440 = vrot.lane.b32.xlu0 %v3375_v53, %s4855_s6 }
 0x34e   : > { %4642 = vpow2.f32 %v3813_v10 }
 0x34f   : > { %v2787_v7 = vpop.f32.mrb[8].mxu0 }
 0x350   : > { %v7095_v61 = vadd.f32 %v2787_v7, %v7022_v43  ;;  %v2789_v36 = vpop.f32.mrb[9].mxu0 }
 0x351   : > { %3472 = vrot.lane.b32.xlu0 %v3391_v9, %s4855_s6 }
 0x352   : > { %v4637_v3 = vpop.eup %4636  ;;  %v3798_v23 = vmul.f32 -1.442695, %v7095_v61  ;;  %v3154_v39 = vadd.f32 0.5, %v7095_v61  ;;  %vm3122_vm7 = vcmp.ge.f32.partialorder %v7095_v61, 0.0  ;;  %v3319_v61 = vpop.permute.xlu1 %3318 }
 0x353   : > { %v3025_v2 = vadd.f32 1.0, %v4637_v3  ;;  %v7099_v32 = vpop.eup %4638 }
 0x354   : > { %4644 = vpow2.f32 %v3798_v23  ;;  %v3200_v25 = vsel %vm3136_vm4, %v3168_v11, %v7099_v32 }
 0x355   : > { %v7102_v54 = vpop.eup %4640  ;;  %4646 = vrcp.f32 %v3025_v2  ;;  %v2867_v19 = vpop.f32.mrb[8].mxu1  ;;  %v3392_v57 = vsub.f32 %v3200_v25, %v3315_v44 }
 0x356   : > { %v3184_v31 = vsel %vm3120_vm3, %v3152_v5, %v7102_v54  ;;  %v7108_v62 = vadd.f32 %v2867_v19, %v7022_v43  ;;  %v2869_v49 = vpop.f32.mrb[9].mxu1 }
 0x357   : > { %v3376_v35 = vsub.f32 %v3184_v31, %v7013_v17 }
 0x358   : > { %v4643_v38 = vpop.eup %4642  ;;  %v3814_v52 = vmul.f32 -1.442695, %v7108_v62  ;;  %v3170_v49 = vadd.f32 0.5, %v7108_v62  ;;  %vm3138_vm8 = vcmp.ge.f32.partialorder %v7108_v62, 0.0 }
 0x359   : > { %v3041_v24 = vadd.f32 1.0, %v4643_v38  ;;  %3442 = vrot.lane.b32.xlu1 %v3376_v35, %s4855_s6 }
 0x35a   : > { %4648 = vpow2.f32 %v3814_v52 }
 0x35b   : > { %4650 = vrcp.f32 %v3041_v24 }
 0x35d   : > { %3474 = vrot.lane.b32.xlu1 %v3392_v57, %s4855_s6 }
 0x35e   : > { %v4645_v12 = vpop.eup %4644 }
 0x35f   : > { %v7120_v15 = vpop.eup %4646  ;;  %v3026_v13 = vadd.f32 1.0, %v4645_v12 }
 0x360   : > { %v2872_v29 = vpop.f32.mrb[10].mxu1  ;;  %v3185_v50 = vsel %vm3121_vm5, %v3153_v8, %v7120_v15 }
 0x361   : > { %v7118_v17 = vadd.f32 %v2872_v29, %v7022_v43  ;;  %v2874_v46 = vpop.f32.mrb[11].mxu1  ;;  %4652 = vrcp.f32 %v3026_v13  ;;  %v3377_v18 = vsub.f32 %v3185_v50, %v7032_v51 }
 0x363   : > { %v3815_v33 = vmul.f32 -1.442695, %v7118_v17  ;;  %v2792_v55 = vpop.f32.mrb[10].mxu0  ;;  %3444 = vrot.lane.b32.xlu0 %v3377_v18, %s4855_s6  ;;  %v3171_v18 = vadd.f32 0.5, %v7118_v17  ;;  %vm3139_vm11 = vcmp.ge.f32.partialorder %v7118_v17, 0.0 }
 0x364   : > { %v2793_v45 = vadd.f32 %v2792_v55, %v7022_v43  ;;  %v2794_v26 = vpop.f32.mrb[11].mxu0  ;;  %v4649_v41 = vpop.eup %4648 }
 0x365   : > { %4654 = vpow2.f32 %v3815_v33  ;;  %v7129_v22 = vpop.eup %4650  ;;  %v3042_v59 = vadd.f32 1.0, %v4649_v41 }
 0x366   : > { %v3799_v37 = vmul.f32 -1.442695, %v2793_v45  ;;  %v3201_v53 = vsel %vm3137_vm6, %v3169_v48, %v7129_v22  ;;  %v3155_v62 = vadd.f32 0.5, %v2793_v45  ;;  %vm3123_vm9 = vcmp.ge.f32.partialorder %v2793_v45, 0.0 }
 0x367   : > { %v3393_v51 = vsub.f32 %v3201_v53, %v3317_v1  ;;  %v3321_v1 = vpop.permute.xlu0 %3320 }
 0x368   : > { %4656 = vpow2.f32 %v3799_v37 }
 0x369   : > { %4658 = vrcp.f32 %v3042_v59  ;;  %3476 = vrot.lane.b32.xlu0 %v3393_v51, %s4855_s6 }
 0x36b   : > { %v7138_v7 = vpop.eup %4652 }
 0x36c   : > { %v2877_v34 = vpop.f32.mrb[12].mxu1  ;;  %v3186_v56 = vsel %vm3122_vm7, %v3154_v39, %v7138_v7 }
 0x36d   : > { %v7136_v10 = vadd.f32 %v2877_v34, %v7022_v43  ;;  %v2879_v9 = vpop.f32.mrb[13].mxu1  ;;  %v3378_v5 = vsub.f32 %v3186_v56, %v7024_v40 }
 0x36f   : > { %v4655_v36 = vpop.eup %4654  ;;  %v3816_v3 = vmul.f32 -1.442695, %v7136_v10  ;;  %v2797_v2 = vpop.f32.mrb[12].mxu0  ;;  %3446 = vrot.lane.b32.xlu1 %v3378_v5, %s4855_s6  ;;  %vm3140_vm13 = vcmp.ge.f32.partialorder %v7136_v10, 0.0 }
 0x370   : > { %v3043_v23 = vadd.f32 1.0, %v4655_v36  ;;  %v2798_v19 = vadd.f32 %v2797_v2, %v7022_v43  ;;  %v2799_v11 = vpop.f32.mrb[13].mxu0  ;;  %v3172_v2 = vadd.f32 0.5, %v7136_v10 }
 0x371   : > { %4660 = vpow2.f32 %v3816_v3 }
 0x372   : > { %v4657_v31 = vpop.eup %4656  ;;  %v3800_v35 = vmul.f32 -1.442695, %v2798_v19  ;;  %4662 = vrcp.f32 %v3043_v23  ;;  %v3156_v56 = vadd.f32 0.5, %v2798_v19  ;;  %vm3124_vm12 = vcmp.ge.f32.partialorder %v2798_v19, 0.0 }
 0x373   : > { %v7147_v38 = vpop.eup %4658  ;;  %v3027_v44 = vadd.f32 1.0, %v4657_v31 }
 0x374   : > { %4664 = vpow2.f32 %v3800_v35  ;;  %v3202_v40 = vsel %vm3138_vm8, %v3170_v49, %v7147_v38 }
 0x375   : > { %4666 = vrcp.f32 %v3027_v44  ;;  %v3394_v25 = vsub.f32 %v3202_v40, %v3319_v61  ;;  %v3323_v61 = vpop.permute.xlu1 %3322 }
 0x377   : > { %3478 = vrot.lane.b32.xlu1 %v3394_v25, %s4855_s6 }
 0x379   : > { %v2802_v52 = vpop.f32.mrb[14].mxu0 }
 0x37a   : > { %v7153_v57 = vadd.f32 %v2802_v52, %v7022_v43  ;;  %v2804_v29 = vpop.f32.mrb[15].mxu0 }
 0x37b   : > { %v4661_v24 = vpop.eup %4660 }
 0x37c   : > { %v3044_v12 = vadd.f32 1.0, %v4661_v24  ;;  %v3801_v8 = vmul.f32 -1.442695, %v7153_v57  ;;  %v7156_v46 = vpop.eup %4662  ;;  %v3157_v10 = vadd.f32 0.5, %v7153_v57  ;;  %vm3125_vm14 = vcmp.ge.f32.partialorder %v7153_v57, 0.0 }
 0x37d   : > { %v3203_v59 = vsel %vm3139_vm11, %v3171_v18, %v7156_v46 }
 0x37e   : > { %v4665_v13 = vpop.eup %4664  ;;  %4668 = vpow2.f32 %v3801_v8  ;;  %v3395_v53 = vsub.f32 %v3203_v59, %v3321_v1  ;;  %v3325_v1 = vpop.permute.xlu0 %3324 }
 0x37f   : > { %v7158_v50 = vpop.eup %4666  ;;  %v3028_v33 = vadd.f32 1.0, %v4665_v13  ;;  %v2882_v55 = vpop.f32.mrb[14].mxu1  ;;  %4670 = vrcp.f32 %v3044_v12 }
 0x380   : > { %v3187_v26 = vsel %vm3123_vm9, %v3155_v62, %v7158_v50  ;;  %v7163_v41 = vadd.f32 %v2882_v55, %v7022_v43  ;;  %v2884_v48 = vpop.f32.mrb[15].mxu1  ;;  %v3327_v55 = vpop.permute.xlu1 %3326 }
 0x381   : > { %4672 = vrcp.f32 %v3028_v33  ;;  %v3379_v37 = vsub.f32 %v3187_v26, %v7036_v27 }
 0x382   : > { %v3817_v45 = vmul.f32 -1.442695, %v7163_v41  ;;  %v3173_v57 = vadd.f32 0.5, %v7163_v41  ;;  %vm3141_vm15 = vcmp.ge.f32.partialorder %v7163_v41, 0.0 }
 0x383   : > { %3448 = vrot.lane.b32.xlu0 %v3379_v37, %s4855_s6 }
 0x384   : > { %4674 = vpow2.f32 %v3817_v45 }
 0x385   : > { %v2807_v51 = vpop.f32.mrb[16].mxu0 }
 0x386   : > { %v7171_v34 = vadd.f32 %v2807_v51, %v7022_v43  ;;  %v2809_v39 = vpop.f32.mrb[17].mxu0 }
 0x387   : > { %3480 = vrot.lane.b32.xlu0 %v3395_v53, %s4855_s6  ;;  %v7210_v39 = vpop.permute.xlu1 %3330 }
 0x388   : > { %v4669_v9 = vpop.eup %4668  ;;  %v3802_v17 = vmul.f32 -1.442695, %v7171_v34  ;;  %vm3126_vm0 = vcmp.ge.f32.partialorder %v7171_v34, 0.0 }
 0x389   : > { %v3029_v27 = vadd.f32 1.0, %v4669_v9  ;;  %v7175_v36 = vpop.eup %4670 }
 0x38a   : > { %4676 = vpow2.f32 %v3802_v17  ;;  %v3204_v44 = vsel %vm3140_vm13, %v3172_v2, %v7175_v36  ;;  %v3158_v17 = vadd.f32 0.5, %v7171_v34 }
 0x38b   : > { %v7177_v3 = vpop.eup %4672  ;;  %4678 = vrcp.f32 %v3029_v27  ;;  %v2887_v23 = vpop.f32.mrb[16].mxu1  ;;  %v3396_v25 = vsub.f32 %v3204_v44, %v3323_v61 }
 0x38c   : > { %v3188_v5 = vsel %vm3124_vm12, %v3156_v56, %v7177_v3  ;;  %v7182_v11 = vadd.f32 %v2887_v23, %v7022_v43  ;;  %v2889_v31 = vpop.f32.mrb[17].mxu1 }
 0x38d   : > { %v3380_v49 = vsub.f32 %v3188_v5, %v7029_v21 }
 0x38e   : > { %v4675_v35 = vpop.eup %4674  ;;  %v3818_v19 = vmul.f32 -1.442695, %v7182_v11  ;;  %vm3142_vm1 = vcmp.ge.f32.partialorder %v7182_v11, 0.0 }
 0x38f   : > { %v3045_v40 = vadd.f32 1.0, %v4675_v35  ;;  %3450 = vrot.lane.b32.xlu1 %v3380_v49, %s4855_s6  ;;  %v7223_v49 = vpop.permute.xlu1 %3334 }
 0x390   : > { %4680 = vpow2.f32 %v3818_v19  ;;  %v3174_v19 = vadd.f32 0.5, %v7182_v11 }
 0x391   : > { %4682 = vrcp.f32 %v3045_v40 }
 0x393   : > { %3482 = vrot.lane.b32.xlu1 %v3396_v25, %s4855_s6 }
 0x394   : > { %v2892_v52 = vpop.f32.mrb[18].mxu1  ;;  %v4677_v24 = vpop.eup %4676 }
 0x395   : > { %v7192_v21 = vadd.f32 %v2892_v52, %v7022_v43  ;;  %v2894_v29 = vpop.f32.mrb[19].mxu1  ;;  %v7194_v12 = vpop.eup %4678  ;;  %v3030_v8 = vadd.f32 1.0, %v4677_v24 }
 0x396   : > { %v3189_v13 = vsel %vm3125_vm14, %v3157_v10, %v7194_v12  ;;  %v7235_v29 = vpop.permute.xlu1 %3338 }
 0x397   : > { %v3819_v62 = vmul.f32 -1.442695, %v7192_v21  ;;  %4684 = vrcp.f32 %v3030_v8  ;;  %v3381_v33 = vsub.f32 %v3189_v13, %v7045_v58  ;;  %v2812_v18 = vpop.f32.mrb[18].mxu0  ;;  %v3329_v8 = vpop.permute.xlu0 %3328  ;;  %vm3143_vm3 = vcmp.ge.f32.partialorder %v7192_v21, 0.0 }
 0x398   : > { %v7201_v26 = vadd.f32 %v2812_v18, %v7022_v43  ;;  %v2814_v48 = vpop.f32.mrb[19].mxu0 }
 0x399   : > { %4686 = vpow2.f32 %v3819_v62  ;;  %3452 = vrot.lane.b32.xlu0 %v3381_v33, %s4855_s6 }
 0x39a   : > { %v4681_v37 = vpop.eup %4680  ;;  %v3803_v53 = vmul.f32 -1.442695, %v7201_v26  ;;  %vm3127_vm2 = vcmp.ge.f32.partialorder %v7201_v26, 0.0 }
 0x39b   : > { %v7205_v59 = vpop.eup %4682  ;;  %v3046_v45 = vadd.f32 1.0, %v4681_v37  ;;  %v7238_v11 = vpop.permute.xlu0 %3332 }
 0x39c   : > { %v3205_v58 = vsel %vm3141_vm15, %v3173_v57, %v7205_v59 }
 0x39d   : > { %4688 = vrcp.f32 %v3046_v45  ;;  %v3397_v51 = vsub.f32 %v3205_v58, %v3325_v1  ;;  %v4803_v1 = vld [vmem:[%s6794_s30] sm:$0xff] }
 0x39e   : > { %4690 = vpow2.f32 %v3803_v53 }
 0x39f   : > { %3484 = vrot.lane.b32.xlu0 %v3397_v51, %s4855_s6  ;;  %v3159_v51 = vadd.f32 0.5, %v7201_v26 }
 0x3a0   : > { %v2897_v9 = vpop.f32.mrb[20].mxu1 }
 0x3a1   : > { %v7215_v27 = vadd.f32 %v2897_v9, %v7022_v43  ;;  %v2899_v56 = vpop.f32.mrb[21].mxu1  ;;  %v7217_v23 = vpop.eup %4684 }
 0x3a2   : > { %v3190_v41 = vsel %vm3126_vm0, %v3158_v17, %v7217_v23  ;;  %v7258_v17 = vpop.permute.xlu0 %3336 }
 0x3a3   : > { %v3820_v2 = vmul.f32 -1.442695, %v7215_v27  ;;  %v4687_v5 = vpop.eup %4686  ;;  %v3382_v31 = vsub.f32 %v3190_v41, %v7034_v47  ;;  %v2817_v35 = vpop.f32.mrb[20].mxu0  ;;  %vm3144_vm5 = vcmp.ge.f32.partialorder %v7215_v27, 0.0 }
 0x3a4   : > { %v7226_v61 = vadd.f32 %v2817_v35, %v7022_v43  ;;  %v2819_v44 = vpop.f32.mrb[21].mxu0  ;;  %v3047_v34 = vadd.f32 1.0, %v4687_v5 }
 0x3a5   : > { %4692 = vpow2.f32 %v3820_v2  ;;  %3454 = vrot.lane.b32.xlu1 %v3382_v31, %s4855_s6  ;;  %v3175_v31 = vadd.f32 0.5, %v7192_v21 }
 0x3a6   : > { %v3804_v25 = vmul.f32 -1.442695, %v7226_v61  ;;  %vm3128_vm4 = vcmp.ge.f32.partialorder %v7226_v61, 0.0 }
 0x3a7   : > { %v7230_v40 = vpop.eup %4688 }
 0x3a8   : > { %v4691_v47 = vpop.eup %4690  ;;  %v3206_v52 = vsel %vm3142_vm1, %v3174_v19, %v7230_v40  ;;  %4694 = vpow2.f32 %v3804_v25  ;;  %v4804_v25 = vld [vmem:[%s6794_s30 + $0x80] sm:$0xff] }
 0x3a9   : > { %v3031_v24 = vadd.f32 1.0, %v4691_v47  ;;  %v3398_v10 = vsub.f32 %v3206_v52, %v3327_v55  ;;  %4696 = vrcp.f32 %v3047_v34 }
 0x3ab   : > { %4698 = vrcp.f32 %v3031_v24  ;;  %3486 = vrot.lane.b32.xlu1 %v3398_v10, %s4855_s6  ;;  %v7277_v10 = vpop.permute.xlu0 %3340 }
 0x3ad   : > { %v2822_v62 = vpop.f32.mrb[22].mxu0  ;;  %v3439_v48 = vpop.permute.xlu1 %3438 }
 0x3ae   : > { %v7241_v33 = vadd.f32 %v2822_v62, %v7022_v43  ;;  %v2824_v18 = vpop.f32.mrb[23].mxu0  ;;  %v3534_v55 = vmul.f32 %v7056_v14, %v3439_v48  ;;  %v3160_v48 = vadd.f32 0.5, %v7226_v61 }
 0x3af   : > { %v4693_v13 = vpop.eup %4692 }
 0x3b0   : > { %v3048_v37 = vadd.f32 1.0, %v4693_v13  ;;  %v3805_v57 = vmul.f32 -1.442695, %v7241_v33  ;;  %v3566_v45 = vadd.f32 %v4803_v1, %v3534_v55  ;;  %vm3129_vm6 = vcmp.ge.f32.partialorder %v7241_v33, 0.0 }
 0x3b2   : > { %v4695_v53 = vpop.eup %4694  ;;  %4700 = vpow2.f32 %v3805_v57  ;;  %3598 = vst.msk [vmem:[%s7249_s9] sm:$0xff] %vm2543_vm10, %v3566_v45 }
 0x3b3   : > { %v7253_v58 = vpop.eup %4696  ;;  %v3032_v9 = vadd.f32 1.0, %v4695_v53  ;;  %v2902_v14 = vpop.f32.mrb[22].mxu1  ;;  %4702 = vrcp.f32 %v3048_v37  ;;  %v3176_v37 = vadd.f32 0.5, %v7215_v27 }
 0x3b4   : > { %v7264_v41 = vadd.f32 %v2902_v14, %v7022_v43  ;;  %v2904_v2 = vpop.f32.mrb[23].mxu1  ;;  %v3471_v5 = vpop.permute.xlu1 %3470  ;;  %v3207_v34 = vsel %vm3143_vm3, %v3175_v31, %v7253_v58  ;;  %v4805_v31 = vld [vmem:[%s6794_s30 + $0x8] sm:$0xff] }
 0x3b5   : > { %v7260_v56 = vpop.eup %4698  ;;  %4704 = vrcp.f32 %v3032_v9  ;;  %v3550_v44 = vmul.f32 %v7068_v60, %v3471_v5  ;;  %v3399_v52 = vsub.f32 %v3207_v34, %v3329_v8 }
 0x3b6   : > { %v3191_v35 = vsel %vm3127_vm2, %v3159_v51, %v7260_v56  ;;  %v3821_v19 = vmul.f32 -1.442695, %v7264_v41  ;;  %vm3145_vm7 = vcmp.ge.f32.partialorder %v7264_v41, 0.0 }
 0x3b7   : > { %v3383_v26 = vsub.f32 %v3191_v35, %v7049_v0  ;;  %v3582_v47 = vadd.f32 %v4804_v25, %v3550_v44 }
 0x3b8   : > { %4706 = vpow2.f32 %v3821_v19 }
 0x3b9   : > { %3456 = vrot.lane.b32.xlu0 %v3383_v26, %s4855_s6  ;;  %3614 = vst.msk [vmem:[%s7249_s9 + $0x80] sm:$0xff] %vm2543_vm10, %v3582_v47  ;;  %v3161_v26 = vadd.f32 0.5, %v7241_v33 }
 0x3bc   : > { %v2907_v24 = vpop.f32.mrb[24].mxu1  ;;  %v4701_v13 = vpop.eup %4700 }
 0x3bd   : > { %v7280_v60 = vadd.f32 %v2907_v24, %v7022_v43  ;;  %v2909_v21 = vpop.f32.mrb[25].mxu1  ;;  %3488 = vrot.lane.b32.xlu0 %v3399_v52, %s4855_s6  ;;  %v3033_v0 = vadd.f32 1.0, %v4701_v13  ;;  %v7284_v18 = vpop.eup %4702 }
 0x3be   : > { %v3208_v14 = vsel %vm3144_vm5, %v3176_v37, %v7284_v18 }
 0x3bf   : > { %v3822_v62 = vmul.f32 -1.442695, %v7280_v60  ;;  %v7287_v55 = vpop.eup %4704  ;;  %4708 = vrcp.f32 %v3033_v0  ;;  %v2827_v8 = vpop.f32.mrb[24].mxu0  ;;  %v3400_v27 = vsub.f32 %v3208_v14, %v7210_v39  ;;  %vm3146_vm9 = vcmp.ge.f32.partialorder %v7280_v60, 0.0 }
 0x3c0   : > { %v3192_v57 = vsel %vm3128_vm4, %v3160_v48, %v7287_v55  ;;  %v7293_v1 = vadd.f32 %v2827_v8, %v7022_v43  ;;  %v2829_v45 = vpop.f32.mrb[25].mxu0  ;;  %v3441_v53 = vpop.permute.xlu0 %3440  ;;  %v3177_v48 = vadd.f32 0.5, %v7264_v41 }
 0x3c1   : > { %4710 = vpow2.f32 %v3822_v62  ;;  %v3535_v51 = vmul.f32 %v7082_v20, %v3441_v53  ;;  %v3384_v61 = vsub.f32 %v3192_v57, %v7041_v4  ;;  %v4806_v20 = vld [vmem:[%s6794_s30 + $0x88] sm:$0xff] }
 0x3c2   : > { %v4707_v9 = vpop.eup %4706  ;;  %v3806_v2 = vmul.f32 -1.442695, %v7293_v1  ;;  %vm3130_vm8 = vcmp.ge.f32.partialorder %v7293_v1, 0.0 }
 0x3c3   : > { %v3049_v5 = vadd.f32 1.0, %v4707_v9  ;;  %v3567_v35 = vadd.f32 %v4805_v31, %v3535_v51  ;;  %3458 = vrot.lane.b32.xlu1 %v3384_v61, %s4855_s6 }
 0x3c4   : > { %4712 = vpow2.f32 %v3806_v2  ;;  %v3473_v44 = vpop.permute.xlu0 %3472  ;;  %v4808_v2 = vld [vmem:[%s6794_s30 + $0x90] sm:$0xff] }
 0x3c5   : > { %4714 = vrcp.f32 %v3049_v5  ;;  %3599 = vst.msk [vmem:[%s7249_s9 + $0x8] sm:$0xff] %vm2543_vm10, %v3567_v35  ;;  %v3551_v4 = vmul.f32 %v7080_v6, %v3473_v44 }
 0x3c7   : > { %v3583_v19 = vadd.f32 %v4806_v20, %v3551_v4  ;;  %3490 = vrot.lane.b32.xlu1 %v3400_v27, %s4855_s6 }
 0x3c9   : > { %v7309_v34 = vpop.eup %4708  ;;  %3615 = vst.msk [vmem:[%s7249_s9 + $0x88] sm:$0xff] %vm2543_vm10, %v3583_v19  ;;  %v2832_v25 = vpop.f32.mrb[26].mxu0 }
 0x3ca   : > { %v3193_v39 = vsel %vm3129_vm6, %v3161_v26, %v7309_v34  ;;  %v7316_v52 = vadd.f32 %v2832_v25, %v7022_v43  ;;  %v2834_v6 = vpop.f32.mrb[27].mxu0  ;;  %v3162_v26 = vadd.f32 0.5, %v7293_v1  ;;  %v4809_v25 = vld [vmem:[%s6794_s30 + $0x18] sm:$0xff] }
 0x3cb   : > { %v4711_v47 = vpop.eup %4710  ;;  %v3385_v24 = vsub.f32 %v3193_v39, %v7061_v30  ;;  %v3443_v0 = vpop.permute.xlu1 %3442  ;;  %v4807_v30 = vld [vmem:[%s6794_s30 + $0x10] sm:$0xff] }
 0x3cc   : > { %v3050_v21 = vadd.f32 1.0, %v4711_v47  ;;  %v3807_v13 = vmul.f32 -1.442695, %v7316_v52  ;;  %v3536_v33 = vmul.f32 %v7102_v54, %v3443_v0  ;;  %vm3131_vm11 = vcmp.ge.f32.partialorder %v7316_v52, 0.0 }
 0x3cd   : > { %3460 = vrot.lane.b32.xlu0 %v3385_v24, %s4855_s6  ;;  %v3178_v24 = vadd.f32 0.5, %v7280_v60 }
 0x3ce   : > { %v4713_v62 = vpop.eup %4712  ;;  %4716 = vpow2.f32 %v3807_v13  ;;  %v3568_v57 = vadd.f32 %v4807_v30, %v3536_v33 }
 0x3cf   : > { %v7323_v8 = vpop.eup %4714  ;;  %v3034_v37 = vadd.f32 1.0, %v4713_v62  ;;  %v2912_v45 = vpop.f32.mrb[26].mxu1  ;;  %4718 = vrcp.f32 %v3050_v21 }
 0x3d0   : > { %v3209_v53 = vsel %vm3145_vm7, %v3177_v48, %v7323_v8  ;;  %v7329_v54 = vadd.f32 %v2912_v45, %v7022_v43  ;;  %v2914_v51 = vpop.f32.mrb[27].mxu1  ;;  %v3475_v61 = vpop.permute.xlu1 %3474  ;;  %3600 = vst.msk [vmem:[%s7249_s9 + $0x10] sm:$0xff] %vm2543_vm10, %v3568_v57  ;;  %v4810_v57 = vld [vmem:[%s6794_s30 + $0x98] sm:$0xff] }
 0x3d1   : > { %v3401_v9 = vsub.f32 %v3209_v53, %v7238_v11  ;;  %4720 = vrcp.f32 %v3034_v37  ;;  %v3552_v41 = vmul.f32 %v7099_v32, %v3475_v61  ;;  %v3163_v53 = vadd.f32 0.5, %v7316_v52  ;;  %v4811_v61 = vld [vmem:[%s6794_s30 + $0x20] sm:$0xff] }
 0x3d2   : > { %v3823_v14 = vmul.f32 -1.442695, %v7329_v54  ;;  %vm3147_vm12 = vcmp.ge.f32.partialorder %v7329_v54, 0.0 }
 0x3d3   : > { %v3584_v5 = vadd.f32 %v4808_v2, %v3552_v41  ;;  %3492 = vrot.lane.b32.xlu0 %v3401_v9, %s4855_s6 }
 0x3d4   : > { %4722 = vpow2.f32 %v3823_v14 }
 0x3d5   : > { %3616 = vst.msk [vmem:[%s7249_s9 + $0x90] sm:$0xff] %vm2543_vm10, %v3584_v5  ;;  %v3445_v35 = vpop.permute.xlu0 %3444 }
 0x3d6   : > { %v3537_v27 = vmul.f32 %v7120_v15, %v3445_v35 }
 0x3d8   : > { %v2917_v31 = vpop.f32.mrb[28].mxu1  ;;  %v4717_v32 = vpop.eup %4716  ;;  %v3569_v47 = vadd.f32 %v4809_v25, %v3537_v27 }
 0x3d9   : > { %v7341_v44 = vadd.f32 %v2917_v31, %v7022_v43  ;;  %v2919_v11 = vpop.f32.mrb[29].mxu1  ;;  %v3035_v4 = vadd.f32 1.0, %v4717_v32  ;;  %v7345_v19 = vpop.eup %4718  ;;  %v3179_v32 = vadd.f32 0.5, %v7329_v54 }
 0x3da   : > { %3601 = vst.msk [vmem:[%s7249_s9 + $0x18] sm:$0xff] %vm2543_vm10, %v3569_v47  ;;  %v3210_v48 = vsel %vm3146_vm9, %v3178_v24, %v7345_v19 }
 0x3db   : > { %v3824_v20 = vmul.f32 -1.442695, %v7341_v44  ;;  %v7349_v39 = vpop.eup %4720  ;;  %4724 = vrcp.f32 %v3035_v4  ;;  %v2837_v6 = vpop.f32.mrb[28].mxu0  ;;  %vm3148_vm14 = vcmp.ge.f32.partialorder %v7341_v44, 0.0 }
 0x3dc   : > { %v3194_v15 = vsel %vm3130_vm8, %v3162_v26, %v7349_v39  ;;  %v7357_v21 = vadd.f32 %v2837_v6, %v7022_v43  ;;  %v2839_v13 = vpop.f32.mrb[29].mxu0  ;;  %v3477_v0 = vpop.permute.xlu0 %3476  ;;  %v4812_v26 = vld [vmem:[%s6794_s30 + $0xa0] sm:$0xff] }
 0x3dd   : > { %4726 = vpow2.f32 %v3824_v20  ;;  %v3553_v1 = vmul.f32 %v7129_v22, %v3477_v0  ;;  %v3386_v33 = vsub.f32 %v3194_v15, %v7047_v42  ;;  %v3402_v22 = vsub.f32 %v3210_v48, %v7223_v49 }
 0x3de   : > { %v4723_v62 = vpop.eup %4722  ;;  %v3808_v37 = vmul.f32 -1.442695, %v7357_v21  ;;  %vm3132_vm13 = vcmp.ge.f32.partialorder %v7357_v21, 0.0 }
 0x3df   : > { %v3051_v30 = vadd.f32 1.0, %v4723_v62  ;;  %v3585_v45 = vadd.f32 %v4810_v57, %v3553_v1  ;;  %3462 = vrot.lane.b32.xlu1 %v3386_v33, %s4855_s6 }
 0x3e0   : > { %4728 = vpow2.f32 %v3808_v37  ;;  %v3180_v37 = vadd.f32 0.5, %v7341_v44 }
 0x3e1   : > { %4730 = vrcp.f32 %v3051_v30  ;;  %3617 = vst.msk [vmem:[%s7249_s9 + $0x98] sm:$0xff] %vm2543_vm10, %v3585_v45  ;;  %v3447_v60 = vpop.permute.xlu1 %3446 }
 0x3e2   : > { %v3538_v42 = vmul.f32 %v7138_v7, %v3447_v60 }
 0x3e3   : > { %3494 = vrot.lane.b32.xlu1 %v3402_v22, %s4855_s6 }
 0x3e4   : > { %v3570_v9 = vadd.f32 %v4811_v61, %v3538_v42  ;;  %v4814_v42 = vld [vmem:[%s6794_s30 + $0xa8] sm:$0xff] }
 0x3e5   : > { %v7372_v51 = vpop.eup %4724  ;;  %v2842_v41 = vpop.f32.mrb[30].mxu0 }
 0x3e6   : > { %v3195_v2 = vsel %vm3131_vm11, %v3163_v53, %v7372_v51  ;;  %v7378_v49 = vadd.f32 %v2842_v41, %v7022_v43  ;;  %v2844_v5 = vpop.f32.mrb[31].mxu0  ;;  %3602 = vst.msk [vmem:[%s7249_s9 + $0x20] sm:$0xff] %vm2543_vm10, %v3570_v9 }
 0x3e7   : > { %v4727_v14 = vpop.eup %4726  ;;  %v3387_v7 = vsub.f32 %v3195_v2, %v7071_v63 }
 0x3e8   : > { %v3052_v31 = vadd.f32 1.0, %v4727_v14  ;;  %v3809_v35 = vmul.f32 -1.442695, %v7378_v49  ;;  %vm3133_vm15 = vcmp.ge.f32.partialorder %v7378_v49, 0.0  ;;  %v4815_v14 = vld [vmem:[%s6794_s30 + $0x30] sm:$0xff] }
 0x3e9   : > { %v3479_v11 = vpop.permute.xlu1 %3478  ;;  %3464 = vrot.lane.b32.xlu0 %v3387_v7, %s4855_s6 }
 0x3ea   : > { %v3554_v52 = vmul.f32 %v7147_v38, %v3479_v11  ;;  %v4729_v27 = vpop.eup %4728  ;;  %4732 = vpow2.f32 %v3809_v35 }
 0x3eb   : > { %v7387_v4 = vpop.eup %4730  ;;  %v3036_v20 = vadd.f32 1.0, %v4729_v27  ;;  %v2922_v25 = vpop.f32.mrb[30].mxu1  ;;  %4734 = vrcp.f32 %v3052_v31  ;;  %v4817_v27 = vld [vmem:[%s6794_s30 + $0x38] sm:$0xff] }
 0x3ec   : > { %v3586_v63 = vadd.f32 %v4812_v26, %v3554_v52  ;;  %v3211_v47 = vsel %vm3147_vm12, %v3179_v32, %v7387_v4  ;;  %v2923_v6 = vadd.f32 %v2922_v25, %v7022_v43  ;;  %v2924_v24 = vpop.f32.mrb[31].mxu1  ;;  %v3164_v43 = vadd.f32 0.5, %v7357_v21 }
 0x3ed   : > { %4736 = vrcp.f32 %v3036_v20  ;;  %v3403_v38 = vsub.f32 %v3211_v47, %v7258_v17  ;;  %v4813_v17 = vld [vmem:[%s6794_s30 + $0x28] sm:$0xff] }
 0x3ee   : > { %3618 = vst.msk [vmem:[%s7249_s9 + $0xa0] sm:$0xff] %vm2543_vm10, %v3586_v63  ;;  %v3825_v15 = vmul.f32 -1.442695, %v2923_v6  ;;  %v3181_v31 = vadd.f32 0.5, %v2923_v6  ;;  %vm3149_vm0 = vcmp.ge.f32.partialorder %v2923_v6, 0.0  ;;  %v4818_v63 = vld [vmem:[%s6794_s30 + $0xb8] sm:$0xff] }
 0x3ef   : > { %3496 = vrot.lane.b32.xlu0 %v3403_v38, %s4855_s6 }
 0x3f0   : > { %4738 = vpow2.f32 %v3825_v15 }
 0x3f4   : > { %v4733_v54 = vpop.eup %4732 }
 0x3f5   : > { %v3449_v13 = vpop.permute.xlu0 %3448  ;;  %v3037_v0 = vadd.f32 1.0, %v4733_v54  ;;  %v7398_v33 = vpop.eup %4734 }
 0x3f6   : > { %v3539_v1 = vmul.f32 %v7158_v50, %v3449_v13  ;;  %v3212_v21 = vsel %vm3148_vm14, %v3180_v37, %v7398_v33 }
 0x3f7   : > { %v7401_v62 = vpop.eup %4736  ;;  %4740 = vrcp.f32 %v3037_v0  ;;  %v3404_v44 = vsub.f32 %v3212_v21, %v7235_v29 }
 0x3f8   : > { %v3571_v48 = vadd.f32 %v4813_v17, %v3539_v1  ;;  %v3196_v30 = vsel %vm3132_vm13, %v3164_v43, %v7401_v62 }
 0x3f9   : > { %v3481_v57 = vpop.permute.xlu0 %3480  ;;  %v3388_v45 = vsub.f32 %v3196_v30, %v7054_v28 }
 0x3fa   : > { %3603 = vst.msk [vmem:[%s7249_s9 + $0x28] sm:$0xff] %vm2543_vm10, %v3571_v48  ;;  %v3555_v50 = vmul.f32 %v7156_v46, %v3481_v57  ;;  %v4739_v22 = vpop.eup %4738  ;;  %v3165_v46 = vadd.f32 0.5, %v7378_v49 }
 0x3fb   : > { %v3053_v60 = vadd.f32 1.0, %v4739_v22  ;;  %3466 = vrot.lane.b32.xlu1 %v3388_v45, %s4855_s6 }
 0x3fc   : > { %v3587_v53 = vadd.f32 %v4814_v42, %v3555_v50 }
 0x3fd   : > { %4742 = vrcp.f32 %v3053_v60 }
 0x3fe   : > { %3619 = vst.msk [vmem:[%s7249_s9 + $0xa8] sm:$0xff] %vm2543_vm10, %v3587_v53 }
 0x3ff   : > { %3498 = vrot.lane.b32.xlu1 %v3404_v44, %s4855_s6 }
 0x401   : > { %v3451_v28 = vpop.permute.xlu1 %3450  ;;  %v7420_v61 = vpop.eup %4740 }
 0x402   : > { %v3540_v9 = vmul.f32 %v7177_v3, %v3451_v28  ;;  %v3197_v41 = vsel %vm3133_vm15, %v3165_v46, %v7420_v61  ;;  %v4816_v3 = vld [vmem:[%s6794_s30 + $0xb0] sm:$0xff] }
 0x403   : > { %v3389_v5 = vsub.f32 %v3197_v41, %v7077_v16 }
 0x404   : > { %v3572_v2 = vadd.f32 %v4815_v14, %v3540_v9 }
 0x405   : > { %v3483_v29 = vpop.permute.xlu1 %3482  ;;  %3468 = vrot.lane.b32.xlu0 %v3389_v5, %s4855_s6 }
 0x406   : > { %3604 = vst.msk [vmem:[%s7249_s9 + $0x30] sm:$0xff] %vm2543_vm10, %v3572_v2  ;;  %v3556_v7 = vmul.f32 %v7175_v36, %v3483_v29 }
 0x407   : > { %v7431_v49 = vpop.eup %4742 }
 0x408   : > { %v3588_v35 = vadd.f32 %v4816_v3, %v3556_v7  ;;  %v3213_v11 = vsel %vm3149_vm0, %v3181_v31, %v7431_v49 }
 0x409   : > { %v3405_v16 = vsub.f32 %v3213_v11, %v7277_v10 }
 0x40a   : > { %3620 = vst.msk [vmem:[%s7249_s9 + $0xb0] sm:$0xff] %vm2543_vm10, %v3588_v35 }
 0x40b   : > { %v3453_v52 = vpop.permute.xlu0 %3452  ;;  %3500 = vrot.lane.b32.xlu0 %v3405_v16, %s4855_s6 }
 0x40c   : > { %v3541_v36 = vmul.f32 %v7194_v12, %v3453_v52  ;;  %v4819_v12 = vld [vmem:[%s6794_s30 + $0x40] sm:$0xff] }
 0x40e   : > { %v3573_v32 = vadd.f32 %v4817_v27, %v3541_v36 }
 0x410   : > { %3605 = vst.msk [vmem:[%s7249_s9 + $0x38] sm:$0xff] %vm2543_vm10, %v3573_v32  ;;  %v4832_v32 = vld [vmem:[%s6794_s30 + $0xf0] sm:$0xff] }
 0x411   : > { %v3485_v20 = vpop.permute.xlu0 %3484 }
 0x412   : > { %v3557_v26 = vmul.f32 %v7205_v59, %v3485_v20  ;;  %v4820_v59 = vld [vmem:[%s6794_s30 + $0xc0] sm:$0xff] }
 0x414   : > { %v3589_v25 = vadd.f32 %v4818_v63, %v3557_v26  ;;  %v4833_v63 = vld [vmem:[%s6794_s30 + $0x78] sm:$0xff] }
 0x416   : > { %3621 = vst.msk [vmem:[%s7249_s9 + $0xb8] sm:$0xff] %vm2543_vm10, %v3589_v25 }
 0x417   : > { %v3455_v10 = vpop.permute.xlu1 %3454 }
 0x418   : > { %v3542_v47 = vmul.f32 %v7217_v23, %v3455_v10  ;;  %v4821_v23 = vld [vmem:[%s6794_s30 + $0x48] sm:$0xff] }
 0x41a   : > { %v3574_v6 = vadd.f32 %v4819_v12, %v3542_v47  ;;  %v4834_v47 = vld [vmem:[%s6794_s30 + $0xf8] sm:$0xff] }
 0x41c   : > { %3606 = vst.msk [vmem:[%s7249_s9 + $0x40] sm:$0xff] %vm2543_vm10, %v3574_v6 }
 0x41d   : > { %v3487_v24 = vpop.permute.xlu1 %3486 }
 0x41e   : > { %v3558_v38 = vmul.f32 %v7230_v40, %v3487_v24  ;;  %v4822_v40 = vld [vmem:[%s6794_s30 + $0xc8] sm:$0xff] }
 0x420   : > { %v3590_v15 = vadd.f32 %v4820_v59, %v3558_v38 }
 0x422   : > { %3622 = vst.msk [vmem:[%s7249_s9 + $0xc0] sm:$0xff] %vm2543_vm10, %v3590_v15 }
 0x42b   : > { %v3457_v54 = vpop.permute.xlu0 %3456 }
 0x42c   : > { %v3543_v13 = vmul.f32 %v7260_v56, %v3457_v54  ;;  %v4823_v56 = vld [vmem:[%s6794_s30 + $0x50] sm:$0xff] }
 0x42e   : > { %v3575_v0 = vadd.f32 %v4821_v23, %v3543_v13 }
 0x42f   : > { %v3489_v1 = vpop.permute.xlu0 %3488 }
 0x430   : > { %3607 = vst.msk [vmem:[%s7249_s9 + $0x48] sm:$0xff] %vm2543_vm10, %v3575_v0  ;;  %v3559_v43 = vmul.f32 %v7253_v58, %v3489_v1  ;;  %v4824_v58 = vld [vmem:[%s6794_s30 + $0xd0] sm:$0xff] }
 0x432   : > { %v3591_v17 = vadd.f32 %v4822_v40, %v3559_v43 }
 0x434   : > { %3623 = vst.msk [vmem:[%s7249_s9 + $0xc8] sm:$0xff] %vm2543_vm10, %v3591_v17 }
 0x435   : > { %v3459_v48 = vpop.permute.xlu1 %3458 }
 0x436   : > { %v3544_v37 = vmul.f32 %v7287_v55, %v3459_v48  ;;  %v4825_v55 = vld [vmem:[%s6794_s30 + $0x58] sm:$0xff] }
 0x438   : > { %v3576_v30 = vadd.f32 %v4823_v56, %v3544_v37 }
 0x439   : > { %v3491_v57 = vpop.permute.xlu1 %3490 }
 0x43a   : > { %3608 = vst.msk [vmem:[%s7249_s9 + $0x50] sm:$0xff] %vm2543_vm10, %v3576_v30  ;;  %v3560_v50 = vmul.f32 %v7284_v18, %v3491_v57  ;;  %v4826_v18 = vld [vmem:[%s6794_s30 + $0xd8] sm:$0xff] }
 0x43c   : > { %v3592_v45 = vadd.f32 %v4824_v58, %v3560_v50 }
 0x43e   : > { %3624 = vst.msk [vmem:[%s7249_s9 + $0xd0] sm:$0xff] %vm2543_vm10, %v3592_v45 }
 0x43f   : > { %v3461_v22 = vpop.permute.xlu0 %3460 }
 0x440   : > { %v3545_v21 = vmul.f32 %v7309_v34, %v3461_v22  ;;  %v4827_v34 = vld [vmem:[%s6794_s30 + $0x60] sm:$0xff] }
 0x442   : > { %v3577_v60 = vadd.f32 %v4825_v55, %v3545_v21 }
 0x444   : > { %3609 = vst.msk [vmem:[%s7249_s9 + $0x58] sm:$0xff] %vm2543_vm10, %v3577_v60 }
 0x445   : > { %v3493_v42 = vpop.permute.xlu0 %3492 }
 0x446   : > { %v3561_v53 = vmul.f32 %v7323_v8, %v3493_v42  ;;  %v4828_v8 = vld [vmem:[%s6794_s30 + $0xe0] sm:$0xff] }
 0x448   : > { %v3593_v44 = vadd.f32 %v4826_v18, %v3561_v53 }
 0x44a   : > { %3625 = vst.msk [vmem:[%s7249_s9 + $0xd8] sm:$0xff] %vm2543_vm10, %v3593_v44 }
 0x451   : > { %v3463_v46 = vpop.permute.xlu1 %3462 }
 0x452   : > { %v3546_v28 = vmul.f32 %v7349_v39, %v3463_v46  ;;  %v4829_v39 = vld [vmem:[%s6794_s30 + $0x68] sm:$0xff] }
 0x454   : > { %v3578_v9 = vadd.f32 %v4827_v34, %v3546_v28 }
 0x455   : > { %v3495_v41 = vpop.permute.xlu1 %3494 }
 0x456   : > { %3610 = vst.msk [vmem:[%s7249_s9 + $0x60] sm:$0xff] %vm2543_vm10, %v3578_v9  ;;  %v3562_v14 = vmul.f32 %v7345_v19, %v3495_v41  ;;  %v4830_v19 = vld [vmem:[%s6794_s30 + $0xe8] sm:$0xff] }
 0x458   : > { %v3594_v2 = vadd.f32 %v4828_v8, %v3562_v14 }
 0x45a   : > { %3626 = vst.msk [vmem:[%s7249_s9 + $0xe0] sm:$0xff] %vm2543_vm10, %v3594_v2 }
 0x45b   : > { %v3465_v5 = vpop.permute.xlu0 %3464 }
 0x45c   : > { %v3547_v29 = vmul.f32 %v7372_v51, %v3465_v5  ;;  %v4831_v51 = vld [vmem:[%s6794_s30 + $0x70] sm:$0xff] }
 0x45e   : > { %v3579_v7 = vadd.f32 %v4829_v39, %v3547_v29 }
 0x460   : > { %3611 = vst.msk [vmem:[%s7249_s9 + $0x68] sm:$0xff] %vm2543_vm10, %v3579_v7 }
 0x461   : > { %v3497_v31 = vpop.permute.xlu0 %3496 }
 0x462   : > { %v3563_v3 = vmul.f32 %v7387_v4, %v3497_v31 }
 0x464   : > { %v3595_v35 = vadd.f32 %v4830_v19, %v3563_v3 }
 0x466   : > { %3627 = vst.msk [vmem:[%s7249_s9 + $0xe8] sm:$0xff] %vm2543_vm10, %v3595_v35 }
 0x46d   : > { %v3467_v11 = vpop.permute.xlu1 %3466 }
 0x46e   : > { %v3548_v16 = vmul.f32 %v7401_v62, %v3467_v11 }
 0x470   : > { %v3580_v52 = vadd.f32 %v4831_v51, %v3548_v16 }
 0x471   : > { %v3499_v36 = vpop.permute.xlu1 %3498 }
 0x472   : > { %3612 = vst.msk [vmem:[%s7249_s9 + $0x70] sm:$0xff] %vm2543_vm10, %v3580_v52  ;;  %v3564_v27 = vmul.f32 %v7398_v33, %v3499_v36 }
 0x474   : > { %v3596_v4 = vadd.f32 %v4832_v32, %v3564_v27 }
 0x476   : > { %3628 = vst.msk [vmem:[%s7249_s9 + $0xf0] sm:$0xff] %vm2543_vm10, %v3596_v4 }
 0x477   : > { %v3469_v20 = vpop.permute.xlu0 %3468 }
 0x478   : > { %v3549_v26 = vmul.f32 %v7420_v61, %v3469_v20 }
 0x47a   : > { %v3581_v25 = vadd.f32 %v4833_v63, %v3549_v26 }
 0x47c   : > { %3613 = vst.msk [vmem:[%s7249_s9 + $0x78] sm:$0xff] %vm2543_vm10, %v3581_v25 }
 0x47d   : > { %v3501_v62 = vpop.permute.xlu0 %3500 }
 0x47e   : > { %v3565_v10 = vmul.f32 %v7431_v49, %v3501_v62 }
 0x480   : > { %v3597_v12 = vadd.f32 %v4834_v47, %v3565_v10 }
 0x482   : > { %3629 = vst.msk [vmem:[%s7249_s9 + $0xf8] sm:$0xff] %vm2543_vm10, %v3597_v12 }
 0x483 PF: > { %s14_s15 = sadd.s32 1, %s4841_s15  }
 0x484   : > { %p11_p4 = scmp.ge.s32.totalorder %s14_s15, 4  }
 0x486   :  { %13 = sbr.rel (!%p11_p4) target bundleno = 1 (0x1), region = 69 }

</bundles_post_ra>
